<compile_context>
chip_gen: v7x
topology: tpu7x:2x2x1
jax: 0.10.0
libtpu: 0.0.40
codegen_flags: <defaults>
</compile_context>

<pallas_src>
import functools
import math

import jax
import jax.numpy as jnp
from jax import lax
from jax.experimental import pallas as pl
from jax.experimental.pallas import tpu as pltpu

NEG_INF = -1.0e10


# -----------------------------------------------------------------------------
# Fused decoder-layer kernel factory (one batch element per grid step)
# -----------------------------------------------------------------------------
def _make_decoder_layer_kernel(*, n_heads, head_dim, eps, causal, return_attn,
                               mxu_dtype):

    def _mm(a, b):
        # 2-D matmul: MXU operands in mxu_dtype, f32 accumulation.
        return jnp.dot(a.astype(mxu_dtype), b.astype(mxu_dtype),
                       preferred_element_type=jnp.float32)

    def _mm_nt(a, b):
        # a @ b.T on the MXU (contract the last dim of both operands).
        return lax.dot_general(a.astype(mxu_dtype), b.astype(mxu_dtype),
                               (((1,), (1,)), ((), ())),
                               preferred_element_type=jnp.float32)

    def softmax_rows(s):
        # Row softmax; the divide is moved onto the EUP (approx reciprocal +
        # one Newton step).  exp / reciprocal math stays in f32.
        m = jnp.max(s, axis=-1, keepdims=True)
        p = jnp.exp(s - m)
        d = jnp.sum(p, axis=-1, keepdims=True)
        r = pl.reciprocal(d, approx=True)
        r = r * (2.0 - d * r)                 # Newton refinement -> f32-grade
        return p * r

    def add_ln(x, y, g, b):
        z = x + y
        mu = jnp.mean(z, axis=-1, keepdims=True)
        c = z - mu
        var = jnp.mean(c * c, axis=-1, keepdims=True)
        return c * lax.rsqrt(var + eps) * g + b

    def mha(xq, xkv, bias, wq, bq, wk, bk, wv, bv, wo, bo, attn_ref, ctx_ref):
        # Full-H projections; 1/sqrt(head_dim) is pre-folded into wq/bq.
        q = _mm(xq, wq[...]) + bq[...]          # [Tq, H] f32
        k = _mm(xkv, wk[...]) + bk[...]         # [Tk, H] f32
        v = _mm(xkv, wv[...]) + bv[...]         # [Tk, H] f32
        attns = []
        # TODO(synk): for production head_dim (>=128) / many heads replace this
        # statically unrolled loop with a head-batched dot_general
        # ('bqd,bkd->bqk') or lax.fori_loop(..., unroll=True) so vreg live
        # ranges stay bounded, and KV-tile flash-style at long sequences.
        for h in range(n_heads):
            sl = slice(h * head_dim, (h + 1) * head_dim)
            s = _mm_nt(q[:, sl], k[:, sl]) + bias          # [Tq, Tk]
            a = softmax_rows(s)
            if return_attn:
                attns.append(a)
            # Stage per-head context into the [Tq, H] VMEM slab so the output
            # projection is ONE K=H contraction instead of n_heads K=head_dim
            # matmuls (tiny contracting dims waste the 128/256-row MXU).
            ctx_ref[:, sl] = _mm(a, v[:, sl])
        if return_attn:
            # One coalesced store per attention call (v5e: single vst slot).
            attn_ref[0] = jnp.stack(attns, axis=0)
        return _mm(ctx_ref[...], wo[...]) + bo[...]

    def kernel(*refs):
        it = iter(refs)
        trg_ref = next(it)                                  # [1, T, H]
        enc_ref = next(it)                                  # [1, S, H]
        smask_ref = next(it)                                # [1, 1, S] int8
        tmask_ref = None if causal else next(it)            # [1, T, T] int8
        (sa_wq, sa_bq, sa_wk, sa_bk, sa_wv, sa_bv, sa_wo, sa_bo,
         ln1_g, ln1_b,
         ca_wq, ca_bq, ca_wk, ca_bk, ca_wv, ca_bv, ca_wo, ca_bo,
         ln2_g, ln2_b,
         ff_w1, ff_b1, ff_w2, ff_b2,
         ln3_g, ln3_b) = (next(it) for _ in range(26))
        out_ref = next(it)
        self_attn_ref = next(it) if return_attn else None
        cross_attn_ref = next(it) if return_attn else None
        ctx_ref = next(it)                                  # VMEM [T, H] f32

        trg = trg_ref[0]        # [T, H]
        enc = enc_ref[0]        # [S, H]
        T = trg.shape[0]

        # Additive score biases computed ONCE per attention call.
        if causal:
            rows = lax.broadcasted_iota(jnp.int32, (T, T), 0)
            cols = lax.broadcasted_iota(jnp.int32, (T, T), 1)
            self_bias = jnp.where(rows >= cols, 0.0, NEG_INF)           # [T, T]
        else:
            self_bias = (tmask_ref[0].astype(jnp.float32) - 1.0) * 1.0e10
        cross_bias = (smask_ref[0].astype(jnp.float32) - 1.0) * 1.0e10  # [1, S]

        # 1) masked self-attention + residual + LayerNorm (dropout = identity)
        sa = mha(trg, trg, self_bias,
                 sa_wq, sa_bq, sa_wk, sa_bk, sa_wv, sa_bv, sa_wo, sa_bo,
                 self_attn_ref, ctx_ref)
        x1 = add_ln(trg, sa, ln1_g[...], ln1_b[...])

        # 2) encoder (cross) attention + residual + LayerNorm
        ca = mha(x1, enc, cross_bias,
                 ca_wq, ca_bq, ca_wk, ca_bk, ca_wv, ca_bv, ca_wo, ca_bo,
                 cross_attn_ref, ctx_ref)
        x2 = add_ln(x1, ca, ln2_g[...], ln2_b[...])

        # 3) position-wise feed-forward + residual + LayerNorm
        hidden = jnp.maximum(_mm(x2, ff_w1[...]) + ff_b1[...], 0.0)
        ff = _mm(hidden, ff_w2[...]) + ff_b2[...]
        out_ref[0] = add_ln(x2, ff, ln3_g[...], ln3_b[...])

    return kernel


# -----------------------------------------------------------------------------
# Wrapper: single fused pallas_call for the whole decoder layer
# -----------------------------------------------------------------------------
def decoder_layer_forward(params, trg, enc_src, trg_mask, src_mask, n_heads,
                          *, eps=1e-5, mxu_dtype=jnp.float32,
                          causal_trg_mask=False, return_attn=True):
    """trg: [B,T,H], enc_src: [B,S,H], trg_mask: [B,1,T,T], src_mask: [B,1,1,S]."""
    B, T, H = trg.shape
    S = enc_src.shape[1]
    head_dim = H // n_heads
    inv_scale = 1.0 / math.sqrt(head_dim)

    # ---- parameter prep (constant-folded under jit) -------------------------
    # Weights -> MXU dtype; 1/sqrt(head_dim) folded into the Q projection;
    # 1-D biases / LN params reshaped to (1, dim) once (stay f32: elementwise
    # math stays f32, esp. on v5e with no bf16 VPU/EUP).
    def prep_mha(p):
        wq, bq, wk, bk, wv, bv, wo, bo = p
        return ((wq * inv_scale).astype(mxu_dtype), (bq * inv_scale).reshape(1, -1),
                wk.astype(mxu_dtype), bk.reshape(1, -1),
                wv.astype(mxu_dtype), bv.reshape(1, -1),
                wo.astype(mxu_dtype), bo.reshape(1, -1))

    def prep_ln(p):
        g, b = p
        return g.reshape(1, -1), b.reshape(1, -1)

    w1, b1, w2, b2 = params["ffn"]
    param_arrays = (*prep_mha(params["self_attn"]), *prep_ln(params["ln_self"]),
                    *prep_mha(params["cross_attn"]), *prep_ln(params["ln_enc"]),
                    w1.astype(mxu_dtype), b1.reshape(1, -1),
                    w2.astype(mxu_dtype), b2.reshape(1, -1),
                    *prep_ln(params["ln_ff"]))

    # Compact int8 masks (4x less DMA than f32, no [B,Tq,Tk] pre-broadcast).
    smask = (src_mask[:, 0] != 0).astype(jnp.int8)              # [B, 1, S]
    data_inputs = [trg, enc_src, smask]
    data_specs = [pl.BlockSpec((1, T, H), lambda b: (b, 0, 0)),
                  pl.BlockSpec((1, S, H), lambda b: (b, 0, 0)),
                  pl.BlockSpec((1, 1, S), lambda b: (b, 0, 0))]
    if not causal_trg_mask:
        tmask = (trg_mask[:, 0] != 0).astype(jnp.int8)          # [B, T, T]
        data_inputs.append(tmask)
        data_specs.append(pl.BlockSpec((1, T, T), lambda b: (b, 0, 0)))
    # else: causal mask is generated in-kernel (zero DMA, batch-invariant).

    def rep(arr):
        # Grid-invariant parameter block: constant index_map -> fetched once.
        # TODO(synk): on v7x (64 MiB VMEM) single-buffer these weight blocks
        # (pipeline_mode=pl.Buffered(1)) once weights are production-sized.
        nd = arr.ndim
        return pl.BlockSpec(arr.shape, lambda b: (0,) * nd)

    out_specs = [pl.BlockSpec((1, T, H), lambda b: (b, 0, 0))]
    out_shape = [jax.ShapeDtypeStruct((B, T, H), jnp.float32)]
    if return_attn:
        out_specs += [pl.BlockSpec((1, n_heads, T, T), lambda b: (b, 0, 0, 0)),
                      pl.BlockSpec((1, n_heads, T, S), lambda b: (b, 0, 0, 0))]
        out_shape += [jax.ShapeDtypeStruct((B, n_heads, T, T), jnp.float32),
                      jax.ShapeDtypeStruct((B, n_heads, T, S), jnp.float32)]

    kernel = _make_decoder_layer_kernel(
        n_heads=n_heads, head_dim=head_dim, eps=eps, causal=causal_trg_mask,
        return_attn=return_attn, mxu_dtype=mxu_dtype)

    # TODO(synk): at production T add a second "parallel" grid axis over
    # query-sequence tiles (feeds v7x's 2 TensorCores) and KV-tile the
    # attention flash-style so the [nh,Tq,Tk] score slab never materializes.
    results = pl.pallas_call(
        kernel,
        grid=(B,),
        in_specs=[*data_specs, *[rep(p) for p in param_arrays]],
        out_specs=out_specs,
        out_shape=out_shape,
        scratch_shapes=[pltpu.VMEM((T, H), jnp.float32)],   # per-head ctx slab
        compiler_params=pltpu.CompilerParams(
            dimension_semantics=("parallel",),
            vmem_limit_bytes=64 * 1024 * 1024),
    )(*data_inputs, *param_arrays)

    if return_attn:
        out, self_attn, cross_attn = results
        # Match PyTorch return order: (trg, cross_attention, self_attention)
        return out, cross_attn, self_attn
    return results[0] if isinstance(results, (list, tuple)) else results


# -----------------------------------------------------------------------------
# Pure-JAX reference (for correctness check)
# -----------------------------------------------------------------------------
def _ref_mha(q, k, v, mask4, p, nh):
    wq, bq, wk, bk, wv, bv, wo, bo = p
    B, Tq, H = q.shape
    Tk = k.shape[1]
    hd = H // nh
    Q = (q @ wq + bq).reshape(B, Tq, nh, hd).transpose(0, 2, 1, 3)
    K = (k @ wk + bk).reshape(B, Tk, nh, hd).transpose(0, 2, 1, 3)
    V = (v @ wv + bv).reshape(B, Tk, nh, hd).transpose(0, 2, 1, 3)
    energy = jnp.einsum("bhqd,bhkd->bhqk", Q, K) / math.sqrt(hd)
    energy = jnp.where(mask4 == 0.0, -1.0e10, energy)
    attn = jax.nn.softmax(energy, axis=-1)
    x = jnp.einsum("bhqk,bhkd->bhqd", attn, V).transpose(0, 2, 1, 3).reshape(B, Tq, H)
    return x @ wo + bo, attn


def _ref_ln(z, gamma, beta, eps=1e-5):
    mean = jnp.mean(z, axis=-1, keepdims=True)
    var = jnp.mean((z - mean) ** 2, axis=-1, keepdims=True)
    return (z - mean) / jnp.sqrt(var + eps) * gamma + beta


def ref_decoder_layer(params, trg, enc_src, trg_mask, src_mask, n_heads):
    _trg, sa = _ref_mha(trg, trg, trg, trg_mask, params["self_attn"], n_heads)
    t1 = _ref_ln(trg + _trg, *params["ln_self"])
    _trg, ca = _ref_mha(t1, enc_src, enc_src, src_mask, params["cross_attn"], n_heads)
    t2 = _ref_ln(t1 + _trg, *params["ln_enc"])
    w1, b1, w2, b2 = params["ffn"]
    _trg = jnp.maximum(t2 @ w1 + b1, 0.0) @ w2 + b2
    t3 = _ref_ln(t2 + _trg, *params["ln_ff"])
    return t3, ca, sa


# -----------------------------------------------------------------------------
# Main
# -----------------------------------------------------------------------------
if __name__ == "__main__":
    B, T, S = 2, 8, 16          # batch, target seq len, source seq len
    HID, N_HEADS, PF = 32, 4, 64

    key = jax.random.PRNGKey(0)
    ks = iter(jax.random.split(key, 32))

    def lin(in_d, out_d):
        # weight stored pre-transposed as [in_d, out_d]
        w = jax.random.normal(next(ks), (in_d, out_d), jnp.float32) * 0.05
        b = jax.random.normal(next(ks), (out_d,), jnp.float32) * 0.05
        return w, b

    def mha_params():
        return (*lin(HID, HID), *lin(HID, HID), *lin(HID, HID), *lin(HID, HID))

    params = {
        "self_attn": mha_params(),
        "cross_attn": mha_params(),
        "ffn": (*lin(HID, PF), *lin(PF, HID)),
        "ln_self": (jnp.ones((HID,), jnp.float32), jnp.zeros((HID,), jnp.float32)),
        "ln_enc": (jnp.ones((HID,), jnp.float32), jnp.zeros((HID,), jnp.float32)),
        "ln_ff": (jnp.ones((HID,), jnp.float32), jnp.zeros((HID,), jnp.float32)),
    }

    trg = jax.random.normal(next(ks), (B, T, HID), jnp.float32)
    enc_src = jax.random.normal(next(ks), (B, S, HID), jnp.float32)
    # causal target mask [B,1,T,T]; source padding mask [B,1,1,S]
    trg_mask = jnp.tril(jnp.ones((T, T), jnp.float32))[None, None].repeat(B, 0)
    src_valid = jnp.array([[1.0] * S, [1.0] * (S - 3) + [0.0] * 3], jnp.float32)
    src_mask = src_valid[:, None, None, :]

    ref_out, ref_ca, ref_sa = ref_decoder_layer(params, trg, enc_src,
                                                trg_mask, src_mask, N_HEADS)

    # --- f32 run: explicit int8 trg_mask path, attention maps returned -------
    fwd_f32 = jax.jit(functools.partial(
        decoder_layer_forward, n_heads=N_HEADS, mxu_dtype=jnp.float32,
        causal_trg_mask=False, return_attn=True))
    out, cross_attn, self_attn = fwd_f32(params, trg, enc_src, trg_mask, src_mask)
    jax.block_until_ready(out)
    assert jnp.allclose(out, ref_out, rtol=2e-3, atol=2e-3)
    assert jnp.allclose(cross_attn, ref_ca, rtol=2e-3, atol=2e-3)
    assert jnp.allclose(self_attn, ref_sa, rtol=2e-3, atol=2e-3)

    # --- production-mode run: bf16 MXU operands, in-kernel causal mask,
    #     no attention-map writeback ------------------------------------------
    fwd_bf16 = jax.jit(functools.partial(
        decoder_layer_forward, n_heads=N_HEADS, mxu_dtype=jnp.bfloat16,
        causal_trg_mask=True, return_attn=False))
    out_bf16 = fwd_bf16(params, trg, enc_src, trg_mask, src_mask)
    jax.block_until_ready(out_bf16)
    assert jnp.allclose(out_bf16, ref_out, rtol=5e-2, atol=5e-2)

    print("KERNEL_OK")
</pallas_src>

<mosaic_0001>
module attributes {stable_mosaic.version = 11 : i64} {
  func.func @kernel(%arg0: i32, %arg1: memref<1x8x32xf32, #tpu.memory_space<vmem>>, %arg2: memref<1x16x32xf32, #tpu.memory_space<vmem>>, %arg3: memref<1x1x16xi8, #tpu.memory_space<vmem>>, %arg4: memref<1x8x8xi8, #tpu.memory_space<vmem>>, %arg5: memref<32x32xf32, #tpu.memory_space<vmem>>, %arg6: memref<1x32xf32, #tpu.memory_space<vmem>>, %arg7: memref<32x32xf32, #tpu.memory_space<vmem>>, %arg8: memref<1x32xf32, #tpu.memory_space<vmem>>, %arg9: memref<32x32xf32, #tpu.memory_space<vmem>>, %arg10: memref<1x32xf32, #tpu.memory_space<vmem>>, %arg11: memref<32x32xf32, #tpu.memory_space<vmem>>, %arg12: memref<1x32xf32, #tpu.memory_space<vmem>>, %arg13: memref<1x32xf32, #tpu.memory_space<vmem>>, %arg14: memref<1x32xf32, #tpu.memory_space<vmem>>, %arg15: memref<32x32xf32, #tpu.memory_space<vmem>>, %arg16: memref<1x32xf32, #tpu.memory_space<vmem>>, %arg17: memref<32x32xf32, #tpu.memory_space<vmem>>, %arg18: memref<1x32xf32, #tpu.memory_space<vmem>>, %arg19: memref<32x32xf32, #tpu.memory_space<vmem>>, %arg20: memref<1x32xf32, #tpu.memory_space<vmem>>, %arg21: memref<32x32xf32, #tpu.memory_space<vmem>>, %arg22: memref<1x32xf32, #tpu.memory_space<vmem>>, %arg23: memref<1x32xf32, #tpu.memory_space<vmem>>, %arg24: memref<1x32xf32, #tpu.memory_space<vmem>>, %arg25: memref<32x64xf32, #tpu.memory_space<vmem>>, %arg26: memref<1x64xf32, #tpu.memory_space<vmem>>, %arg27: memref<64x32xf32, #tpu.memory_space<vmem>>, %arg28: memref<1x32xf32, #tpu.memory_space<vmem>>, %arg29: memref<1x32xf32, #tpu.memory_space<vmem>>, %arg30: memref<1x32xf32, #tpu.memory_space<vmem>>, %arg31: memref<1x8x32xf32, #tpu.memory_space<vmem>>, %arg32: memref<1x4x8x8xf32, #tpu.memory_space<vmem>>, %arg33: memref<1x4x8x16xf32, #tpu.memory_space<vmem>>, %arg34: memref<8x32xf32, #tpu.memory_space<vmem>>) attributes {dimension_semantics = [#tpu.dimension_semantics<parallel>], iteration_bounds = array<i64: 2>, scalar_prefetch = 0 : i64, scratch_operands = 1 : i64, tpu.core_type = #tpu.core_type<tc>, window_params = [{transform_indices = @transform_0, window_bounds = array<i64: 1, 8, 32>}, {transform_indices = @transform_1, window_bounds = array<i64: 1, 16, 32>}, {transform_indices = @transform_2, window_bounds = array<i64: 1, 1, 16>}, {transform_indices = @transform_3, window_bounds = array<i64: 1, 8, 8>}, {pipeline_mode = #tpu.pipeline_mode<synchronous>, transform_indices = @transform_4, window_bounds = array<i64: 32, 32>}, {pipeline_mode = #tpu.pipeline_mode<synchronous>, transform_indices = @transform_5, window_bounds = array<i64: 1, 32>}, {pipeline_mode = #tpu.pipeline_mode<synchronous>, transform_indices = @transform_6, window_bounds = array<i64: 32, 32>}, {pipeline_mode = #tpu.pipeline_mode<synchronous>, transform_indices = @transform_7, window_bounds = array<i64: 1, 32>}, {pipeline_mode = #tpu.pipeline_mode<synchronous>, transform_indices = @transform_8, window_bounds = array<i64: 32, 32>}, {pipeline_mode = #tpu.pipeline_mode<synchronous>, transform_indices = @transform_9, window_bounds = array<i64: 1, 32>}, {pipeline_mode = #tpu.pipeline_mode<synchronous>, transform_indices = @transform_10, window_bounds = array<i64: 32, 32>}, {pipeline_mode = #tpu.pipeline_mode<synchronous>, transform_indices = @transform_11, window_bounds = array<i64: 1, 32>}, {pipeline_mode = #tpu.pipeline_mode<synchronous>, transform_indices = @transform_12, window_bounds = array<i64: 1, 32>}, {pipeline_mode = #tpu.pipeline_mode<synchronous>, transform_indices = @transform_13, window_bounds = array<i64: 1, 32>}, {pipeline_mode = #tpu.pipeline_mode<synchronous>, transform_indices = @transform_14, window_bounds = array<i64: 32, 32>}, {pipeline_mode = #tpu.pipeline_mode<synchronous>, transform_indices = @transform_15, window_bounds = array<i64: 1, 32>}, {pipeline_mode = #tpu.pipeline_mode<synchronous>, transform_indices = @transform_16, window_bounds = array<i64: 32, 32>}, {pipeline_mode = #tpu.pipeline_mode<synchronous>, transform_indices = @transform_17, window_bounds = array<i64: 1, 32>}, {pipeline_mode = #tpu.pipeline_mode<synchronous>, transform_indices = @transform_18, window_bounds = array<i64: 32, 32>}, {pipeline_mode = #tpu.pipeline_mode<synchronous>, transform_indices = @transform_19, window_bounds = array<i64: 1, 32>}, {pipeline_mode = #tpu.pipeline_mode<synchronous>, transform_indices = @transform_20, window_bounds = array<i64: 32, 32>}, {pipeline_mode = #tpu.pipeline_mode<synchronous>, transform_indices = @transform_21, window_bounds = array<i64: 1, 32>}, {pipeline_mode = #tpu.pipeline_mode<synchronous>, transform_indices = @transform_22, window_bounds = array<i64: 1, 32>}, {pipeline_mode = #tpu.pipeline_mode<synchronous>, transform_indices = @transform_23, window_bounds = array<i64: 1, 32>}, {pipeline_mode = #tpu.pipeline_mode<synchronous>, transform_indices = @transform_24, window_bounds = array<i64: 32, 64>}, {pipeline_mode = #tpu.pipeline_mode<synchronous>, transform_indices = @transform_25, window_bounds = array<i64: 1, 64>}, {pipeline_mode = #tpu.pipeline_mode<synchronous>, transform_indices = @transform_26, window_bounds = array<i64: 64, 32>}, {pipeline_mode = #tpu.pipeline_mode<synchronous>, transform_indices = @transform_27, window_bounds = array<i64: 1, 32>}, {pipeline_mode = #tpu.pipeline_mode<synchronous>, transform_indices = @transform_28, window_bounds = array<i64: 1, 32>}, {pipeline_mode = #tpu.pipeline_mode<synchronous>, transform_indices = @transform_29, window_bounds = array<i64: 1, 32>}, {transform_indices = @transform_30, window_bounds = array<i64: 1, 8, 32>}, {transform_indices = @transform_31, window_bounds = array<i64: 1, 4, 8, 8>}, {transform_indices = @transform_32, window_bounds = array<i64: 1, 4, 8, 16>}]} {
    %c0 = arith.constant 0 : index
    %c0_0 = arith.constant 0 : index
    %c0_1 = arith.constant 0 : index
    %0 = vector.load %arg1[%c0, %c0_0, %c0_1] : memref<1x8x32xf32, #tpu.memory_space<vmem>>, vector<1x8x32xf32>
    %1 = vector.shape_cast %0 : vector<1x8x32xf32> to vector<8x32xf32>
    %c0_2 = arith.constant 0 : index
    %c0_3 = arith.constant 0 : index
    %c0_4 = arith.constant 0 : index
    %2 = vector.load %arg2[%c0_2, %c0_3, %c0_4] : memref<1x16x32xf32, #tpu.memory_space<vmem>>, vector<1x16x32xf32>
    %3 = vector.shape_cast %2 : vector<1x16x32xf32> to vector<16x32xf32>
    %c0_5 = arith.constant 0 : index
    %c0_6 = arith.constant 0 : index
    %c0_7 = arith.constant 0 : index
    %4 = vector.load %arg4[%c0_5, %c0_6, %c0_7] : memref<1x8x8xi8, #tpu.memory_space<vmem>>, vector<1x8x8xi8>
    %5 = vector.shape_cast %4 : vector<1x8x8xi8> to vector<8x8xi8>
    %6 = arith.sitofp %5 : vector<8x8xi8> to vector<8x8xf32>
    %cst = arith.constant 1.000000e+00 : f32
    %7 = vector.broadcast %cst : f32 to vector<8x8xf32>
    %8 = arith.subf %6, %7 : vector<8x8xf32>
    %cst_8 = arith.constant 1.000000e+10 : f32
    %9 = vector.broadcast %cst_8 : f32 to vector<8x8xf32>
    %10 = arith.mulf %8, %9 : vector<8x8xf32>
    %c0_9 = arith.constant 0 : index
    %c0_10 = arith.constant 0 : index
    %c0_11 = arith.constant 0 : index
    %11 = vector.load %arg3[%c0_9, %c0_10, %c0_11] : memref<1x1x16xi8, #tpu.memory_space<vmem>>, vector<1x1x16xi8>
    %12 = vector.shape_cast %11 : vector<1x1x16xi8> to vector<1x16xi8>
    %13 = arith.sitofp %12 : vector<1x16xi8> to vector<1x16xf32>
    %cst_12 = arith.constant 1.000000e+00 : f32
    %14 = vector.broadcast %cst_12 : f32 to vector<1x16xf32>
    %15 = arith.subf %13, %14 : vector<1x16xf32>
    %cst_13 = arith.constant 1.000000e+10 : f32
    %16 = vector.broadcast %cst_13 : f32 to vector<1x16xf32>
    %17 = arith.mulf %15, %16 : vector<1x16xf32>
    %c0_14 = arith.constant 0 : index
    %c0_15 = arith.constant 0 : index
    %18 = vector.load %arg5[%c0_14, %c0_15] : memref<32x32xf32, #tpu.memory_space<vmem>>, vector<32x32xf32>
    %cst_16 = arith.constant dense<0.000000e+00> : vector<8x32xf32>
    %19 = tpu.matmul %1, %18, %cst_16 {dimension_numbers = #tpu.dot_dimension_numbers<[1], [0], [0], [1], [0, 0, 1, 1], [], []>} : vector<8x32xf32>, vector<32x32xf32>, vector<8x32xf32> -> vector<8x32xf32>
    %c0_17 = arith.constant 0 : index
    %c0_18 = arith.constant 0 : index
    %20 = vector.load %arg6[%c0_17, %c0_18] : memref<1x32xf32, #tpu.memory_space<vmem>>, vector<1x32xf32>
    %21 = vector.broadcast %20 : vector<1x32xf32> to vector<8x32xf32>
    %22 = arith.addf %19, %21 : vector<8x32xf32>
    %c0_19 = arith.constant 0 : index
    %c0_20 = arith.constant 0 : index
    %23 = vector.load %arg7[%c0_19, %c0_20] : memref<32x32xf32, #tpu.memory_space<vmem>>, vector<32x32xf32>
    %cst_21 = arith.constant dense<0.000000e+00> : vector<8x32xf32>
    %24 = tpu.matmul %1, %23, %cst_21 {dimension_numbers = #tpu.dot_dimension_numbers<[1], [0], [0], [1], [0, 0, 1, 1], [], []>} : vector<8x32xf32>, vector<32x32xf32>, vector<8x32xf32> -> vector<8x32xf32>
    %c0_22 = arith.constant 0 : index
    %c0_23 = arith.constant 0 : index
    %25 = vector.load %arg8[%c0_22, %c0_23] : memref<1x32xf32, #tpu.memory_space<vmem>>, vector<1x32xf32>
    %26 = vector.broadcast %25 : vector<1x32xf32> to vector<8x32xf32>
    %27 = arith.addf %24, %26 : vector<8x32xf32>
    %c0_24 = arith.constant 0 : index
    %c0_25 = arith.constant 0 : index
    %28 = vector.load %arg9[%c0_24, %c0_25] : memref<32x32xf32, #tpu.memory_space<vmem>>, vector<32x32xf32>
    %cst_26 = arith.constant dense<0.000000e+00> : vector<8x32xf32>
    %29 = tpu.matmul %1, %28, %cst_26 {dimension_numbers = #tpu.dot_dimension_numbers<[1], [0], [0], [1], [0, 0, 1, 1], [], []>} : vector<8x32xf32>, vector<32x32xf32>, vector<8x32xf32> -> vector<8x32xf32>
    %c0_27 = arith.constant 0 : index
    %c0_28 = arith.constant 0 : index
    %30 = vector.load %arg10[%c0_27, %c0_28] : memref<1x32xf32, #tpu.memory_space<vmem>>, vector<1x32xf32>
    %31 = vector.broadcast %30 : vector<1x32xf32> to vector<8x32xf32>
    %32 = arith.addf %29, %31 : vector<8x32xf32>
    %33 = vector.extract_strided_slice %22 {offsets = [0, 0], sizes = [8, 8], strides = [1, 1]} : vector<8x32xf32> to vector<8x8xf32>
    %34 = vector.extract_strided_slice %27 {offsets = [0, 0], sizes = [8, 8], strides = [1, 1]} : vector<8x32xf32> to vector<8x8xf32>
    %cst_29 = arith.constant dense<0.000000e+00> : vector<8x8xf32>
    %35 = tpu.matmul %33, %34, %cst_29 {dimension_numbers = #tpu.dot_dimension_numbers<[1], [1], [0], [0], [0, 0, 1, 0], [], []>} : vector<8x8xf32>, vector<8x8xf32>, vector<8x8xf32> -> vector<8x8xf32>
    %36 = arith.addf %35, %10 : vector<8x8xf32>
    %cst_30 = arith.constant dense<0xFF800000> : vector<8xf32>
    %37 = vector.multi_reduction <maximumf>, %36, %cst_30 [1] : vector<8x8xf32> to vector<8xf32>
    %38 = vector.shape_cast %37 : vector<8xf32> to vector<8x1xf32>
    %39 = vector.broadcast %38 : vector<8x1xf32> to vector<8x8xf32>
    %40 = arith.subf %36, %39 : vector<8x8xf32>
    %41 = math.exp %40 : vector<8x8xf32>
    %cst_31 = arith.constant dense<0.000000e+00> : vector<8xf32>
    %42 = vector.multi_reduction <add>, %41, %cst_31 [1] : vector<8x8xf32> to vector<8xf32>
    %43 = vector.shape_cast %42 : vector<8xf32> to vector<8x1xf32>
    %44 = tpu.reciprocal %43 {approx = true} : vector<8x1xf32> -> vector<8x1xf32>
    %45 = arith.mulf %43, %44 : vector<8x1xf32>
    %cst_32 = arith.constant 2.000000e+00 : f32
    %46 = vector.broadcast %cst_32 : f32 to vector<8x1xf32>
    %47 = arith.subf %46, %45 : vector<8x1xf32>
    %48 = arith.mulf %44, %47 : vector<8x1xf32>
    %49 = vector.broadcast %48 : vector<8x1xf32> to vector<8x8xf32>
    %50 = arith.mulf %41, %49 : vector<8x8xf32>
    %51 = vector.extract_strided_slice %32 {offsets = [0, 0], sizes = [8, 8], strides = [1, 1]} : vector<8x32xf32> to vector<8x8xf32>
    %cst_33 = arith.constant dense<0.000000e+00> : vector<8x8xf32>
    %52 = tpu.matmul %50, %51, %cst_33 {dimension_numbers = #tpu.dot_dimension_numbers<[1], [0], [0], [1], [0, 0, 1, 1], [], []>} : vector<8x8xf32>, vector<8x8xf32>, vector<8x8xf32> -> vector<8x8xf32>
    %c0_34 = arith.constant 0 : index
    %c0_35 = arith.constant 0 : index
    %53 = vector.load %arg34[%c0_34, %c0_35] : memref<8x32xf32, #tpu.memory_space<vmem>>, vector<8x8xf32>
    tpu.vector_store %arg34[%c0_34, %c0_35], %52 {strides = array<i32>} : memref<8x32xf32, #tpu.memory_space<vmem>>, vector<8x8xf32>,
    %54 = vector.extract_strided_slice %22 {offsets = [0, 8], sizes = [8, 8], strides = [1, 1]} : vector<8x32xf32> to vector<8x8xf32>
    %55 = vector.extract_strided_slice %27 {offsets = [0, 8], sizes = [8, 8], strides = [1, 1]} : vector<8x32xf32> to vector<8x8xf32>
    %cst_36 = arith.constant dense<0.000000e+00> : vector<8x8xf32>
    %56 = tpu.matmul %54, %55, %cst_36 {dimension_numbers = #tpu.dot_dimension_numbers<[1], [1], [0], [0], [0, 0, 1, 0], [], []>} : vector<8x8xf32>, vector<8x8xf32>, vector<8x8xf32> -> vector<8x8xf32>
    %57 = arith.addf %56, %10 : vector<8x8xf32>
    %cst_37 = arith.constant dense<0xFF800000> : vector<8xf32>
    %58 = vector.multi_reduction <maximumf>, %57, %cst_37 [1] : vector<8x8xf32> to vector<8xf32>
    %59 = vector.shape_cast %58 : vector<8xf32> to vector<8x1xf32>
    %60 = vector.broadcast %59 : vector<8x1xf32> to vector<8x8xf32>
    %61 = arith.subf %57, %60 : vector<8x8xf32>
    %62 = math.exp %61 : vector<8x8xf32>
    %cst_38 = arith.constant dense<0.000000e+00> : vector<8xf32>
    %63 = vector.multi_reduction <add>, %62, %cst_38 [1] : vector<8x8xf32> to vector<8xf32>
    %64 = vector.shape_cast %63 : vector<8xf32> to vector<8x1xf32>
    %65 = tpu.reciprocal %64 {approx = true} : vector<8x1xf32> -> vector<8x1xf32>
    %66 = arith.mulf %64, %65 : vector<8x1xf32>
    %cst_39 = arith.constant 2.000000e+00 : f32
    %67 = vector.broadcast %cst_39 : f32 to vector<8x1xf32>
    %68 = arith.subf %67, %66 : vector<8x1xf32>
    %69 = arith.mulf %65, %68 : vector<8x1xf32>
    %70 = vector.broadcast %69 : vector<8x1xf32> to vector<8x8xf32>
    %71 = arith.mulf %62, %70 : vector<8x8xf32>
    %72 = vector.extract_strided_slice %32 {offsets = [0, 8], sizes = [8, 8], strides = [1, 1]} : vector<8x32xf32> to vector<8x8xf32>
    %cst_40 = arith.constant dense<0.000000e+00> : vector<8x8xf32>
    %73 = tpu.matmul %71, %72, %cst_40 {dimension_numbers = #tpu.dot_dimension_numbers<[1], [0], [0], [1], [0, 0, 1, 1], [], []>} : vector<8x8xf32>, vector<8x8xf32>, vector<8x8xf32> -> vector<8x8xf32>
    %c0_41 = arith.constant 0 : index
    %c8 = arith.constant 8 : index
    %74 = vector.load %arg34[%c0_41, %c8] : memref<8x32xf32, #tpu.memory_space<vmem>>, vector<8x8xf32>
    tpu.vector_store %arg34[%c0_41, %c8], %73 {strides = array<i32>} : memref<8x32xf32, #tpu.memory_space<vmem>>, vector<8x8xf32>,
    %75 = vector.extract_strided_slice %22 {offsets = [0, 16], sizes = [8, 8], strides = [1, 1]} : vector<8x32xf32> to vector<8x8xf32>
    %76 = vector.extract_strided_slice %27 {offsets = [0, 16], sizes = [8, 8], strides = [1, 1]} : vector<8x32xf32> to vector<8x8xf32>
    %cst_42 = arith.constant dense<0.000000e+00> : vector<8x8xf32>
    %77 = tpu.matmul %75, %76, %cst_42 {dimension_numbers = #tpu.dot_dimension_numbers<[1], [1], [0], [0], [0, 0, 1, 0], [], []>} : vector<8x8xf32>, vector<8x8xf32>, vector<8x8xf32> -> vector<8x8xf32>
    %78 = arith.addf %77, %10 : vector<8x8xf32>
    %cst_43 = arith.constant dense<0xFF800000> : vector<8xf32>
    %79 = vector.multi_reduction <maximumf>, %78, %cst_43 [1] : vector<8x8xf32> to vector<8xf32>
    %80 = vector.shape_cast %79 : vector<8xf32> to vector<8x1xf32>
    %81 = vector.broadcast %80 : vector<8x1xf32> to vector<8x8xf32>
    %82 = arith.subf %78, %81 : vector<8x8xf32>
    %83 = math.exp %82 : vector<8x8xf32>
    %cst_44 = arith.constant dense<0.000000e+00> : vector<8xf32>
    %84 = vector.multi_reduction <add>, %83, %cst_44 [1] : vector<8x8xf32> to vector<8xf32>
    %85 = vector.shape_cast %84 : vector<8xf32> to vector<8x1xf32>
    %86 = tpu.reciprocal %85 {approx = true} : vector<8x1xf32> -> vector<8x1xf32>
    %87 = arith.mulf %85, %86 : vector<8x1xf32>
    %cst_45 = arith.constant 2.000000e+00 : f32
    %88 = vector.broadcast %cst_45 : f32 to vector<8x1xf32>
    %89 = arith.subf %88, %87 : vector<8x1xf32>
    %90 = arith.mulf %86, %89 : vector<8x1xf32>
    %91 = vector.broadcast %90 : vector<8x1xf32> to vector<8x8xf32>
    %92 = arith.mulf %83, %91 : vector<8x8xf32>
    %93 = vector.extract_strided_slice %32 {offsets = [0, 16], sizes = [8, 8], strides = [1, 1]} : vector<8x32xf32> to vector<8x8xf32>
    %cst_46 = arith.constant dense<0.000000e+00> : vector<8x8xf32>
    %94 = tpu.matmul %92, %93, %cst_46 {dimension_numbers = #tpu.dot_dimension_numbers<[1], [0], [0], [1], [0, 0, 1, 1], [], []>} : vector<8x8xf32>, vector<8x8xf32>, vector<8x8xf32> -> vector<8x8xf32>
    %c0_47 = arith.constant 0 : index
    %c16 = arith.constant 16 : index
    %95 = vector.load %arg34[%c0_47, %c16] : memref<8x32xf32, #tpu.memory_space<vmem>>, vector<8x8xf32>
    tpu.vector_store %arg34[%c0_47, %c16], %94 {strides = array<i32>} : memref<8x32xf32, #tpu.memory_space<vmem>>, vector<8x8xf32>,
    %96 = vector.extract_strided_slice %22 {offsets = [0, 24], sizes = [8, 8], strides = [1, 1]} : vector<8x32xf32> to vector<8x8xf32>
    %97 = vector.extract_strided_slice %27 {offsets = [0, 24], sizes = [8, 8], strides = [1, 1]} : vector<8x32xf32> to vector<8x8xf32>
    %cst_48 = arith.constant dense<0.000000e+00> : vector<8x8xf32>
    %98 = tpu.matmul %96, %97, %cst_48 {dimension_numbers = #tpu.dot_dimension_numbers<[1], [1], [0], [0], [0, 0, 1, 0], [], []>} : vector<8x8xf32>, vector<8x8xf32>, vector<8x8xf32> -> vector<8x8xf32>
    %99 = arith.addf %98, %10 : vector<8x8xf32>
    %cst_49 = arith.constant dense<0xFF800000> : vector<8xf32>
    %100 = vector.multi_reduction <maximumf>, %99, %cst_49 [1] : vector<8x8xf32> to vector<8xf32>
    %101 = vector.shape_cast %100 : vector<8xf32> to vector<8x1xf32>
    %102 = vector.broadcast %101 : vector<8x1xf32> to vector<8x8xf32>
    %103 = arith.subf %99, %102 : vector<8x8xf32>
    %104 = math.exp %103 : vector<8x8xf32>
    %cst_50 = arith.constant dense<0.000000e+00> : vector<8xf32>
    %105 = vector.multi_reduction <add>, %104, %cst_50 [1] : vector<8x8xf32> to vector<8xf32>
    %106 = vector.shape_cast %105 : vector<8xf32> to vector<8x1xf32>
    %107 = tpu.reciprocal %106 {approx = true} : vector<8x1xf32> -> vector<8x1xf32>
    %108 = arith.mulf %106, %107 : vector<8x1xf32>
    %cst_51 = arith.constant 2.000000e+00 : f32
    %109 = vector.broadcast %cst_51 : f32 to vector<8x1xf32>
    %110 = arith.subf %109, %108 : vector<8x1xf32>
    %111 = arith.mulf %107, %110 : vector<8x1xf32>
    %112 = vector.broadcast %111 : vector<8x1xf32> to vector<8x8xf32>
    %113 = arith.mulf %104, %112 : vector<8x8xf32>
    %114 = vector.extract_strided_slice %32 {offsets = [0, 24], sizes = [8, 8], strides = [1, 1]} : vector<8x32xf32> to vector<8x8xf32>
    %cst_52 = arith.constant dense<0.000000e+00> : vector<8x8xf32>
    %115 = tpu.matmul %113, %114, %cst_52 {dimension_numbers = #tpu.dot_dimension_numbers<[1], [0], [0], [1], [0, 0, 1, 1], [], []>} : vector<8x8xf32>, vector<8x8xf32>, vector<8x8xf32> -> vector<8x8xf32>
    %c0_53 = arith.constant 0 : index
    %c24 = arith.constant 24 : index
    %116 = vector.load %arg34[%c0_53, %c24] : memref<8x32xf32, #tpu.memory_space<vmem>>, vector<8x8xf32>
    tpu.vector_store %arg34[%c0_53, %c24], %115 {strides = array<i32>} : memref<8x32xf32, #tpu.memory_space<vmem>>, vector<8x8xf32>,
    %117 = vector.shape_cast %50 : vector<8x8xf32> to vector<1x8x8xf32>
    %118 = vector.shape_cast %71 : vector<8x8xf32> to vector<1x8x8xf32>
    %119 = vector.shape_cast %92 : vector<8x8xf32> to vector<1x8x8xf32>
    %120 = vector.shape_cast %113 : vector<8x8xf32> to vector<1x8x8xf32>
    %121 = tpu.concatenate %117, %118, %119, %120 in 0 : vector<1x8x8xf32>, vector<1x8x8xf32>, vector<1x8x8xf32>, vector<1x8x8xf32> -> vector<4x8x8xf32>
    %c0_54 = arith.constant 0 : index
    %c0_55 = arith.constant 0 : index
    %c0_56 = arith.constant 0 : index
    %c0_57 = arith.constant 0 : index
    %122 = vector.load %arg32[%c0_54, %c0_55, %c0_56, %c0_57] : memref<1x4x8x8xf32, #tpu.memory_space<vmem>>, vector<1x4x8x8xf32>
    %123 = vector.shape_cast %122 : vector<1x4x8x8xf32> to vector<4x8x8xf32>
    %124 = vector.shape_cast %121 : vector<4x8x8xf32> to vector<1x4x8x8xf32>
    tpu.vector_store %arg32[%c0_54, %c0_55, %c0_56, %c0_57], %124 {strides = array<i32>} : memref<1x4x8x8xf32, #tpu.memory_space<vmem>>, vector<1x4x8x8xf32>,
    %c0_58 = arith.constant 0 : index
    %c0_59 = arith.constant 0 : index
    %125 = vector.load %arg34[%c0_58, %c0_59] : memref<8x32xf32, #tpu.memory_space<vmem>>, vector<8x32xf32>
    %c0_60 = arith.constant 0 : index
    %c0_61 = arith.constant 0 : index
    %126 = vector.load %arg11[%c0_60, %c0_61] : memref<32x32xf32, #tpu.memory_space<vmem>>, vector<32x32xf32>
    %cst_62 = arith.constant dense<0.000000e+00> : vector<8x32xf32>
    %127 = tpu.matmul %125, %126, %cst_62 {dimension_numbers = #tpu.dot_dimension_numbers<[1], [0], [0], [1], [0, 0, 1, 1], [], []>} : vector<8x32xf32>, vector<32x32xf32>, vector<8x32xf32> -> vector<8x32xf32>
    %c0_63 = arith.constant 0 : index
    %c0_64 = arith.constant 0 : index
    %128 = vector.load %arg12[%c0_63, %c0_64] : memref<1x32xf32, #tpu.memory_space<vmem>>, vector<1x32xf32>
    %129 = vector.broadcast %128 : vector<1x32xf32> to vector<8x32xf32>
    %130 = arith.addf %127, %129 : vector<8x32xf32>
    %c0_65 = arith.constant 0 : index
    %c0_66 = arith.constant 0 : index
    %131 = vector.load %arg13[%c0_65, %c0_66] : memref<1x32xf32, #tpu.memory_space<vmem>>, vector<1x32xf32>
    %c0_67 = arith.constant 0 : index
    %c0_68 = arith.constant 0 : index
    %132 = vector.load %arg14[%c0_67, %c0_68] : memref<1x32xf32, #tpu.memory_space<vmem>>, vector<1x32xf32>
    %133 = arith.addf %1, %130 : vector<8x32xf32>
    %cst_69 = arith.constant dense<0.000000e+00> : vector<8xf32>
    %134 = vector.multi_reduction <add>, %133, %cst_69 [1] : vector<8x32xf32> to vector<8xf32>
    %135 = vector.shape_cast %134 : vector<8xf32> to vector<8x1xf32>
    %cst_70 = arith.constant 3.200000e+01 : f32
    %136 = vector.broadcast %cst_70 : f32 to vector<8x1xf32>
    %137 = arith.divf %135, %136 : vector<8x1xf32>
    %138 = vector.broadcast %137 : vector<8x1xf32> to vector<8x32xf32>
    %139 = arith.subf %133, %138 : vector<8x32xf32>
    %140 = arith.mulf %139, %139 : vector<8x32xf32>
    %cst_71 = arith.constant dense<0.000000e+00> : vector<8xf32>
    %141 = vector.multi_reduction <add>, %140, %cst_71 [1] : vector<8x32xf32> to vector<8xf32>
    %142 = vector.shape_cast %141 : vector<8xf32> to vector<8x1xf32>
    %cst_72 = arith.constant 3.200000e+01 : f32
    %143 = vector.broadcast %cst_72 : f32 to vector<8x1xf32>
    %144 = arith.divf %142, %143 : vector<8x1xf32>
    %cst_73 = arith.constant 9.99999974E-6 : f32
    %145 = vector.broadcast %cst_73 : f32 to vector<8x1xf32>
    %146 = arith.addf %144, %145 : vector<8x1xf32>
    %147 = math.rsqrt %146 : vector<8x1xf32>
    %148 = vector.broadcast %147 : vector<8x1xf32> to vector<8x32xf32>
    %149 = arith.mulf %139, %148 : vector<8x32xf32>
    %150 = vector.broadcast %131 : vector<1x32xf32> to vector<8x32xf32>
    %151 = arith.mulf %149, %150 : vector<8x32xf32>
    %152 = vector.broadcast %132 : vector<1x32xf32> to vector<8x32xf32>
    %153 = arith.addf %151, %152 : vector<8x32xf32>
    %c0_74 = arith.constant 0 : index
    %c0_75 = arith.constant 0 : index
    %154 = vector.load %arg15[%c0_74, %c0_75] : memref<32x32xf32, #tpu.memory_space<vmem>>, vector<32x32xf32>
    %cst_76 = arith.constant dense<0.000000e+00> : vector<8x32xf32>
    %155 = tpu.matmul %153, %154, %cst_76 {dimension_numbers = #tpu.dot_dimension_numbers<[1], [0], [0], [1], [0, 0, 1, 1], [], []>} : vector<8x32xf32>, vector<32x32xf32>, vector<8x32xf32> -> vector<8x32xf32>
    %c0_77 = arith.constant 0 : index
    %c0_78 = arith.constant 0 : index
    %156 = vector.load %arg16[%c0_77, %c0_78] : memref<1x32xf32, #tpu.memory_space<vmem>>, vector<1x32xf32>
    %157 = vector.broadcast %156 : vector<1x32xf32> to vector<8x32xf32>
    %158 = arith.addf %155, %157 : vector<8x32xf32>
    %c0_79 = arith.constant 0 : index
    %c0_80 = arith.constant 0 : index
    %159 = vector.load %arg17[%c0_79, %c0_80] : memref<32x32xf32, #tpu.memory_space<vmem>>, vector<32x32xf32>
    %cst_81 = arith.constant dense<0.000000e+00> : vector<16x32xf32>
    %160 = tpu.matmul %3, %159, %cst_81 {dimension_numbers = #tpu.dot_dimension_numbers<[1], [0], [0], [1], [0, 0, 1, 1], [], []>} : vector<16x32xf32>, vector<32x32xf32>, vector<16x32xf32> -> vector<16x32xf32>
    %c0_82 = arith.constant 0 : index
    %c0_83 = arith.constant 0 : index
    %161 = vector.load %arg18[%c0_82, %c0_83] : memref<1x32xf32, #tpu.memory_space<vmem>>, vector<1x32xf32>
    %162 = vector.broadcast %161 : vector<1x32xf32> to vector<16x32xf32>
    %163 = arith.addf %160, %162 : vector<16x32xf32>
    %c0_84 = arith.constant 0 : index
    %c0_85 = arith.constant 0 : index
    %164 = vector.load %arg19[%c0_84, %c0_85] : memref<32x32xf32, #tpu.memory_space<vmem>>, vector<32x32xf32>
    %cst_86 = arith.constant dense<0.000000e+00> : vector<16x32xf32>
    %165 = tpu.matmul %3, %164, %cst_86 {dimension_numbers = #tpu.dot_dimension_numbers<[1], [0], [0], [1], [0, 0, 1, 1], [], []>} : vector<16x32xf32>, vector<32x32xf32>, vector<16x32xf32> -> vector<16x32xf32>
    %c0_87 = arith.constant 0 : index
    %c0_88 = arith.constant 0 : index
    %166 = vector.load %arg20[%c0_87, %c0_88] : memref<1x32xf32, #tpu.memory_space<vmem>>, vector<1x32xf32>
    %167 = vector.broadcast %166 : vector<1x32xf32> to vector<16x32xf32>
    %168 = arith.addf %165, %167 : vector<16x32xf32>
    %169 = vector.extract_strided_slice %158 {offsets = [0, 0], sizes = [8, 8], strides = [1, 1]} : vector<8x32xf32> to vector<8x8xf32>
    %170 = vector.extract_strided_slice %163 {offsets = [0, 0], sizes = [16, 8], strides = [1, 1]} : vector<16x32xf32> to vector<16x8xf32>
    %cst_89 = arith.constant dense<0.000000e+00> : vector<8x16xf32>
    %171 = tpu.matmul %169, %170, %cst_89 {dimension_numbers = #tpu.dot_dimension_numbers<[1], [1], [0], [0], [0, 0, 1, 0], [], []>} : vector<8x8xf32>, vector<16x8xf32>, vector<8x16xf32> -> vector<8x16xf32>
    %172 = vector.broadcast %17 : vector<1x16xf32> to vector<8x16xf32>
    %173 = arith.addf %171, %172 : vector<8x16xf32>
    %cst_90 = arith.constant dense<0xFF800000> : vector<8xf32>
    %174 = vector.multi_reduction <maximumf>, %173, %cst_90 [1] : vector<8x16xf32> to vector<8xf32>
    %175 = vector.shape_cast %174 : vector<8xf32> to vector<8x1xf32>
    %176 = vector.broadcast %175 : vector<8x1xf32> to vector<8x16xf32>
    %177 = arith.subf %173, %176 : vector<8x16xf32>
    %178 = math.exp %177 : vector<8x16xf32>
    %cst_91 = arith.constant dense<0.000000e+00> : vector<8xf32>
    %179 = vector.multi_reduction <add>, %178, %cst_91 [1] : vector<8x16xf32> to vector<8xf32>
    %180 = vector.shape_cast %179 : vector<8xf32> to vector<8x1xf32>
    %181 = tpu.reciprocal %180 {approx = true} : vector<8x1xf32> -> vector<8x1xf32>
    %182 = arith.mulf %180, %181 : vector<8x1xf32>
    %cst_92 = arith.constant 2.000000e+00 : f32
    %183 = vector.broadcast %cst_92 : f32 to vector<8x1xf32>
    %184 = arith.subf %183, %182 : vector<8x1xf32>
    %185 = arith.mulf %181, %184 : vector<8x1xf32>
    %186 = vector.broadcast %185 : vector<8x1xf32> to vector<8x16xf32>
    %187 = arith.mulf %178, %186 : vector<8x16xf32>
    %188 = vector.extract_strided_slice %168 {offsets = [0, 0], sizes = [16, 8], strides = [1, 1]} : vector<16x32xf32> to vector<16x8xf32>
    %cst_93 = arith.constant dense<0.000000e+00> : vector<8x8xf32>
    %189 = tpu.matmul %187, %188, %cst_93 {dimension_numbers = #tpu.dot_dimension_numbers<[1], [0], [0], [1], [0, 0, 1, 1], [], []>} : vector<8x16xf32>, vector<16x8xf32>, vector<8x8xf32> -> vector<8x8xf32>
    %c0_94 = arith.constant 0 : index
    %c0_95 = arith.constant 0 : index
    %190 = vector.load %arg34[%c0_94, %c0_95] : memref<8x32xf32, #tpu.memory_space<vmem>>, vector<8x8xf32>
    tpu.vector_store %arg34[%c0_94, %c0_95], %189 {strides = array<i32>} : memref<8x32xf32, #tpu.memory_space<vmem>>, vector<8x8xf32>,
    %191 = vector.extract_strided_slice %158 {offsets = [0, 8], sizes = [8, 8], strides = [1, 1]} : vector<8x32xf32> to vector<8x8xf32>
    %192 = vector.extract_strided_slice %163 {offsets = [0, 8], sizes = [16, 8], strides = [1, 1]} : vector<16x32xf32> to vector<16x8xf32>
    %cst_96 = arith.constant dense<0.000000e+00> : vector<8x16xf32>
    %193 = tpu.matmul %191, %192, %cst_96 {dimension_numbers = #tpu.dot_dimension_numbers<[1], [1], [0], [0], [0, 0, 1, 0], [], []>} : vector<8x8xf32>, vector<16x8xf32>, vector<8x16xf32> -> vector<8x16xf32>
    %194 = vector.broadcast %17 : vector<1x16xf32> to vector<8x16xf32>
    %195 = arith.addf %193, %194 : vector<8x16xf32>
    %cst_97 = arith.constant dense<0xFF800000> : vector<8xf32>
    %196 = vector.multi_reduction <maximumf>, %195, %cst_97 [1] : vector<8x16xf32> to vector<8xf32>
    %197 = vector.shape_cast %196 : vector<8xf32> to vector<8x1xf32>
    %198 = vector.broadcast %197 : vector<8x1xf32> to vector<8x16xf32>
    %199 = arith.subf %195, %198 : vector<8x16xf32>
    %200 = math.exp %199 : vector<8x16xf32>
    %cst_98 = arith.constant dense<0.000000e+00> : vector<8xf32>
    %201 = vector.multi_reduction <add>, %200, %cst_98 [1] : vector<8x16xf32> to vector<8xf32>
    %202 = vector.shape_cast %201 : vector<8xf32> to vector<8x1xf32>
    %203 = tpu.reciprocal %202 {approx = true} : vector<8x1xf32> -> vector<8x1xf32>
    %204 = arith.mulf %202, %203 : vector<8x1xf32>
    %cst_99 = arith.constant 2.000000e+00 : f32
    %205 = vector.broadcast %cst_99 : f32 to vector<8x1xf32>
    %206 = arith.subf %205, %204 : vector<8x1xf32>
    %207 = arith.mulf %203, %206 : vector<8x1xf32>
    %208 = vector.broadcast %207 : vector<8x1xf32> to vector<8x16xf32>
    %209 = arith.mulf %200, %208 : vector<8x16xf32>
    %210 = vector.extract_strided_slice %168 {offsets = [0, 8], sizes = [16, 8], strides = [1, 1]} : vector<16x32xf32> to vector<16x8xf32>
    %cst_100 = arith.constant dense<0.000000e+00> : vector<8x8xf32>
    %211 = tpu.matmul %209, %210, %cst_100 {dimension_numbers = #tpu.dot_dimension_numbers<[1], [0], [0], [1], [0, 0, 1, 1], [], []>} : vector<8x16xf32>, vector<16x8xf32>, vector<8x8xf32> -> vector<8x8xf32>
    %c0_101 = arith.constant 0 : index
    %c8_102 = arith.constant 8 : index
    %212 = vector.load %arg34[%c0_101, %c8_102] : memref<8x32xf32, #tpu.memory_space<vmem>>, vector<8x8xf32>
    tpu.vector_store %arg34[%c0_101, %c8_102], %211 {strides = array<i32>} : memref<8x32xf32, #tpu.memory_space<vmem>>, vector<8x8xf32>,
    %213 = vector.extract_strided_slice %158 {offsets = [0, 16], sizes = [8, 8], strides = [1, 1]} : vector<8x32xf32> to vector<8x8xf32>
    %214 = vector.extract_strided_slice %163 {offsets = [0, 16], sizes = [16, 8], strides = [1, 1]} : vector<16x32xf32> to vector<16x8xf32>
    %cst_103 = arith.constant dense<0.000000e+00> : vector<8x16xf32>
    %215 = tpu.matmul %213, %214, %cst_103 {dimension_numbers = #tpu.dot_dimension_numbers<[1], [1], [0], [0], [0, 0, 1, 0], [], []>} : vector<8x8xf32>, vector<16x8xf32>, vector<8x16xf32> -> vector<8x16xf32>
    %216 = vector.broadcast %17 : vector<1x16xf32> to vector<8x16xf32>
    %217 = arith.addf %215, %216 : vector<8x16xf32>
    %cst_104 = arith.constant dense<0xFF800000> : vector<8xf32>
    %218 = vector.multi_reduction <maximumf>, %217, %cst_104 [1] : vector<8x16xf32> to vector<8xf32>
    %219 = vector.shape_cast %218 : vector<8xf32> to vector<8x1xf32>
    %220 = vector.broadcast %219 : vector<8x1xf32> to vector<8x16xf32>
    %221 = arith.subf %217, %220 : vector<8x16xf32>
    %222 = math.exp %221 : vector<8x16xf32>
    %cst_105 = arith.constant dense<0.000000e+00> : vector<8xf32>
    %223 = vector.multi_reduction <add>, %222, %cst_105 [1] : vector<8x16xf32> to vector<8xf32>
    %224 = vector.shape_cast %223 : vector<8xf32> to vector<8x1xf32>
    %225 = tpu.reciprocal %224 {approx = true} : vector<8x1xf32> -> vector<8x1xf32>
    %226 = arith.mulf %224, %225 : vector<8x1xf32>
    %cst_106 = arith.constant 2.000000e+00 : f32
    %227 = vector.broadcast %cst_106 : f32 to vector<8x1xf32>
    %228 = arith.subf %227, %226 : vector<8x1xf32>
    %229 = arith.mulf %225, %228 : vector<8x1xf32>
    %230 = vector.broadcast %229 : vector<8x1xf32> to vector<8x16xf32>
    %231 = arith.mulf %222, %230 : vector<8x16xf32>
    %232 = vector.extract_strided_slice %168 {offsets = [0, 16], sizes = [16, 8], strides = [1, 1]} : vector<16x32xf32> to vector<16x8xf32>
    %cst_107 = arith.constant dense<0.000000e+00> : vector<8x8xf32>
    %233 = tpu.matmul %231, %232, %cst_107 {dimension_numbers = #tpu.dot_dimension_numbers<[1], [0], [0], [1], [0, 0, 1, 1], [], []>} : vector<8x16xf32>, vector<16x8xf32>, vector<8x8xf32> -> vector<8x8xf32>
    %c0_108 = arith.constant 0 : index
    %c16_109 = arith.constant 16 : index
    %234 = vector.load %arg34[%c0_108, %c16_109] : memref<8x32xf32, #tpu.memory_space<vmem>>, vector<8x8xf32>
    tpu.vector_store %arg34[%c0_108, %c16_109], %233 {strides = array<i32>} : memref<8x32xf32, #tpu.memory_space<vmem>>, vector<8x8xf32>,
    %235 = vector.extract_strided_slice %158 {offsets = [0, 24], sizes = [8, 8], strides = [1, 1]} : vector<8x32xf32> to vector<8x8xf32>
    %236 = vector.extract_strided_slice %163 {offsets = [0, 24], sizes = [16, 8], strides = [1, 1]} : vector<16x32xf32> to vector<16x8xf32>
    %cst_110 = arith.constant dense<0.000000e+00> : vector<8x16xf32>
    %237 = tpu.matmul %235, %236, %cst_110 {dimension_numbers = #tpu.dot_dimension_numbers<[1], [1], [0], [0], [0, 0, 1, 0], [], []>} : vector<8x8xf32>, vector<16x8xf32>, vector<8x16xf32> -> vector<8x16xf32>
    %238 = vector.broadcast %17 : vector<1x16xf32> to vector<8x16xf32>
    %239 = arith.addf %237, %238 : vector<8x16xf32>
    %cst_111 = arith.constant dense<0xFF800000> : vector<8xf32>
    %240 = vector.multi_reduction <maximumf>, %239, %cst_111 [1] : vector<8x16xf32> to vector<8xf32>
    %241 = vector.shape_cast %240 : vector<8xf32> to vector<8x1xf32>
    %242 = vector.broadcast %241 : vector<8x1xf32> to vector<8x16xf32>
    %243 = arith.subf %239, %242 : vector<8x16xf32>
    %244 = math.exp %243 : vector<8x16xf32>
    %cst_112 = arith.constant dense<0.000000e+00> : vector<8xf32>
    %245 = vector.multi_reduction <add>, %244, %cst_112 [1] : vector<8x16xf32> to vector<8xf32>
    %246 = vector.shape_cast %245 : vector<8xf32> to vector<8x1xf32>
    %247 = tpu.reciprocal %246 {approx = true} : vector<8x1xf32> -> vector<8x1xf32>
    %248 = arith.mulf %246, %247 : vector<8x1xf32>
    %cst_113 = arith.constant 2.000000e+00 : f32
    %249 = vector.broadcast %cst_113 : f32 to vector<8x1xf32>
    %250 = arith.subf %249, %248 : vector<8x1xf32>
    %251 = arith.mulf %247, %250 : vector<8x1xf32>
    %252 = vector.broadcast %251 : vector<8x1xf32> to vector<8x16xf32>
    %253 = arith.mulf %244, %252 : vector<8x16xf32>
    %254 = vector.extract_strided_slice %168 {offsets = [0, 24], sizes = [16, 8], strides = [1, 1]} : vector<16x32xf32> to vector<16x8xf32>
    %cst_114 = arith.constant dense<0.000000e+00> : vector<8x8xf32>
    %255 = tpu.matmul %253, %254, %cst_114 {dimension_numbers = #tpu.dot_dimension_numbers<[1], [0], [0], [1], [0, 0, 1, 1], [], []>} : vector<8x16xf32>, vector<16x8xf32>, vector<8x8xf32> -> vector<8x8xf32>
    %c0_115 = arith.constant 0 : index
    %c24_116 = arith.constant 24 : index
    %256 = vector.load %arg34[%c0_115, %c24_116] : memref<8x32xf32, #tpu.memory_space<vmem>>, vector<8x8xf32>
    tpu.vector_store %arg34[%c0_115, %c24_116], %255 {strides = array<i32>} : memref<8x32xf32, #tpu.memory_space<vmem>>, vector<8x8xf32>,
    %257 = vector.shape_cast %187 : vector<8x16xf32> to vector<1x8x16xf32>
    %258 = vector.shape_cast %209 : vector<8x16xf32> to vector<1x8x16xf32>
    %259 = vector.shape_cast %231 : vector<8x16xf32> to vector<1x8x16xf32>
    %260 = vector.shape_cast %253 : vector<8x16xf32> to vector<1x8x16xf32>
    %261 = tpu.concatenate %257, %258, %259, %260 in 0 : vector<1x8x16xf32>, vector<1x8x16xf32>, vector<1x8x16xf32>, vector<1x8x16xf32> -> vector<4x8x16xf32>
    %c0_117 = arith.constant 0 : index
    %c0_118 = arith.constant 0 : index
    %c0_119 = arith.constant 0 : index
    %c0_120 = arith.constant 0 : index
    %262 = vector.load %arg33[%c0_117, %c0_118, %c0_119, %c0_120] : memref<1x4x8x16xf32, #tpu.memory_space<vmem>>, vector<1x4x8x16xf32>
    %263 = vector.shape_cast %262 : vector<1x4x8x16xf32> to vector<4x8x16xf32>
    %264 = vector.shape_cast %261 : vector<4x8x16xf32> to vector<1x4x8x16xf32>
    tpu.vector_store %arg33[%c0_117, %c0_118, %c0_119, %c0_120], %264 {strides = array<i32>} : memref<1x4x8x16xf32, #tpu.memory_space<vmem>>, vector<1x4x8x16xf32>,
    %c0_121 = arith.constant 0 : index
    %c0_122 = arith.constant 0 : index
    %265 = vector.load %arg34[%c0_121, %c0_122] : memref<8x32xf32, #tpu.memory_space<vmem>>, vector<8x32xf32>
    %c0_123 = arith.constant 0 : index
    %c0_124 = arith.constant 0 : index
    %266 = vector.load %arg21[%c0_123, %c0_124] : memref<32x32xf32, #tpu.memory_space<vmem>>, vector<32x32xf32>
    %cst_125 = arith.constant dense<0.000000e+00> : vector<8x32xf32>
    %267 = tpu.matmul %265, %266, %cst_125 {dimension_numbers = #tpu.dot_dimension_numbers<[1], [0], [0], [1], [0, 0, 1, 1], [], []>} : vector<8x32xf32>, vector<32x32xf32>, vector<8x32xf32> -> vector<8x32xf32>
    %c0_126 = arith.constant 0 : index
    %c0_127 = arith.constant 0 : index
    %268 = vector.load %arg22[%c0_126, %c0_127] : memref<1x32xf32, #tpu.memory_space<vmem>>, vector<1x32xf32>
    %269 = vector.broadcast %268 : vector<1x32xf32> to vector<8x32xf32>
    %270 = arith.addf %267, %269 : vector<8x32xf32>
    %c0_128 = arith.constant 0 : index
    %c0_129 = arith.constant 0 : index
    %271 = vector.load %arg23[%c0_128, %c0_129] : memref<1x32xf32, #tpu.memory_space<vmem>>, vector<1x32xf32>
    %c0_130 = arith.constant 0 : index
    %c0_131 = arith.constant 0 : index
    %272 = vector.load %arg24[%c0_130, %c0_131] : memref<1x32xf32, #tpu.memory_space<vmem>>, vector<1x32xf32>
    %273 = arith.addf %153, %270 : vector<8x32xf32>
    %cst_132 = arith.constant dense<0.000000e+00> : vector<8xf32>
    %274 = vector.multi_reduction <add>, %273, %cst_132 [1] : vector<8x32xf32> to vector<8xf32>
    %275 = vector.shape_cast %274 : vector<8xf32> to vector<8x1xf32>
    %cst_133 = arith.constant 3.200000e+01 : f32
    %276 = vector.broadcast %cst_133 : f32 to vector<8x1xf32>
    %277 = arith.divf %275, %276 : vector<8x1xf32>
    %278 = vector.broadcast %277 : vector<8x1xf32> to vector<8x32xf32>
    %279 = arith.subf %273, %278 : vector<8x32xf32>
    %280 = arith.mulf %279, %279 : vector<8x32xf32>
    %cst_134 = arith.constant dense<0.000000e+00> : vector<8xf32>
    %281 = vector.multi_reduction <add>, %280, %cst_134 [1] : vector<8x32xf32> to vector<8xf32>
    %282 = vector.shape_cast %281 : vector<8xf32> to vector<8x1xf32>
    %cst_135 = arith.constant 3.200000e+01 : f32
    %283 = vector.broadcast %cst_135 : f32 to vector<8x1xf32>
    %284 = arith.divf %282, %283 : vector<8x1xf32>
    %cst_136 = arith.constant 9.99999974E-6 : f32
    %285 = vector.broadcast %cst_136 : f32 to vector<8x1xf32>
    %286 = arith.addf %284, %285 : vector<8x1xf32>
    %287 = math.rsqrt %286 : vector<8x1xf32>
    %288 = vector.broadcast %287 : vector<8x1xf32> to vector<8x32xf32>
    %289 = arith.mulf %279, %288 : vector<8x32xf32>
    %290 = vector.broadcast %271 : vector<1x32xf32> to vector<8x32xf32>
    %291 = arith.mulf %289, %290 : vector<8x32xf32>
    %292 = vector.broadcast %272 : vector<1x32xf32> to vector<8x32xf32>
    %293 = arith.addf %291, %292 : vector<8x32xf32>
    %c0_137 = arith.constant 0 : index
    %c0_138 = arith.constant 0 : index
    %294 = vector.load %arg25[%c0_137, %c0_138] : memref<32x64xf32, #tpu.memory_space<vmem>>, vector<32x64xf32>
    %cst_139 = arith.constant dense<0.000000e+00> : vector<8x64xf32>
    %295 = tpu.matmul %293, %294, %cst_139 {dimension_numbers = #tpu.dot_dimension_numbers<[1], [0], [0], [1], [0, 0, 1, 1], [], []>} : vector<8x32xf32>, vector<32x64xf32>, vector<8x64xf32> -> vector<8x64xf32>
    %c0_140 = arith.constant 0 : index
    %c0_141 = arith.constant 0 : index
    %296 = vector.load %arg26[%c0_140, %c0_141] : memref<1x64xf32, #tpu.memory_space<vmem>>, vector<1x64xf32>
    %297 = vector.broadcast %296 : vector<1x64xf32> to vector<8x64xf32>
    %298 = arith.addf %295, %297 : vector<8x64xf32>
    %cst_142 = arith.constant 0.000000e+00 : f32
    %299 = vector.broadcast %cst_142 : f32 to vector<8x64xf32>
    %300 = arith.maximumf %298, %299 : vector<8x64xf32>
    %c0_143 = arith.constant 0 : index
    %c0_144 = arith.constant 0 : index
    %301 = vector.load %arg27[%c0_143, %c0_144] : memref<64x32xf32, #tpu.memory_space<vmem>>, vector<64x32xf32>
    %cst_145 = arith.constant dense<0.000000e+00> : vector<8x32xf32>
    %302 = tpu.matmul %300, %301, %cst_145 {dimension_numbers = #tpu.dot_dimension_numbers<[1], [0], [0], [1], [0, 0, 1, 1], [], []>} : vector<8x64xf32>, vector<64x32xf32>, vector<8x32xf32> -> vector<8x32xf32>
    %c0_146 = arith.constant 0 : index
    %c0_147 = arith.constant 0 : index
    %303 = vector.load %arg28[%c0_146, %c0_147] : memref<1x32xf32, #tpu.memory_space<vmem>>, vector<1x32xf32>
    %304 = vector.broadcast %303 : vector<1x32xf32> to vector<8x32xf32>
    %305 = arith.addf %302, %304 : vector<8x32xf32>
    %c0_148 = arith.constant 0 : index
    %c0_149 = arith.constant 0 : index
    %306 = vector.load %arg29[%c0_148, %c0_149] : memref<1x32xf32, #tpu.memory_space<vmem>>, vector<1x32xf32>
    %c0_150 = arith.constant 0 : index
    %c0_151 = arith.constant 0 : index
    %307 = vector.load %arg30[%c0_150, %c0_151] : memref<1x32xf32, #tpu.memory_space<vmem>>, vector<1x32xf32>
    %308 = arith.addf %293, %305 : vector<8x32xf32>
    %cst_152 = arith.constant dense<0.000000e+00> : vector<8xf32>
    %309 = vector.multi_reduction <add>, %308, %cst_152 [1] : vector<8x32xf32> to vector<8xf32>
    %310 = vector.shape_cast %309 : vector<8xf32> to vector<8x1xf32>
    %cst_153 = arith.constant 3.200000e+01 : f32
    %311 = vector.broadcast %cst_153 : f32 to vector<8x1xf32>
    %312 = arith.divf %310, %311 : vector<8x1xf32>
    %313 = vector.broadcast %312 : vector<8x1xf32> to vector<8x32xf32>
    %314 = arith.subf %308, %313 : vector<8x32xf32>
    %315 = arith.mulf %314, %314 : vector<8x32xf32>
    %cst_154 = arith.constant dense<0.000000e+00> : vector<8xf32>
    %316 = vector.multi_reduction <add>, %315, %cst_154 [1] : vector<8x32xf32> to vector<8xf32>
    %317 = vector.shape_cast %316 : vector<8xf32> to vector<8x1xf32>
    %cst_155 = arith.constant 3.200000e+01 : f32
    %318 = vector.broadcast %cst_155 : f32 to vector<8x1xf32>
    %319 = arith.divf %317, %318 : vector<8x1xf32>
    %cst_156 = arith.constant 9.99999974E-6 : f32
    %320 = vector.broadcast %cst_156 : f32 to vector<8x1xf32>
    %321 = arith.addf %319, %320 : vector<8x1xf32>
    %322 = math.rsqrt %321 : vector<8x1xf32>
    %323 = vector.broadcast %322 : vector<8x1xf32> to vector<8x32xf32>
    %324 = arith.mulf %314, %323 : vector<8x32xf32>
    %325 = vector.broadcast %306 : vector<1x32xf32> to vector<8x32xf32>
    %326 = arith.mulf %324, %325 : vector<8x32xf32>
    %327 = vector.broadcast %307 : vector<1x32xf32> to vector<8x32xf32>
    %328 = arith.addf %326, %327 : vector<8x32xf32>
    %c0_157 = arith.constant 0 : index
    %c0_158 = arith.constant 0 : index
    %c0_159 = arith.constant 0 : index
    %329 = vector.load %arg31[%c0_157, %c0_158, %c0_159] : memref<1x8x32xf32, #tpu.memory_space<vmem>>, vector<1x8x32xf32>
    %330 = vector.shape_cast %329 : vector<1x8x32xf32> to vector<8x32xf32>
    %331 = vector.shape_cast %328 : vector<8x32xf32> to vector<1x8x32xf32>
    tpu.vector_store %arg31[%c0_157, %c0_158, %c0_159], %331 {strides = array<i32>} : memref<1x8x32xf32, #tpu.memory_space<vmem>>, vector<1x8x32xf32>,
    return
  }
  func.func @transform_0(%arg0: i32) -> (i32, i32, i32) {
    %c0_i32 = arith.constant 0 : i32
    %c0_i32_0 = arith.constant 0 : i32
    %c0_i32_1 = arith.constant 0 : i32
    return %arg0, %c0_i32, %c0_i32_0 : i32, i32, i32
  }
  func.func @transform_1(%arg0: i32) -> (i32, i32, i32) {
    %c0_i32 = arith.constant 0 : i32
    %c0_i32_0 = arith.constant 0 : i32
    %c0_i32_1 = arith.constant 0 : i32
    return %arg0, %c0_i32, %c0_i32_0 : i32, i32, i32
  }
  func.func @transform_2(%arg0: i32) -> (i32, i32, i32) {
    %c0_i32 = arith.constant 0 : i32
    %c0_i32_0 = arith.constant 0 : i32
    %c0_i32_1 = arith.constant 0 : i32
    return %arg0, %c0_i32, %c0_i32_0 : i32, i32, i32
  }
  func.func @transform_3(%arg0: i32) -> (i32, i32, i32) {
    %c0_i32 = arith.constant 0 : i32
    %c0_i32_0 = arith.constant 0 : i32
    %c0_i32_1 = arith.constant 0 : i32
    return %arg0, %c0_i32, %c0_i32_0 : i32, i32, i32
  }
  func.func @transform_4(%arg0: i32) -> (i32, i32) {
    %c0_i32 = arith.constant 0 : i32
    %c0_i32_0 = arith.constant 0 : i32
    %c0_i32_1 = arith.constant 0 : i32
    return %c0_i32, %c0_i32_0 : i32, i32
  }
  func.func @transform_5(%arg0: i32) -> (i32, i32) {
    %c0_i32 = arith.constant 0 : i32
    %c0_i32_0 = arith.constant 0 : i32
    %c0_i32_1 = arith.constant 0 : i32
    return %c0_i32, %c0_i32_0 : i32, i32
  }
  func.func @transform_6(%arg0: i32) -> (i32, i32) {
    %c0_i32 = arith.constant 0 : i32
    %c0_i32_0 = arith.constant 0 : i32
    %c0_i32_1 = arith.constant 0 : i32
    return %c0_i32, %c0_i32_0 : i32, i32
  }
  func.func @transform_7(%arg0: i32) -> (i32, i32) {
    %c0_i32 = arith.constant 0 : i32
    %c0_i32_0 = arith.constant 0 : i32
    %c0_i32_1 = arith.constant 0 : i32
    return %c0_i32, %c0_i32_0 : i32, i32
  }
  func.func @transform_8(%arg0: i32) -> (i32, i32) {
    %c0_i32 = arith.constant 0 : i32
    %c0_i32_0 = arith.constant 0 : i32
    %c0_i32_1 = arith.constant 0 : i32
    return %c0_i32, %c0_i32_0 : i32, i32
  }
  func.func @transform_9(%arg0: i32) -> (i32, i32) {
    %c0_i32 = arith.constant 0 : i32
    %c0_i32_0 = arith.constant 0 : i32
    %c0_i32_1 = arith.constant 0 : i32
    return %c0_i32, %c0_i32_0 : i32, i32
  }
  func.func @transform_10(%arg0: i32) -> (i32, i32) {
    %c0_i32 = arith.constant 0 : i32
    %c0_i32_0 = arith.constant 0 : i32
    %c0_i32_1 = arith.constant 0 : i32
    return %c0_i32, %c0_i32_0 : i32, i32
  }
  func.func @transform_11(%arg0: i32) -> (i32, i32) {
    %c0_i32 = arith.constant 0 : i32
    %c0_i32_0 = arith.constant 0 : i32
    %c0_i32_1 = arith.constant 0 : i32
    return %c0_i32, %c0_i32_0 : i32, i32
  }
  func.func @transform_12(%arg0: i32) -> (i32, i32) {
    %c0_i32 = arith.constant 0 : i32
    %c0_i32_0 = arith.constant 0 : i32
    %c0_i32_1 = arith.constant 0 : i32
    return %c0_i32, %c0_i32_0 : i32, i32
  }
  func.func @transform_13(%arg0: i32) -> (i32, i32) {
    %c0_i32 = arith.constant 0 : i32
    %c0_i32_0 = arith.constant 0 : i32
    %c0_i32_1 = arith.constant 0 : i32
    return %c0_i32, %c0_i32_0 : i32, i32
  }
  func.func @transform_14(%arg0: i32) -> (i32, i32) {
    %c0_i32 = arith.constant 0 : i32
    %c0_i32_0 = arith.constant 0 : i32
    %c0_i32_1 = arith.constant 0 : i32
    return %c0_i32, %c0_i32_0 : i32, i32
  }
  func.func @transform_15(%arg0: i32) -> (i32, i32) {
    %c0_i32 = arith.constant 0 : i32
    %c0_i32_0 = arith.constant 0 : i32
    %c0_i32_1 = arith.constant 0 : i32
    return %c0_i32, %c0_i32_0 : i32, i32
  }
  func.func @transform_16(%arg0: i32) -> (i32, i32) {
    %c0_i32 = arith.constant 0 : i32
    %c0_i32_0 = arith.constant 0 : i32
    %c0_i32_1 = arith.constant 0 : i32
    return %c0_i32, %c0_i32_0 : i32, i32
  }
  func.func @transform_17(%arg0: i32) -> (i32, i32) {
    %c0_i32 = arith.constant 0 : i32
    %c0_i32_0 = arith.constant 0 : i32
    %c0_i32_1 = arith.constant 0 : i32
    return %c0_i32, %c0_i32_0 : i32, i32
  }
  func.func @transform_18(%arg0: i32) -> (i32, i32) {
    %c0_i32 = arith.constant 0 : i32
    %c0_i32_0 = arith.constant 0 : i32
    %c0_i32_1 = arith.constant 0 : i32
    return %c0_i32, %c0_i32_0 : i32, i32
  }
  func.func @transform_19(%arg0: i32) -> (i32, i32) {
    %c0_i32 = arith.constant 0 : i32
    %c0_i32_0 = arith.constant 0 : i32
    %c0_i32_1 = arith.constant 0 : i32
    return %c0_i32, %c0_i32_0 : i32, i32
  }
  func.func @transform_20(%arg0: i32) -> (i32, i32) {
    %c0_i32 = arith.constant 0 : i32
    %c0_i32_0 = arith.constant 0 : i32
    %c0_i32_1 = arith.constant 0 : i32
    return %c0_i32, %c0_i32_0 : i32, i32
  }
  func.func @transform_21(%arg0: i32) -> (i32, i32) {
    %c0_i32 = arith.constant 0 : i32
    %c0_i32_0 = arith.constant 0 : i32
    %c0_i32_1 = arith.constant 0 : i32
    return %c0_i32, %c0_i32_0 : i32, i32
  }
  func.func @transform_22(%arg0: i32) -> (i32, i32) {
    %c0_i32 = arith.constant 0 : i32
    %c0_i32_0 = arith.constant 0 : i32
    %c0_i32_1 = arith.constant 0 : i32
    return %c0_i32, %c0_i32_0 : i32, i32
  }
  func.func @transform_23(%arg0: i32) -> (i32, i32) {
    %c0_i32 = arith.constant 0 : i32
    %c0_i32_0 = arith.constant 0 : i32
    %c0_i32_1 = arith.constant 0 : i32
    return %c0_i32, %c0_i32_0 : i32, i32
  }
  func.func @transform_24(%arg0: i32) -> (i32, i32) {
    %c0_i32 = arith.constant 0 : i32
    %c0_i32_0 = arith.constant 0 : i32
    %c0_i32_1 = arith.constant 0 : i32
    return %c0_i32, %c0_i32_0 : i32, i32
  }
  func.func @transform_25(%arg0: i32) -> (i32, i32) {
    %c0_i32 = arith.constant 0 : i32
    %c0_i32_0 = arith.constant 0 : i32
    %c0_i32_1 = arith.constant 0 : i32
    return %c0_i32, %c0_i32_0 : i32, i32
  }
  func.func @transform_26(%arg0: i32) -> (i32, i32) {
    %c0_i32 = arith.constant 0 : i32
    %c0_i32_0 = arith.constant 0 : i32
    %c0_i32_1 = arith.constant 0 : i32
    return %c0_i32, %c0_i32_0 : i32, i32
  }
  func.func @transform_27(%arg0: i32) -> (i32, i32) {
    %c0_i32 = arith.constant 0 : i32
    %c0_i32_0 = arith.constant 0 : i32
    %c0_i32_1 = arith.constant 0 : i32
    return %c0_i32, %c0_i32_0 : i32, i32
  }
  func.func @transform_28(%arg0: i32) -> (i32, i32) {
    %c0_i32 = arith.constant 0 : i32
    %c0_i32_0 = arith.constant 0 : i32
    %c0_i32_1 = arith.constant 0 : i32
    return %c0_i32, %c0_i32_0 : i32, i32
  }
  func.func @transform_29(%arg0: i32) -> (i32, i32) {
    %c0_i32 = arith.constant 0 : i32
    %c0_i32_0 = arith.constant 0 : i32
    %c0_i32_1 = arith.constant 0 : i32
    return %c0_i32, %c0_i32_0 : i32, i32
  }
  func.func @transform_30(%arg0: i32) -> (i32, i32, i32) {
    %c0_i32 = arith.constant 0 : i32
    %c0_i32_0 = arith.constant 0 : i32
    %c0_i32_1 = arith.constant 0 : i32
    return %arg0, %c0_i32, %c0_i32_0 : i32, i32, i32
  }
  func.func @transform_31(%arg0: i32) -> (i32, i32, i32, i32) {
    %c0_i32 = arith.constant 0 : i32
    %c0_i32_0 = arith.constant 0 : i32
    %c0_i32_1 = arith.constant 0 : i32
    %c0_i32_2 = arith.constant 0 : i32
    return %arg0, %c0_i32, %c0_i32_0, %c0_i32_1 : i32, i32, i32, i32
  }
  func.func @transform_32(%arg0: i32) -> (i32, i32, i32, i32) {
    %c0_i32 = arith.constant 0 : i32
    %c0_i32_0 = arith.constant 0 : i32
    %c0_i32_1 = arith.constant 0 : i32
    %c0_i32_2 = arith.constant 0 : i32
    return %arg0, %c0_i32, %c0_i32_0, %c0_i32_1 : i32, i32, i32, i32
  }
}

</mosaic_0001>

<bundles_post_ra>
// kernel: decoder_layer_forward.1
= control target key start
LH: loop header
LB: loop body
LE: loop exit
PB: predicated region body
PF: predicated region fallthrough
CT: control target
= control target key end

     0   :  { %s6403_s6 = smov 1   ;;  %s6404_s10 = smov 2   ;;  %s7598_s0 = inlined_call_operand.smem [shape: u32[33], index: -1, kind: input, shape index: {}] }
   0x1   :  { %s6488_s5 = sld [smem:[%s7598_s0]]   ;;  %s6405_s14 = smov 3  }
   0x2   :  { %s6493_s9 = sld [smem:[%s7598_s0 + %s6403_s6]]   ;;  %s6406_s18 = smov 4  }
   0x3   :  { %s6498_s13 = sld [smem:[%s7598_s0 + %s6404_s10]]   ;;  %s6407_s22 = smov 5  }
   0x4   :  { %s6503_s17 = sld [smem:[%s7598_s0 + %s6405_s14]]   ;;  %s6408_s26 = smov 6  }
   0x5   :  { %s6508_s21 = sld [smem:[%s7598_s0 + %s6406_s18]]   ;;  %s6409_s30 = smov 7  }
   0x6   :  { %s6513_s25 = sld [smem:[%s7598_s0 + %s6407_s22]]   ;;  %s6410_s4 = smov 8  }
   0x7   :  { %7661 = sst [smem:[#allocation73_spill]] %s6488_s5  ;;  %s6411_s10 = smov 9  }
   0x8   :  { %7662 = sst [smem:[#allocation74_spill]] %s6493_s9  ;;  %s6412_s15 = smov 10  }
   0x9   :  { %7663 = sst [smem:[#allocation75_spill]] %s6498_s13  ;;  %s6413_s20 = smov 11  }
   0xa   :  { %7664 = sst [smem:[#allocation76_spill]] %s6503_s17  ;;  %s6415_s1 = smov 13  }
   0xb   :  { %7665 = sst [smem:[#allocation77_spill]] %s6508_s21  ;;  %s6416_s7 = smov 14  }
   0xc   :  { %7666 = sst [smem:[#allocation78_spill]] %s6513_s25  ;;  %s6418_s22 = smov 16  }
   0xd   :  { %s6518_s29 = sld [smem:[%s7598_s0 + %s6408_s26]]   ;;  %s6414_s26 = smov 12  }
   0xe   :  { %s6523_s3 = sld [smem:[%s7598_s0 + %s6409_s30]]   ;;  %s6419_s28 = smov 17  }
   0xf   :  { %s6528_s8 = sld [smem:[%s7598_s0 + %s6410_s4]]  }
  0x10   :  { %s6533_s14 = sld [smem:[%s7598_s0 + %s6411_s10]]  }
  0x11   :  { %s6538_s19 = sld [smem:[%s7598_s0 + %s6412_s15]]   ;;  %s6417_s15 = smov 15  }
  0x12   :  { %s6543_s24 = sld [smem:[%s7598_s0 + %s6413_s20]]  }
  0x13   :  { %7667 = sst [smem:[#allocation79_spill]] %s6518_s29 }
  0x14   :  { %7668 = sst [smem:[#allocation80_spill]] %s6523_s3 }
  0x15   :  { %7669 = sst [smem:[#allocation81_spill]] %s6528_s8 }
  0x16   :  { %7670 = sst [smem:[#allocation82_spill]] %s6533_s14 }
  0x17   :  { %7671 = sst [smem:[#allocation83_spill]] %s6538_s19 }
  0x18   :  { %7672 = sst [smem:[#allocation84_spill]] %s6543_s24 }
  0x19   :  { %s6548_s30 = sld [smem:[%s7598_s0 + %s6414_s26]]  }
  0x1a   :  { %s6553_s6 = sld [smem:[%s7598_s0 + %s6415_s1]]  }
  0x1b   :  { %s6558_s12 = sld [smem:[%s7598_s0 + %s6416_s7]]   ;;  %s6420_s7 = smov 18  }
  0x1c   :  { %s6563_s20 = sld [smem:[%s7598_s0 + %s6417_s15]]   ;;  %s6421_s15 = smov 19  }
  0x1d   :  { %s6568_s27 = sld [smem:[%s7598_s0 + %s6418_s22]]   ;;  %s6422_s22 = smov 20  }
  0x1e   :  { %s6573_s4 = sld [smem:[%s7598_s0 + %s6419_s28]]   ;;  %s6423_s28 = smov 21  }
  0x1f   :  { %7673 = sst [smem:[#allocation85_spill]] %s6548_s30 }
  0x20   :  { %7674 = sst [smem:[#allocation86_spill]] %s6553_s6 }
  0x21   :  { %7675 = sst [smem:[#allocation87_spill]] %s6558_s12 }
  0x22   :  { %7676 = sst [smem:[#allocation88_spill]] %s6563_s20 }
  0x23   :  { %7677 = sst [smem:[#allocation89_spill]] %s6568_s27 }
  0x24   :  { %7678 = sst [smem:[#allocation90_spill]] %s6573_s4 }
  0x25   :  { %s6578_s17 = sld [smem:[%s7598_s0 + %s6420_s7]]   ;;  %s6424_s7 = smov 22  }
  0x26   :  { %s6583_s13 = sld [smem:[%s7598_s0 + %s6421_s15]]   ;;  %s6425_s15 = smov 23  }
  0x27   :  { %s6588_s5 = sld [smem:[%s7598_s0 + %s6422_s22]]   ;;  %s6426_s22 = smov 24  }
  0x28   :  { %s6593_s27 = sld [smem:[%s7598_s0 + %s6423_s28]]   ;;  %s6427_s28 = smov 25  }
  0x29   :  { %s6603_s12 = sld [smem:[%s7598_s0 + %s6425_s15]]   ;;  %s6429_s15 = smov 27  }
  0x2a   :  { %s6613_s30 = sld [smem:[%s7598_s0 + %s6427_s28]]   ;;  %s6431_s28 = smov 29  }
  0x2b   :  { %7679 = sst [smem:[#allocation91_spill]] %s6578_s17 }
  0x2c   :  { %7680 = sst [smem:[#allocation92_spill]] %s6583_s13 }
  0x2d   :  { %7681 = sst [smem:[#allocation93_spill]] %s6588_s5 }
  0x2e   :  { %7682 = sst [smem:[#allocation94_spill]] %s6593_s27 }
  0x2f   :  { %s6598_s17 = sld [smem:[%s7598_s0 + %s6424_s7]]   ;;  %s6428_s7 = smov 26  }
  0x30   :  { %7684 = sst [smem:[#allocation96_spill]] %s6603_s12 }
  0x31   :  { %s6608_s5 = sld [smem:[%s7598_s0 + %s6426_s22]]   ;;  %s6430_s22 = smov 28  }
  0x32   :  { %s6623_s19 = sld [smem:[%s7598_s0 + %s6429_s15]]   ;;  %s6433_s15 = smov 31  }
  0x33   :  { %s6633_s8 = sld [smem:[%s7598_s0 + %s6431_s28]]  }
  0x34   :  { %s6643_s29 = sld [smem:[%s7598_s0 + %s6433_s15]]  }
  0x35   :  { %7683 = sst [smem:[#allocation95_spill]] %s6598_s17 }
  0x36   :  { %s6618_s17 = sld [smem:[%s7598_s0 + %s6428_s7]]   ;;  %s6432_s7 = smov 30  }
  0x37   :  { %7685 = sst [smem:[#allocation97_spill]] %s6608_s5 }
  0x38   :  { %7687 = sst [smem:[#allocation99_spill]] %s6623_s19 }
  0x39   :  { %s6628_s5 = sld [smem:[%s7598_s0 + %s6430_s22]]   ;;  %s6434_s22 = smov 32  }
  0x3a   :  { %7689 = sst [smem:[#allocation101_spill]] %s6633_s8 }
  0x3b   :  { %7691 = sst [smem:[#allocation103_spill]] %s6643_s29 }
  0x3c   :  { %7686 = sst [smem:[#allocation98_spill]] %s6618_s17 }
  0x3d   :  { %s6638_s17 = sld [smem:[%s7598_s0 + %s6432_s7]]  }
  0x3f   :  { %7688 = sst [smem:[#allocation100_spill]] %s6628_s5 }
  0x40   :  { %s6648_s5 = sld [smem:[%s7598_s0 + %s6434_s22]]  }
  0x43   :  { %7690 = sst [smem:[#allocation102_spill]] %s6638_s17 }
  0x46   :  { %7692 = sst [smem:[#allocation104_spill]] %s6648_s5 }
  0x47   :  { %71 = vsyncpa [#allocation4], 0 }
  0x48   :  { %73 = vsyncpa [#allocation4 + $0x1], 0 }
  0x49   :  { %74 = vsyncpa [#allocation7], 0 }
  0x4a   :  { %76 = vsyncpa [#allocation7 + $0x1], 0 }
  0x4b   :  { %77 = vsyncpa [#allocation10], 0 }
  0x4c   :  { %79 = vsyncpa [#allocation10 + $0x1], 0 }
  0x4d   :  { %80 = vsyncpa [#allocation13], 0 }
  0x4e   :  { %81 = vsyncpa [#allocation16], 0 }
  0x4f   :  { %82 = vsyncpa [#allocation19], 0 }
  0x50   :  { %83 = vsyncpa [#allocation22], 0 }
  0x51   :  { %84 = vsyncpa [#allocation25], 0 }
  0x52   :  { %85 = vsyncpa [#allocation28], 0 }
  0x53   :  { %86 = vsyncpa [#allocation31], 0 }
  0x54   :  { %87 = vsyncpa [#allocation34], 0 }
  0x55   :  { %88 = vsyncpa [#allocation37], 0 }
  0x56   :  { %89 = vsyncpa [#allocation40], 0 }
  0x57   :  { %90 = vsyncpa [#allocation43], 0 }
  0x58   :  { %91 = vsyncpa [#allocation46], 0 }
  0x59   :  { %92 = vsyncpa [#allocation49], 0 }
  0x5a   :  { %93 = vsyncpa [#allocation5], 0 }
  0x5b   :  { %95 = vsyncpa [#allocation5 + $0x1], 0 }
  0x5c   :  { %96 = vsyncpa [#allocation52], 0 }
  0x5d   :  { %98 = vsyncpa [#allocation52 + $0x1], 0  ;;  %s6650_s0 = smov 0   ;;  %s6652_s28 = smov 0  }
  0x5e   :  { %s6654_s1 = smov 0   ;;  %s6656_s2 = smov 0  }
  0x5f LB: > { %s7693_s8 = sld [smem:[#allocation101_spill]]  ;;  %s7694_s27 = sld [smem:[#allocation94_spill]]  ;;  %s6393_s28 = sphi %s6652_s28, %s7780_s28   ;;  %s6389_s0 = sphi %s6650_s0, %s7779_s0   ;;  %s6401_s2 = sphi %s6656_s2, %s7782_s2   ;;  %s6397_s1 = sphi %s6654_s1, %s7781_s1  }
  0x60   : > { %s7695_s25 = sld [smem:[#allocation78_spill]]  ;;  %s7696_s24 = sld [smem:[#allocation84_spill]] }
  0x61   : > { %s7697_s9 = sld [smem:[#allocation74_spill]]  ;;  %s7698_s21 = sld [smem:[#allocation77_spill]] }
  0x62   : > { %s7699_s20 = sld [smem:[#allocation88_spill]]  ;;  %s7700_s19 = sld [smem:[#allocation99_spill]] }
  0x63   : > { %s7701_s14 = sld [smem:[#allocation82_spill]]  ;;  %s7702_s13 = sld [smem:[#allocation92_spill]] }
  0x64   : > { %s7703_s12 = sld [smem:[#allocation96_spill]]  ;;  %s7704_s6 = sld [smem:[#allocation86_spill]] }
  0x65   : > { %s7705_s4 = sld [smem:[#allocation90_spill]]  ;;  %s7706_s3 = sld [smem:[#allocation80_spill]] }
  0x66   : > { %s6435_s7 = smov [#allocation11]   ;;  %s6671_s11 = sadd.s32 4294967295, %s6401_s2  }
  0x67   : > { %s849_s10 = sshll.u32 %s6435_s7, 4  ;;  %p4371_p0 = scmp.ge.s32.totalorder %s6401_s2, 1  ;;  %s6676_s10 = int_to_ptr.vmem [resolvable:$true] %s849_s10 }
  0x68   : > { %p7615_p1 = scmp.eq.s32.totalorder %s6671_s11, 0  ;;  %p837_p2 = scmp.lt.s32.totalorder %s6401_s2, 3 }
  0x69   : > { %s6436_s16 = smov [#allocation12]   ;;  %s6437_s23 = smov [#allocation15]  }
  0x6a   : > { %p6678_p3 = pnand %p4371_p0, %p837_p2  ;;  %s863_s18 = sshll.u32 %s6436_s16, 4  ;;  %s6691_s18 = int_to_ptr.vmem [resolvable:$true] %s863_s18 }
  0x6b   : > { %s887_s26 = sshll.u32 %s6437_s23, 4  ;;  %s5363_s7 = scalar_lea.hbm %s7698_s21, 512  ;;  %s6693_s26 = int_to_ptr.vmem [resolvable:$true] %s887_s26 }
  0x6c   : > { %s7707_s15 = scalar_select %p6678_p3, 1, 0 }
  0x6d   : > { %p5037_p5 = pneg %p6678_p3  ;;  %p5364_p7 = scmp.ne.s32.totalorder %s7698_s21, %s5363_s7 }
  0x6e   : > { %p5370_p11 = scmp.lt.u32.totalorder %s5363_s7, %s7698_s21 }
  0x6f   : > { %p6687_p6 = pnand %p5037_p5, %p7615_p1 }
  0x71   : > { %s7708_s22 = scalar_select %p6687_p6, 1, 0 }
  0x72   : > { %p6699_p8 = pneg %p6687_p6 }
  0x74   : > { %s7709_s17 = scalar_select %p6699_p8, 1, 0 }
  0x75   : > { %p5366_p9 = pnand %p6699_p8, %p5364_p7 }
  0x77   : > { %p5367_p10 = pneg %p5366_p9 }
  0x79   : > { %p5372_p12 = pnand %p5370_p11, %p5367_p10 }
  0x7b   : > { %5375 = shalt.err (!%p5372_p12)
}
  0x7c   : > { %s5376_s16 = scalar_lea.vmem %s6676_s10, 512  ;;  %p5384_p5 = scmp.lt.s32.totalorder %s6676_s10, %s6676_s10 }
  0x7d   : > { %p5377_p13 = scmp.ne.s32.totalorder %s6676_s10, %s5376_s16  ;;  %p5385_p4 = scmp.lt.s32.totalorder %s5376_s16, %s5376_s16 }
  0x7f   : > { %p5379_p0 = pnand %p5377_p13, %p6699_p8  ;;  %p5386_p1 = por %p5385_p4, %p5384_p5 }
  0x81   : > { %p5380_p2 = pneg %p5379_p0 }
  0x83   : > { %p5387_p3 = pnand %p5386_p1, %p5380_p2 }
  0x85   : > { %5390 = shalt.err (!%p5387_p3)
}
  0x86   : > { %s7619_s23 = smov 128   ;;  %s7621_s7 = smov 8  }
  0x87   : > { %5040 = dma.hbm_to_vmem [thread:$0]  (!%p6687_p6), %s7698_s21, 512, %s6676_s10, [#allocation10], %s7619_s23, %s7619_s23, %s7621_s7  }
  0x88   : > { %s5391_s5 = scalar_lea.hbm %s7695_s25, 16 }
  0x89   : > { %p5392_p7 = scmp.ne.s32.totalorder %s7695_s25, %s5391_s5  ;;  %p5398_p3 = scmp.lt.u32.totalorder %s5391_s5, %s7695_s25 }
  0x8b   : > { %p5394_p4 = pnand %p5392_p7, %p6699_p8 }
  0x8d   : > { %p5395_p1 = pneg %p5394_p4 }
  0x8f   : > { %p5400_p9 = pnand %p5398_p3, %p5395_p1 }
  0x91   : > { %5403 = shalt.err (!%p5400_p9)
}
  0x92   : > { %s5404_s16 = scalar_lea.vmem %s6691_s18, 16  ;;  %s5411_s29 = scalar_lea.vmem %s6691_s18, 32 }
  0x93   : > { %p5405_p10 = scmp.ne.s32.totalorder %s6691_s18, %s5404_s16  ;;  %p5412_p13 = scmp.lt.s32.totalorder %s6691_s18, %s6691_s18 }
  0x94   : > { %p5413_p0 = scmp.lt.s32.totalorder %s5411_s29, %s5404_s16 }
  0x95   : > { %p5407_p11 = pnand %p5405_p10, %p6699_p8 }
  0x96   : > { %p5414_p2 = por %p5413_p0, %p5412_p13 }
  0x97   : > { %p5408_p12 = pneg %p5407_p11 }
  0x99   : > { %p5415_p5 = pnand %p5414_p2, %p5408_p12 }
  0x9b   : > { %5418 = shalt.err (!%p5415_p5)
}
  0x9c   : > { %5043 = dma.hbm_to_vmem [thread:$0]  (!%p6687_p6), %s7695_s25, 16, %s6691_s18, [#allocation13]  }
  0x9d   : > { %s5419_s5 = scalar_lea.hbm %s7706_s3, 16 }
  0x9e   : > { %p5420_p7 = scmp.ne.s32.totalorder %s7706_s3, %s5419_s5  ;;  %p5426_p3 = scmp.lt.u32.totalorder %s5419_s5, %s7706_s3 }
  0xa0   : > { %p5422_p4 = pnand %p5420_p7, %p6699_p8 }
  0xa2   : > { %p5423_p1 = pneg %p5422_p4 }
  0xa4   : > { %p5428_p9 = pnand %p5426_p3, %p5423_p1 }
  0xa6   : > { %5431 = shalt.err (!%p5428_p9)
}
  0xa7   : > { %s5432_s29 = scalar_lea.vmem %s6693_s26, 16  ;;  %s5439_s10 = scalar_lea.vmem %s6693_s26, 32 }
  0xa8   : > { %p5433_p10 = scmp.ne.s32.totalorder %s6693_s26, %s5432_s29  ;;  %p5440_p13 = scmp.lt.s32.totalorder %s6693_s26, %s6693_s26 }
  0xa9   : > { %p5441_p0 = scmp.lt.s32.totalorder %s5439_s10, %s5432_s29 }
  0xaa   : > { %p5435_p11 = pnand %p5433_p10, %p6699_p8 }
  0xab   : > { %p5442_p2 = por %p5441_p0, %p5440_p13 }
  0xac   : > { %p5436_p12 = pneg %p5435_p11 }
  0xae   : > { %p5443_p5 = pnand %p5442_p2, %p5436_p12 }
  0xb0   : > { %5446 = shalt.err (!%p5443_p5)
}
  0xb1   : > { %5049 = dma.hbm_to_vmem [thread:$0]  (!%p6687_p6), %s7706_s3, 16, %s6693_s26, [#allocation16]  }
  0xb2   : > { %s6440_s18 = smov [#allocation18]   ;;  %s6441_s5 = smov [#allocation21]  }
  0xb3   : > { %s911_s16 = sshll.u32 %s6440_s18, 4  ;;  %s935_s23 = sshll.u32 %s6441_s5, 4  ;;  %s912_s16 = int_to_ptr.vmem [resolvable:$true] %s911_s16  ;;  %s936_s23 = int_to_ptr.vmem [resolvable:$true] %s935_s23 }
  0xb4   : > { %s5447_s7 = scalar_lea.hbm %s7701_s14, 16 }
  0xb5   : > { %p5448_p7 = scmp.ne.s32.totalorder %s7701_s14, %s5447_s7  ;;  %p5454_p3 = scmp.lt.u32.totalorder %s5447_s7, %s7701_s14 }
  0xb7   : > { %p5450_p4 = pnand %p5448_p7, %p6699_p8 }
  0xb9   : > { %p5451_p1 = pneg %p5450_p4 }
  0xbb   : > { %p5456_p9 = pnand %p5454_p3, %p5451_p1 }
  0xbd   : > { %5459 = shalt.err (!%p5456_p9)
}
  0xbe   : > { %s5460_s29 = scalar_lea.vmem %s912_s16, 16  ;;  %s5467_s26 = scalar_lea.vmem %s912_s16, 32 }
  0xbf   : > { %p5461_p10 = scmp.ne.s32.totalorder %s912_s16, %s5460_s29  ;;  %p5468_p13 = scmp.lt.s32.totalorder %s912_s16, %s912_s16 }
  0xc0   : > { %p5469_p0 = scmp.lt.s32.totalorder %s5467_s26, %s5460_s29 }
  0xc1   : > { %p5463_p11 = pnand %p5461_p10, %p6699_p8 }
  0xc2   : > { %p5470_p2 = por %p5469_p0, %p5468_p13 }
  0xc3   : > { %p5464_p12 = pneg %p5463_p11 }
  0xc5   : > { %p5471_p5 = pnand %p5470_p2, %p5464_p12 }
  0xc7   : > { %5474 = shalt.err (!%p5471_p5)
}
  0xc8   : > { %5055 = dma.hbm_to_vmem [thread:$0]  (!%p6687_p6), %s7701_s14, 16, %s912_s16, [#allocation19]  }
  0xc9   : > { %s5475_s7 = scalar_lea.hbm %s7696_s24, 16 }
  0xca   : > { %p5476_p7 = scmp.ne.s32.totalorder %s7696_s24, %s5475_s7  ;;  %p5482_p3 = scmp.lt.u32.totalorder %s5475_s7, %s7696_s24 }
  0xcc   : > { %p5478_p4 = pnand %p5476_p7, %p6699_p8 }
  0xce   : > { %p5479_p1 = pneg %p5478_p4 }
  0xd0   : > { %p5484_p9 = pnand %p5482_p3, %p5479_p1 }
  0xd2   : > { %5487 = shalt.err (!%p5484_p9)
}
  0xd3   : > { %s5488_s10 = scalar_lea.vmem %s936_s23, 16  ;;  %s5495_s18 = scalar_lea.vmem %s936_s23, 32 }
  0xd4   : > { %p5489_p10 = scmp.ne.s32.totalorder %s936_s23, %s5488_s10  ;;  %p5496_p13 = scmp.lt.s32.totalorder %s936_s23, %s936_s23 }
  0xd5   : > { %p5497_p0 = scmp.lt.s32.totalorder %s5495_s18, %s5488_s10 }
  0xd6   : > { %p5491_p11 = pnand %p5489_p10, %p6699_p8 }
  0xd7   : > { %p5498_p2 = por %p5497_p0, %p5496_p13 }
  0xd8   : > { %p5492_p12 = pneg %p5491_p11 }
  0xda   : > { %p5499_p5 = pnand %p5498_p2, %p5492_p12 }
  0xdc   : > { %5502 = shalt.err (!%p5499_p5)
}
  0xdd   : > { %5061 = dma.hbm_to_vmem [thread:$0]  (!%p6687_p6), %s7696_s24, 16, %s936_s23, [#allocation22]  }
  0xde   : > { %s6442_s16 = smov [#allocation24]   ;;  %s6443_s29 = smov [#allocation27]  }
  0xdf   : > { %s957_s5 = sshll.u32 %s6442_s16, 4  ;;  %s981_s26 = sshll.u32 %s6443_s29, 4  ;;  %s958_s5 = int_to_ptr.vmem [resolvable:$true] %s957_s5  ;;  %s982_s26 = int_to_ptr.vmem [resolvable:$true] %s981_s26 }
  0xe0   : > { %s5503_s7 = scalar_lea.hbm %s7704_s6, 16 }
  0xe1   : > { %p5504_p7 = scmp.ne.s32.totalorder %s7704_s6, %s5503_s7  ;;  %p5510_p3 = scmp.lt.u32.totalorder %s5503_s7, %s7704_s6 }
  0xe3   : > { %p5506_p4 = pnand %p5504_p7, %p6699_p8 }
  0xe5   : > { %p5507_p1 = pneg %p5506_p4 }
  0xe7   : > { %p5512_p9 = pnand %p5510_p3, %p5507_p1 }
  0xe9   : > { %5515 = shalt.err (!%p5512_p9)
}
  0xea   : > { %s5516_s10 = scalar_lea.vmem %s958_s5, 16  ;;  %s5523_s23 = scalar_lea.vmem %s958_s5, 32 }
  0xeb   : > { %p5517_p10 = scmp.ne.s32.totalorder %s958_s5, %s5516_s10  ;;  %p5524_p13 = scmp.lt.s32.totalorder %s958_s5, %s958_s5 }
  0xec   : > { %p5525_p0 = scmp.lt.s32.totalorder %s5523_s23, %s5516_s10 }
  0xed   : > { %p5519_p11 = pnand %p5517_p10, %p6699_p8 }
  0xee   : > { %p5526_p2 = por %p5525_p0, %p5524_p13 }
  0xef   : > { %p5520_p12 = pneg %p5519_p11 }
  0xf1   : > { %p5527_p5 = pnand %p5526_p2, %p5520_p12 }
  0xf3   : > { %5530 = shalt.err (!%p5527_p5)
}
  0xf4   : > { %5067 = dma.hbm_to_vmem [thread:$0]  (!%p6687_p6), %s7704_s6, 16, %s958_s5, [#allocation25]  }
  0xf5   : > { %s5531_s18 = scalar_lea.hbm %s7699_s20, 16 }
  0xf6   : > { %p5532_p7 = scmp.ne.s32.totalorder %s7699_s20, %s5531_s18  ;;  %p5538_p3 = scmp.lt.u32.totalorder %s5531_s18, %s7699_s20 }
  0xf8   : > { %p5534_p4 = pnand %p5532_p7, %p6699_p8 }
  0xfa   : > { %p5535_p1 = pneg %p5534_p4 }
  0xfc   : > { %p5540_p9 = pnand %p5538_p3, %p5535_p1 }
  0xfe   : > { %5543 = shalt.err (!%p5540_p9)
}
  0xff   : > { %s5544_s16 = scalar_lea.vmem %s982_s26, 16  ;;  %s5551_s29 = scalar_lea.vmem %s982_s26, 32 }
 0x100   : > { %p5545_p10 = scmp.ne.s32.totalorder %s982_s26, %s5544_s16  ;;  %p5552_p13 = scmp.lt.s32.totalorder %s982_s26, %s982_s26 }
 0x101   : > { %p5553_p0 = scmp.lt.s32.totalorder %s5551_s29, %s5544_s16 }
 0x102   : > { %p5547_p11 = pnand %p5545_p10, %p6699_p8 }
 0x103   : > { %p5554_p2 = por %p5553_p0, %p5552_p13 }
 0x104   : > { %p5548_p12 = pneg %p5547_p11 }
 0x106   : > { %p5555_p5 = pnand %p5554_p2, %p5548_p12 }
 0x108   : > { %5558 = shalt.err (!%p5555_p5)
}
 0x109   : > { %5073 = dma.hbm_to_vmem [thread:$0]  (!%p6687_p6), %s7699_s20, 16, %s982_s26, [#allocation28]  }
 0x10a   : > { %s6444_s5 = smov [#allocation30]   ;;  %s6445_s10 = smov [#allocation33]  }
 0x10b   : > { %s1005_s7 = sshll.u32 %s6444_s5, 4  ;;  %s1029_s23 = sshll.u32 %s6445_s10, 4  ;;  %s1006_s7 = int_to_ptr.vmem [resolvable:$true] %s1005_s7  ;;  %s1030_s23 = int_to_ptr.vmem [resolvable:$true] %s1029_s23 }
 0x10c   : > { %s5559_s18 = scalar_lea.hbm %s7705_s4, 16 }
 0x10d   : > { %p5560_p7 = scmp.ne.s32.totalorder %s7705_s4, %s5559_s18  ;;  %p5566_p3 = scmp.lt.u32.totalorder %s5559_s18, %s7705_s4 }
 0x10f   : > { %p5562_p4 = pnand %p5560_p7, %p6699_p8 }
 0x111   : > { %p5563_p1 = pneg %p5562_p4 }
 0x113   : > { %p5568_p9 = pnand %p5566_p3, %p5563_p1 }
 0x115   : > { %5571 = shalt.err (!%p5568_p9)
}
 0x116   : > { %s5572_s16 = scalar_lea.vmem %s1006_s7, 16  ;;  %s5579_s26 = scalar_lea.vmem %s1006_s7, 32 }
 0x117   : > { %p5573_p10 = scmp.ne.s32.totalorder %s1006_s7, %s5572_s16  ;;  %p5580_p13 = scmp.lt.s32.totalorder %s1006_s7, %s1006_s7 }
 0x118   : > { %p5581_p0 = scmp.lt.s32.totalorder %s5579_s26, %s5572_s16 }
 0x119   : > { %p5575_p11 = pnand %p5573_p10, %p6699_p8 }
 0x11a   : > { %p5582_p2 = por %p5581_p0, %p5580_p13 }
 0x11b   : > { %p5576_p12 = pneg %p5575_p11 }
 0x11d   : > { %p5583_p5 = pnand %p5582_p2, %p5576_p12 }
 0x11f   : > { %5586 = shalt.err (!%p5583_p5)
}
 0x120   : > { %5079 = dma.hbm_to_vmem [thread:$0]  (!%p6687_p6), %s7705_s4, 16, %s1006_s7, [#allocation31]  }
 0x121   : > { %s5587_s29 = scalar_lea.hbm %s7702_s13, 16 }
 0x122   : > { %p5588_p7 = scmp.ne.s32.totalorder %s7702_s13, %s5587_s29  ;;  %p5594_p3 = scmp.lt.u32.totalorder %s5587_s29, %s7702_s13 }
 0x124   : > { %p5590_p4 = pnand %p5588_p7, %p6699_p8 }
 0x126   : > { %p5591_p1 = pneg %p5590_p4 }
 0x128   : > { %p5596_p9 = pnand %p5594_p3, %p5591_p1 }
 0x12a   : > { %5599 = shalt.err (!%p5596_p9)
}
 0x12b   : > { %s5600_s5 = scalar_lea.vmem %s1030_s23, 16  ;;  %s5607_s10 = scalar_lea.vmem %s1030_s23, 32 }
 0x12c   : > { %p5601_p10 = scmp.ne.s32.totalorder %s1030_s23, %s5600_s5  ;;  %p5608_p13 = scmp.lt.s32.totalorder %s1030_s23, %s1030_s23 }
 0x12d   : > { %p5609_p0 = scmp.lt.s32.totalorder %s5607_s10, %s5600_s5 }
 0x12e   : > { %p5603_p11 = pnand %p5601_p10, %p6699_p8 }
 0x12f   : > { %p5610_p2 = por %p5609_p0, %p5608_p13 }
 0x130   : > { %p5604_p12 = pneg %p5603_p11 }
 0x132   : > { %p5611_p5 = pnand %p5610_p2, %p5604_p12 }
 0x134   : > { %5614 = shalt.err (!%p5611_p5)
}
 0x135   : > { %5085 = dma.hbm_to_vmem [thread:$0]  (!%p6687_p6), %s7702_s13, 16, %s1030_s23, [#allocation34]  }
 0x136   : > { %s6446_s7 = smov [#allocation36]   ;;  %s6447_s16 = smov [#allocation39]  }
 0x137   : > { %s1053_s18 = sshll.u32 %s6446_s7, 4  ;;  %s1075_s26 = sshll.u32 %s6447_s16, 4  ;;  %s1054_s18 = int_to_ptr.vmem [resolvable:$true] %s1053_s18  ;;  %s1076_s26 = int_to_ptr.vmem [resolvable:$true] %s1075_s26 }
 0x138   : > { %s5615_s29 = scalar_lea.hbm %s7694_s27, 16 }
 0x139   : > { %p5616_p7 = scmp.ne.s32.totalorder %s7694_s27, %s5615_s29  ;;  %p5622_p3 = scmp.lt.u32.totalorder %s5615_s29, %s7694_s27 }
 0x13b   : > { %p5618_p4 = pnand %p5616_p7, %p6699_p8 }
 0x13d   : > { %p5619_p1 = pneg %p5618_p4 }
 0x13f   : > { %p5624_p9 = pnand %p5622_p3, %p5619_p1 }
 0x141   : > { %5627 = shalt.err (!%p5624_p9)
}
 0x142   : > { %s5628_s5 = scalar_lea.vmem %s1054_s18, 16  ;;  %s5635_s23 = scalar_lea.vmem %s1054_s18, 32 }
 0x143   : > { %p5629_p10 = scmp.ne.s32.totalorder %s1054_s18, %s5628_s5  ;;  %p5636_p13 = scmp.lt.s32.totalorder %s1054_s18, %s1054_s18 }
 0x144   : > { %p5637_p0 = scmp.lt.s32.totalorder %s5635_s23, %s5628_s5 }
 0x145   : > { %p5631_p11 = pnand %p5629_p10, %p6699_p8 }
 0x146   : > { %p5638_p2 = por %p5637_p0, %p5636_p13 }
 0x147   : > { %p5632_p12 = pneg %p5631_p11 }
 0x149   : > { %p5639_p5 = pnand %p5638_p2, %p5632_p12 }
 0x14b   : > { %5642 = shalt.err (!%p5639_p5)
}
 0x14c   : > { %5091 = dma.hbm_to_vmem [thread:$0]  (!%p6687_p6), %s7694_s27, 16, %s1054_s18, [#allocation37]  }
 0x14d   : > { %s5643_s10 = scalar_lea.hbm %s7703_s12, 16 }
 0x14e   : > { %p5644_p7 = scmp.ne.s32.totalorder %s7703_s12, %s5643_s10  ;;  %p5650_p3 = scmp.lt.u32.totalorder %s5643_s10, %s7703_s12 }
 0x150   : > { %p5646_p4 = pnand %p5644_p7, %p6699_p8 }
 0x152   : > { %p5647_p1 = pneg %p5646_p4 }
 0x154   : > { %p5652_p9 = pnand %p5650_p3, %p5647_p1 }
 0x156   : > { %5655 = shalt.err (!%p5652_p9)
}
 0x157   : > { %s5656_s7 = scalar_lea.vmem %s1076_s26, 16  ;;  %s5663_s16 = scalar_lea.vmem %s1076_s26, 32 }
 0x158   : > { %p5657_p10 = scmp.ne.s32.totalorder %s1076_s26, %s5656_s7  ;;  %p5664_p13 = scmp.lt.s32.totalorder %s1076_s26, %s1076_s26 }
 0x159   : > { %p5665_p0 = scmp.lt.s32.totalorder %s5663_s16, %s5656_s7 }
 0x15a   : > { %p5659_p11 = pnand %p5657_p10, %p6699_p8 }
 0x15b   : > { %p5666_p2 = por %p5665_p0, %p5664_p13 }
 0x15c   : > { %p5660_p12 = pneg %p5659_p11 }
 0x15e   : > { %p5667_p5 = pnand %p5666_p2, %p5660_p12 }
 0x160   : > { %5670 = shalt.err (!%p5667_p5)
}
 0x161   : > { %5097 = dma.hbm_to_vmem [thread:$0]  (!%p6687_p6), %s7703_s12, 16, %s1076_s26, [#allocation40]  }
 0x162   : > { %s6448_s18 = smov [#allocation42]   ;;  %s6449_s5 = smov [#allocation45]  }
 0x163   : > { %s1099_s29 = sshll.u32 %s6448_s18, 4  ;;  %s1123_s23 = sshll.u32 %s6449_s5, 4  ;;  %s1100_s29 = int_to_ptr.vmem [resolvable:$true] %s1099_s29  ;;  %s1124_s23 = int_to_ptr.vmem [resolvable:$true] %s1123_s23 }
 0x164   : > { %s5671_s10 = scalar_lea.hbm %s6613_s30, 16 }
 0x165   : > { %p5672_p7 = scmp.ne.s32.totalorder %s6613_s30, %s5671_s10  ;;  %p5678_p3 = scmp.lt.u32.totalorder %s5671_s10, %s6613_s30 }
 0x167   : > { %p5674_p4 = pnand %p5672_p7, %p6699_p8 }
 0x169   : > { %p5675_p1 = pneg %p5674_p4 }
 0x16b   : > { %p5680_p9 = pnand %p5678_p3, %p5675_p1 }
 0x16d   : > { %5683 = shalt.err (!%p5680_p9)
}
 0x16e   : > { %s5684_s7 = scalar_lea.vmem %s1100_s29, 16  ;;  %s5691_s26 = scalar_lea.vmem %s1100_s29, 32 }
 0x16f   : > { %p5685_p10 = scmp.ne.s32.totalorder %s1100_s29, %s5684_s7  ;;  %p5692_p13 = scmp.lt.s32.totalorder %s1100_s29, %s1100_s29 }
 0x170   : > { %p5693_p0 = scmp.lt.s32.totalorder %s5691_s26, %s5684_s7 }
 0x171   : > { %p5687_p11 = pnand %p5685_p10, %p6699_p8 }
 0x172   : > { %p5694_p2 = por %p5693_p0, %p5692_p13 }
 0x173   : > { %p5688_p12 = pneg %p5687_p11 }
 0x175   : > { %p5695_p5 = pnand %p5694_p2, %p5688_p12 }
 0x177   : > { %5698 = shalt.err (!%p5695_p5)
}
 0x178   : > { %5103 = dma.hbm_to_vmem [thread:$0]  (!%p6687_p6), %s6613_s30, 16, %s1100_s29, [#allocation43]  }
 0x179   : > { %s5699_s16 = scalar_lea.hbm %s7700_s19, 16 }
 0x17a   : > { %p5700_p7 = scmp.ne.s32.totalorder %s7700_s19, %s5699_s16  ;;  %p5706_p3 = scmp.lt.u32.totalorder %s5699_s16, %s7700_s19 }
 0x17c   : > { %p5702_p4 = pnand %p5700_p7, %p6699_p8 }
 0x17e   : > { %p5703_p1 = pneg %p5702_p4 }
 0x180   : > { %p5708_p9 = pnand %p5706_p3, %p5703_p1 }
 0x182   : > { %5711 = shalt.err (!%p5708_p9)
}
 0x183   : > { %s5712_s18 = scalar_lea.vmem %s1124_s23, 16  ;;  %s5719_s5 = scalar_lea.vmem %s1124_s23, 32 }
 0x184   : > { %p5713_p10 = scmp.ne.s32.totalorder %s1124_s23, %s5712_s18  ;;  %p5720_p13 = scmp.lt.s32.totalorder %s1124_s23, %s1124_s23 }
 0x185   : > { %p5721_p0 = scmp.lt.s32.totalorder %s5719_s5, %s5712_s18 }
 0x186   : > { %p5715_p11 = pnand %p5713_p10, %p6699_p8 }
 0x187   : > { %p5722_p2 = por %p5721_p0, %p5720_p13 }
 0x188   : > { %p5716_p12 = pneg %p5715_p11 }
 0x18a   : > { %p5723_p5 = pnand %p5722_p2, %p5716_p12 }
 0x18c   : > { %5726 = shalt.err (!%p5723_p5)
}
 0x18d   : > { %5109 = dma.hbm_to_vmem [thread:$0]  (!%p6687_p6), %s7700_s19, 16, %s1124_s23, [#allocation46]  }
 0x18e   : > { %s7627_s29 = sadd.s32 4294967294, %s6401_s2   ;;  %s6853_s10 = sadd.s32 1, %s6401_s2  }
 0x18f   : > { %s111_s7 = sadd.s32 1, %s6397_s1  ;;  %s108_s26 = ssub.s32 %s6401_s2, %s6853_s10 }
 0x190   : > { %p118_p7 = scmp.ne.s32.totalorder %s6397_s1, %s6393_s28  ;;  %p109_p4 = scmp.eq.s32.totalorder %s108_s26, 0 }
 0x191   : > { %p119_p1 = scmp.eq.s32.totalorder %s6401_s2, 0  ;;  %p124_p3 = scmp.ne.s32.totalorder %s6393_s28, %s6389_s0 }
 0x192   : > { %p772_p9 = scmp.eq.s32.totalorder %s6671_s11, 1  ;;  %p7710_p11 = scmp.eq.s32.totalorder %s6671_s11, 0 }
 0x193   : > { %s6865_s16 = scalar_select %p109_p4, %s6397_s1, %s111_s7  }
 0x194   : > { %p120_p10 = por %p119_p1, %p118_p7  ;;  %p6869_p12 = por %p7710_p11, %p124_p3 }
 0x195   : > { %p6873_p13 = por %p772_p9, %p118_p7  ;;  %p778_p0 = scmp.eq.s32.totalorder %s7627_s29, 1 }
 0x196   : > { %s7711_s23 = scalar_select %p6869_p12, 1, 0 }
 0x197   : > { %s7712_s18 = scalar_select %p6873_p13, 1, 0 }
 0x198   : > { %p5165_p2 = scmp.lt.s32.totalorder %s6401_s2, 2  ;;  %s6881_s5 = sand.u32 1, %s6397_s1  }
 0x199   : > { %p6883_p5 = por %p778_p0, %p124_p3  ;;  %s7638_s26 = sand.u32 1, %s6401_s2  }
 0x19a   : > { %p6888_p4 = pnand %p5165_p2, %p120_p10  ;;  %s4401_s4 = sshll.u32 %s6881_s5, 4 }
 0x19b   : > { %s7713_s7 = scalar_select %p6883_p5, 1, 0 }
 0x19c   : > { %s7714_s3 = scalar_select %p6888_p4, 1, 0 }
 0x19d   : > { %s4508_s6 = sshll.u32 %s6401_s2, 8  ;;  %s1178_s29 = scalar_lea.vmem [#allocation6], %s4401_s4 }
 0x19e   : > { %s6895_s12 = scalar_lea.hbm %s7697_s9, %s4508_s6  ;;  %s1185_s13 = sshll.u32 %s1178_s29, 4  ;;  %s6897_s13 = int_to_ptr.vmem [resolvable:$true] %s1185_s13 }
 0x19f   : > { %s6901_s14 = scalar_lea.sflag [#allocation7], %s7638_s26  ;;  %s5727_s19 = scalar_lea.hbm %s6895_s12, 256 }
 0x1a0   : > { %p5728_p7 = scmp.ne.s32.totalorder %s6895_s12, %s5727_s19  ;;  %p6907_p1 = pneg %p6888_p4 }
 0x1a1   : > { %s5732_s6 = scalar_lea.hbm %s7697_s9, 512  ;;  %p5733_p10 = scmp.lt.u32.totalorder %s6895_s12, %s7697_s9 }
 0x1a2   : > { %s7715_s20 = scalar_select %p6907_p1, 1, 0 }
 0x1a3   : > { %p5730_p3 = pnand %p6907_p1, %p5728_p7  ;;  %p5734_p11 = scmp.lt.u32.totalorder %s5732_s6, %s5727_s19 }
 0x1a4   : > { %p5736_p2 = scmp.lt.u32.totalorder %s5727_s19, %s6895_s12 }
 0x1a5   : > { %p5731_p9 = pneg %p5730_p3  ;;  %p5735_p0 = por %p5734_p11, %p5733_p10 }
 0x1a7   : > { %p5737_p5 = por %p5736_p2, %p5735_p0 }
 0x1a9   : > { %p5738_p13 = pnand %p5737_p5, %p5731_p9 }
 0x1ab   : > { %5741 = shalt.err (!%p5738_p13)
}
 0x1ac   : > { %s5742_s4 = scalar_lea.vmem %s6897_s13, 256  ;;  %s6450_s29 = smov [#allocation6]  }
 0x1ad   : > { %p5743_p12 = scmp.ne.s32.totalorder %s6897_s13, %s5742_s4  ;;  %s5747_s26 = sshll.u32 %s6450_s29, 4  ;;  %s5748_s26 = int_to_ptr.vmem [resolvable:$false] %s5747_s26 }
 0x1ae   : > { %s5749_s21 = scalar_lea.vmem %s5748_s26, 512  ;;  %p5750_p7 = scmp.lt.s32.totalorder %s6897_s13, %s5748_s26 }
 0x1af   : > { %p5745_p6 = pnand %p5743_p12, %p6907_p1  ;;  %p5751_p3 = scmp.lt.s32.totalorder %s5749_s21, %s5742_s4 }
 0x1b1   : > { %p5746_p8 = pneg %p5745_p6  ;;  %p5752_p10 = por %p5751_p3, %p5750_p7 }
 0x1b3   : > { %p5753_p11 = pnand %p5752_p10, %p5746_p8 }
 0x1b5   : > { %5756 = shalt.err (!%p5753_p11)
}
 0x1b6   : > { %s7716_s19 = smov 8   ;;  %s7717_s6 = smov 128  }
 0x1b7   : > { %s7718_s9 = sld [smem:[#allocation79_spill]]  ;;  %s6451_s29 = smov [#allocation14]  }
 0x1b8   : > { %5122 = dma.hbm_to_vmem [thread:$0]  (!%p6888_p4), %s6895_s12, 256, %s6897_s13, %s6901_s14, %s7717_s6, %s7717_s6, %s7716_s19  }
 0x1b9   : > { %s873_s24 = sshll.u32 %s6451_s29, 4  ;;  %s6452_s21 = smov [#allocation17]   ;;  %s874_s24 = int_to_ptr.vmem [resolvable:$true] %s873_s24 }
 0x1ba   : > { %s897_s26 = sshll.u32 %s6452_s21, 4  ;;  %p7719_p8 = scmp.ne.s32.totalorder %s7709_s17, 0  ;;  %s898_s26 = int_to_ptr.vmem [resolvable:$true] %s897_s26 }
 0x1bd   : > { %s5757_s4 = scalar_lea.hbm %s7718_s9, 512 }
 0x1be   : > { %p5758_p6 = scmp.ne.s32.totalorder %s7718_s9, %s5757_s4  ;;  %p5764_p5 = scmp.lt.u32.totalorder %s5757_s4, %s7718_s9 }
 0x1c0   : > { %p5760_p12 = pnand %p5758_p6, %p7719_p8 }
 0x1c2   : > { %p5761_p13 = pneg %p5760_p12 }
 0x1c4   : > { %p5766_p9 = pnand %p5764_p5, %p5761_p13 }
 0x1c6   : > { %5769 = shalt.err (!%p5766_p9)
}
 0x1c7   : > { %s5770_s25 = scalar_lea.vmem %s874_s24, 512  ;;  %p5778_p3 = scmp.lt.s32.totalorder %s874_s24, %s874_s24 }
 0x1c8   : > { %p5771_p0 = scmp.ne.s32.totalorder %s874_s24, %s5770_s25  ;;  %p5779_p10 = scmp.lt.s32.totalorder %s5770_s25, %s5770_s25 }
 0x1ca   : > { %p5773_p2 = pnand %p5771_p0, %p7719_p8  ;;  %p5780_p11 = por %p5779_p10, %p5778_p3 }
 0x1cc   : > { %p5774_p7 = pneg %p5773_p2 }
 0x1ce   : > { %p5781_p4 = pnand %p5780_p11, %p5774_p7 }
 0x1d0   : > { %5784 = shalt.err (!%p5781_p4)
}
 0x1d1   : > { %p7720_p1 = scmp.ne.s32.totalorder %s7708_s22, 0  ;;  %s7721_s13 = sld [smem:[#allocation81_spill]] }
 0x1d3   : > { %5046 = dma.hbm_to_vmem [thread:$0]  (!%p7720_p1), %s7718_s9, 512, %s874_s24, [#allocation13], %s7717_s6, %s7717_s6, %s7716_s19  }
 0x1d7   : > { %s5785_s12 = scalar_lea.hbm %s7721_s13, 512 }
 0x1d8   : > { %p5786_p6 = scmp.ne.s32.totalorder %s7721_s13, %s5785_s12  ;;  %p5792_p5 = scmp.lt.u32.totalorder %s5785_s12, %s7721_s13 }
 0x1da   : > { %p5788_p12 = pnand %p5786_p6, %p7719_p8 }
 0x1dc   : > { %p5789_p13 = pneg %p5788_p12 }
 0x1de   : > { %p5794_p9 = pnand %p5792_p5, %p5789_p13 }
 0x1e0   : > { %5797 = shalt.err (!%p5794_p9)
}
 0x1e1   : > { %s5798_s25 = scalar_lea.vmem %s898_s26, 512  ;;  %p5806_p7 = scmp.lt.s32.totalorder %s898_s26, %s898_s26 }
 0x1e2   : > { %p5799_p4 = scmp.ne.s32.totalorder %s898_s26, %s5798_s25  ;;  %p5807_p3 = scmp.lt.s32.totalorder %s5798_s25, %s5798_s25 }
 0x1e4   : > { %p5801_p0 = pnand %p5799_p4, %p7719_p8  ;;  %p5808_p10 = por %p5807_p3, %p5806_p7 }
 0x1e6   : > { %p5802_p2 = pneg %p5801_p0 }
 0x1e8   : > { %p5809_p11 = pnand %p5808_p10, %p5802_p2 }
 0x1ea   : > { %5812 = shalt.err (!%p5809_p11)
}
 0x1eb   : > { %s7722_s24 = sld [smem:[#allocation83_spill]]  ;;  %s6453_s29 = smov [#allocation20]  }
 0x1ec   : > { %5052 = dma.hbm_to_vmem [thread:$0]  (!%p7720_p1), %s7721_s13, 512, %s898_s26, [#allocation16], %s7717_s6, %s7717_s6, %s7716_s19  }
 0x1ed   : > { %s921_s21 = sshll.u32 %s6453_s29, 4  ;;  %s6454_s4 = smov [#allocation23]   ;;  %s922_s21 = int_to_ptr.vmem [resolvable:$true] %s921_s21 }
 0x1ee   : > { %s946_s12 = sshll.u32 %s6454_s4, 4  ;;  %s947_s12 = int_to_ptr.vmem [resolvable:$true] %s946_s12 }
 0x1f1   : > { %s5813_s25 = scalar_lea.hbm %s7722_s24, 512 }
 0x1f2   : > { %p5814_p6 = scmp.ne.s32.totalorder %s7722_s24, %s5813_s25  ;;  %p5820_p5 = scmp.lt.u32.totalorder %s5813_s25, %s7722_s24 }
 0x1f4   : > { %p5816_p12 = pnand %p5814_p6, %p7719_p8 }
 0x1f6   : > { %p5817_p13 = pneg %p5816_p12 }
 0x1f8   : > { %p5822_p9 = pnand %p5820_p5, %p5817_p13 }
 0x1fa   : > { %5825 = shalt.err (!%p5822_p9)
}
 0x1fb   : > { %s5826_s9 = scalar_lea.vmem %s922_s21, 512  ;;  %p5834_p7 = scmp.lt.s32.totalorder %s922_s21, %s922_s21 }
 0x1fc   : > { %p5827_p4 = scmp.ne.s32.totalorder %s922_s21, %s5826_s9  ;;  %p5835_p3 = scmp.lt.s32.totalorder %s5826_s9, %s5826_s9 }
 0x1fe   : > { %p5829_p0 = pnand %p5827_p4, %p7719_p8  ;;  %p5836_p10 = por %p5835_p3, %p5834_p7 }
 0x200   : > { %p5830_p2 = pneg %p5829_p0 }
 0x202   : > { %p5837_p11 = pnand %p5836_p10, %p5830_p2 }
 0x204   : > { %5840 = shalt.err (!%p5837_p11)
}
 0x205   : > { %s7723_s26 = sld [smem:[#allocation85_spill]] }
 0x206   : > { %5058 = dma.hbm_to_vmem [thread:$0]  (!%p7720_p1), %s7722_s24, 512, %s922_s21, [#allocation19], %s7717_s6, %s7717_s6, %s7716_s19  }
 0x20b   : > { %s5841_s29 = scalar_lea.hbm %s7723_s26, 16 }
 0x20c   : > { %p5842_p6 = scmp.ne.s32.totalorder %s7723_s26, %s5841_s29  ;;  %p5848_p5 = scmp.lt.u32.totalorder %s5841_s29, %s7723_s26 }
 0x20e   : > { %p5844_p12 = pnand %p5842_p6, %p7719_p8 }
 0x210   : > { %p5845_p13 = pneg %p5844_p12 }
 0x212   : > { %p5850_p9 = pnand %p5848_p5, %p5845_p13 }
 0x214   : > { %5853 = shalt.err (!%p5850_p9)
}
 0x215   : > { %s5854_s9 = scalar_lea.vmem %s947_s12, 16  ;;  %s5861_s4 = scalar_lea.vmem %s947_s12, 32 }
 0x216   : > { %p5855_p4 = scmp.ne.s32.totalorder %s947_s12, %s5854_s9  ;;  %p5862_p7 = scmp.lt.s32.totalorder %s947_s12, %s947_s12 }
 0x217   : > { %p5863_p3 = scmp.lt.s32.totalorder %s5861_s4, %s5854_s9 }
 0x218   : > { %p5857_p0 = pnand %p5855_p4, %p7719_p8 }
 0x219   : > { %p5864_p10 = por %p5863_p3, %p5862_p7 }
 0x21a   : > { %p5858_p2 = pneg %p5857_p0 }
 0x21c   : > { %p5865_p11 = pnand %p5864_p10, %p5858_p2 }
 0x21e   : > { %5868 = shalt.err (!%p5865_p11)
}
 0x21f   : > { %s7724_s21 = sld [smem:[#allocation87_spill]]  ;;  %s6455_s25 = smov [#allocation26]  }
 0x220   : > { %5064 = dma.hbm_to_vmem [thread:$0]  (!%p7720_p1), %s7723_s26, 16, %s947_s12, [#allocation22]  }
 0x221   : > { %s967_s29 = sshll.u32 %s6455_s25, 4  ;;  %s6456_s13 = smov [#allocation29]   ;;  %s968_s29 = int_to_ptr.vmem [resolvable:$true] %s967_s29 }
 0x222   : > { %s991_s24 = sshll.u32 %s6456_s13, 4  ;;  %s992_s24 = int_to_ptr.vmem [resolvable:$true] %s991_s24 }
 0x225   : > { %s5869_s27 = scalar_lea.hbm %s7724_s21, 512 }
 0x226   : > { %p5870_p6 = scmp.ne.s32.totalorder %s7724_s21, %s5869_s27  ;;  %p5876_p5 = scmp.lt.u32.totalorder %s5869_s27, %s7724_s21 }
 0x228   : > { %p5872_p12 = pnand %p5870_p6, %p7719_p8 }
 0x22a   : > { %p5873_p13 = pneg %p5872_p12 }
 0x22c   : > { %p5878_p9 = pnand %p5876_p5, %p5873_p13 }
 0x22e   : > { %5881 = shalt.err (!%p5878_p9)
}
 0x22f   : > { %s5882_s9 = scalar_lea.vmem %s968_s29, 512  ;;  %p5890_p7 = scmp.lt.s32.totalorder %s968_s29, %s968_s29 }
 0x230   : > { %p5883_p4 = scmp.ne.s32.totalorder %s968_s29, %s5882_s9  ;;  %p5891_p3 = scmp.lt.s32.totalorder %s5882_s9, %s5882_s9 }
 0x232   : > { %p5885_p0 = pnand %p5883_p4, %p7719_p8  ;;  %p5892_p10 = por %p5891_p3, %p5890_p7 }
 0x234   : > { %p5886_p2 = pneg %p5885_p0 }
 0x236   : > { %p5893_p11 = pnand %p5892_p10, %p5886_p2 }
 0x238   : > { %5896 = shalt.err (!%p5893_p11)
}
 0x239   : > { %s7725_s27 = sld [smem:[#allocation89_spill]] }
 0x23a   : > { %5070 = dma.hbm_to_vmem [thread:$0]  (!%p7720_p1), %s7724_s21, 512, %s968_s29, [#allocation25], %s7717_s6, %s7717_s6, %s7716_s19  }
 0x23f   : > { %s5897_s13 = scalar_lea.hbm %s7725_s27, 512 }
 0x240   : > { %p5898_p6 = scmp.ne.s32.totalorder %s7725_s27, %s5897_s13  ;;  %p5904_p5 = scmp.lt.u32.totalorder %s5897_s13, %s7725_s27 }
 0x242   : > { %p5900_p12 = pnand %p5898_p6, %p7719_p8 }
 0x244   : > { %p5901_p13 = pneg %p5900_p12 }
 0x246   : > { %p5906_p9 = pnand %p5904_p5, %p5901_p13 }
 0x248   : > { %5909 = shalt.err (!%p5906_p9)
}
 0x249   : > { %s5910_s12 = scalar_lea.vmem %s992_s24, 512  ;;  %p5918_p7 = scmp.lt.s32.totalorder %s992_s24, %s992_s24 }
 0x24a   : > { %p5911_p4 = scmp.ne.s32.totalorder %s992_s24, %s5910_s12  ;;  %p5919_p3 = scmp.lt.s32.totalorder %s5910_s12, %s5910_s12 }
 0x24c   : > { %p5913_p0 = pnand %p5911_p4, %p7719_p8  ;;  %p5920_p10 = por %p5919_p3, %p5918_p7 }
 0x24e   : > { %p5914_p2 = pneg %p5913_p0 }
 0x250   : > { %p5921_p11 = pnand %p5920_p10, %p5914_p2 }
 0x252   : > { %5924 = shalt.err (!%p5921_p11)
}
 0x253   : > { %s7726_s4 = sld [smem:[#allocation91_spill]]  ;;  %s6457_s25 = smov [#allocation32]  }
 0x254   : > { %5076 = dma.hbm_to_vmem [thread:$0]  (!%p7720_p1), %s7725_s27, 512, %s992_s24, [#allocation28], %s7717_s6, %s7717_s6, %s7716_s19  }
 0x255   : > { %s1015_s29 = sshll.u32 %s6457_s25, 4  ;;  %s6458_s9 = smov [#allocation35]   ;;  %s1016_s29 = int_to_ptr.vmem [resolvable:$true] %s1015_s29 }
 0x256   : > { %s1039_s13 = sshll.u32 %s6458_s9, 4  ;;  %s1040_s13 = int_to_ptr.vmem [resolvable:$true] %s1039_s13 }
 0x259   : > { %s5925_s12 = scalar_lea.hbm %s7726_s4, 512 }
 0x25a   : > { %p5926_p6 = scmp.ne.s32.totalorder %s7726_s4, %s5925_s12  ;;  %p5932_p5 = scmp.lt.u32.totalorder %s5925_s12, %s7726_s4 }
 0x25c   : > { %p5928_p12 = pnand %p5926_p6, %p7719_p8 }
 0x25e   : > { %p5929_p13 = pneg %p5928_p12 }
 0x260   : > { %p5934_p9 = pnand %p5932_p5, %p5929_p13 }
 0x262   : > { %5937 = shalt.err (!%p5934_p9)
}
 0x263   : > { %s5938_s21 = scalar_lea.vmem %s1016_s29, 512  ;;  %p5946_p7 = scmp.lt.s32.totalorder %s1016_s29, %s1016_s29 }
 0x264   : > { %p5939_p4 = scmp.ne.s32.totalorder %s1016_s29, %s5938_s21  ;;  %p5947_p3 = scmp.lt.s32.totalorder %s5938_s21, %s5938_s21 }
 0x266   : > { %p5941_p0 = pnand %p5939_p4, %p7719_p8  ;;  %p5948_p10 = por %p5947_p3, %p5946_p7 }
 0x268   : > { %p5942_p2 = pneg %p5941_p0 }
 0x26a   : > { %p5949_p11 = pnand %p5948_p10, %p5942_p2 }
 0x26c   : > { %5952 = shalt.err (!%p5949_p11)
}
 0x26d   : > { %s7727_s24 = sld [smem:[#allocation93_spill]] }
 0x26e   : > { %5082 = dma.hbm_to_vmem [thread:$0]  (!%p7720_p1), %s7726_s4, 512, %s1016_s29, [#allocation31], %s7717_s6, %s7717_s6, %s7716_s19  }
 0x273   : > { %s5953_s25 = scalar_lea.hbm %s7727_s24, 512 }
 0x274   : > { %p5954_p6 = scmp.ne.s32.totalorder %s7727_s24, %s5953_s25  ;;  %p5960_p5 = scmp.lt.u32.totalorder %s5953_s25, %s7727_s24 }
 0x276   : > { %p5956_p12 = pnand %p5954_p6, %p7719_p8 }
 0x278   : > { %p5957_p13 = pneg %p5956_p12 }
 0x27a   : > { %p5962_p9 = pnand %p5960_p5, %p5957_p13 }
 0x27c   : > { %5965 = shalt.err (!%p5962_p9)
}
 0x27d   : > { %s5966_s21 = scalar_lea.vmem %s1040_s13, 512  ;;  %p5974_p7 = scmp.lt.s32.totalorder %s1040_s13, %s1040_s13 }
 0x27e   : > { %p5967_p4 = scmp.ne.s32.totalorder %s1040_s13, %s5966_s21  ;;  %p5975_p3 = scmp.lt.s32.totalorder %s5966_s21, %s5966_s21 }
 0x280   : > { %p5969_p0 = pnand %p5967_p4, %p7719_p8  ;;  %p5976_p10 = por %p5975_p3, %p5974_p7 }
 0x282   : > { %p5970_p2 = pneg %p5969_p0 }
 0x284   : > { %p5977_p11 = pnand %p5976_p10, %p5970_p2 }
 0x286   : > { %5980 = shalt.err (!%p5977_p11)
}
 0x287   : > { %s7728_s29 = sld [smem:[#allocation95_spill]]  ;;  %s6459_s9 = smov [#allocation38]  }
 0x288   : > { %5088 = dma.hbm_to_vmem [thread:$0]  (!%p7720_p1), %s7727_s24, 512, %s1040_s13, [#allocation34], %s7717_s6, %s7717_s6, %s7716_s19  }
 0x289   : > { %s1064_s12 = sshll.u32 %s6459_s9, 4  ;;  %s6460_s25 = smov [#allocation41]   ;;  %s1065_s12 = int_to_ptr.vmem [resolvable:$true] %s1064_s12 }
 0x28a   : > { %s1085_s4 = sshll.u32 %s6460_s25, 4  ;;  %s1086_s4 = int_to_ptr.vmem [resolvable:$true] %s1085_s4 }
 0x28d   : > { %s5981_s21 = scalar_lea.hbm %s7728_s29, 16 }
 0x28e   : > { %p5982_p6 = scmp.ne.s32.totalorder %s7728_s29, %s5981_s21  ;;  %p5988_p5 = scmp.lt.u32.totalorder %s5981_s21, %s7728_s29 }
 0x290   : > { %p5984_p12 = pnand %p5982_p6, %p7719_p8 }
 0x292   : > { %p5985_p13 = pneg %p5984_p12 }
 0x294   : > { %p5990_p9 = pnand %p5988_p5, %p5985_p13 }
 0x296   : > { %5993 = shalt.err (!%p5990_p9)
}
 0x297   : > { %s5994_s26 = scalar_lea.vmem %s1065_s12, 16  ;;  %s6001_s13 = scalar_lea.vmem %s1065_s12, 32 }
 0x298   : > { %p5995_p4 = scmp.ne.s32.totalorder %s1065_s12, %s5994_s26  ;;  %p6002_p7 = scmp.lt.s32.totalorder %s1065_s12, %s1065_s12 }
 0x299   : > { %p6003_p3 = scmp.lt.s32.totalorder %s6001_s13, %s5994_s26 }
 0x29a   : > { %p5997_p0 = pnand %p5995_p4, %p7719_p8 }
 0x29b   : > { %p6004_p10 = por %p6003_p3, %p6002_p7 }
 0x29c   : > { %p5998_p2 = pneg %p5997_p0 }
 0x29e   : > { %p6005_p11 = pnand %p6004_p10, %p5998_p2 }
 0x2a0   : > { %6008 = shalt.err (!%p6005_p11)
}
 0x2a1   : > { %s7729_s9 = sld [smem:[#allocation97_spill]] }
 0x2a2   : > { %5094 = dma.hbm_to_vmem [thread:$0]  (!%p7720_p1), %s7728_s29, 16, %s1065_s12, [#allocation37]  }
 0x2a7   : > { %s6009_s25 = scalar_lea.hbm %s7729_s9, 512 }
 0x2a8   : > { %p6010_p6 = scmp.ne.s32.totalorder %s7729_s9, %s6009_s25  ;;  %p6016_p5 = scmp.lt.u32.totalorder %s6009_s25, %s7729_s9 }
 0x2aa   : > { %p6012_p12 = pnand %p6010_p6, %p7719_p8 }
 0x2ac   : > { %p6013_p13 = pneg %p6012_p12 }
 0x2ae   : > { %p6018_p9 = pnand %p6016_p5, %p6013_p13 }
 0x2b0   : > { %6021 = shalt.err (!%p6018_p9)
}
 0x2b1   : > { %s6022_s26 = scalar_lea.vmem %s1086_s4, 512  ;;  %p6030_p7 = scmp.lt.s32.totalorder %s1086_s4, %s1086_s4 }
 0x2b2   : > { %p6023_p4 = scmp.ne.s32.totalorder %s1086_s4, %s6022_s26  ;;  %p6031_p3 = scmp.lt.s32.totalorder %s6022_s26, %s6022_s26 }
 0x2b4   : > { %p6025_p0 = pnand %p6023_p4, %p7719_p8  ;;  %p6032_p10 = por %p6031_p3, %p6030_p7 }
 0x2b6   : > { %p6026_p2 = pneg %p6025_p0 }
 0x2b8   : > { %p6033_p11 = pnand %p6032_p10, %p6026_p2 }
 0x2ba   : > { %6036 = shalt.err (!%p6033_p11)
}
 0x2bb   : > { %s7730_s12 = sld [smem:[#allocation98_spill]]  ;;  %s6461_s21 = smov [#allocation44]  }
 0x2bc   : > { %5100 = dma.hbm_to_vmem [thread:$0]  (!%p7720_p1), %s7729_s9, 512, %s1086_s4, [#allocation40], %s7717_s6, %s7717_s6, %s7716_s19  }
 0x2bd   : > { %s1109_s13 = sshll.u32 %s6461_s21, 4  ;;  %s6462_s25 = smov [#allocation47]   ;;  %s1110_s13 = int_to_ptr.vmem [resolvable:$true] %s1109_s13 }
 0x2be   : > { %s1134_s24 = sshll.u32 %s6462_s25, 4  ;;  %s1135_s24 = int_to_ptr.vmem [resolvable:$true] %s1134_s24 }
 0x2c1   : > { %s6037_s26 = scalar_lea.hbm %s7730_s12, 1024 }
 0x2c2   : > { %p6038_p6 = scmp.ne.s32.totalorder %s7730_s12, %s6037_s26  ;;  %p6044_p5 = scmp.lt.u32.totalorder %s6037_s26, %s7730_s12 }
 0x2c4   : > { %p6040_p12 = pnand %p6038_p6, %p7719_p8 }
 0x2c6   : > { %p6041_p13 = pneg %p6040_p12 }
 0x2c8   : > { %p6046_p9 = pnand %p6044_p5, %p6041_p13 }
 0x2ca   : > { %6049 = shalt.err (!%p6046_p9)
}
 0x2cb   : > { %s6050_s27 = scalar_lea.vmem %s1110_s13, 1024  ;;  %p6058_p7 = scmp.lt.s32.totalorder %s1110_s13, %s1110_s13 }
 0x2cc   : > { %p6051_p4 = scmp.ne.s32.totalorder %s1110_s13, %s6050_s27  ;;  %p6059_p3 = scmp.lt.s32.totalorder %s6050_s27, %s6050_s27 }
 0x2ce   : > { %p6053_p0 = pnand %p6051_p4, %p7719_p8  ;;  %p6060_p10 = por %p6059_p3, %p6058_p7 }
 0x2d0   : > { %p6054_p2 = pneg %p6053_p0 }
 0x2d2   : > { %p6061_p11 = pnand %p6060_p10, %p6054_p2 }
 0x2d4   : > { %6064 = shalt.err (!%p6061_p11)
}
 0x2d5   : > { %s7731_s4 = sld [smem:[#allocation100_spill]] }
 0x2d6   : > { %5106 = dma.hbm_to_vmem [thread:$0]  (!%p7720_p1), %s7730_s12, 1024, %s1110_s13, [#allocation43], %s7717_s6, %s7717_s6, %s7716_s19  }
 0x2db   : > { %s6065_s21 = scalar_lea.hbm %s7731_s4, 16 }
 0x2dc   : > { %p6066_p6 = scmp.ne.s32.totalorder %s7731_s4, %s6065_s21  ;;  %p6072_p5 = scmp.lt.u32.totalorder %s6065_s21, %s7731_s4 }
 0x2de   : > { %p6068_p12 = pnand %p6066_p6, %p7719_p8 }
 0x2e0   : > { %p6069_p13 = pneg %p6068_p12 }
 0x2e2   : > { %p6074_p9 = pnand %p6072_p5, %p6069_p13 }
 0x2e4   : > { %6077 = shalt.err (!%p6074_p9)
}
 0x2e5   : > { %s6078_s27 = scalar_lea.vmem %s1135_s24, 16  ;;  %s6085_s25 = scalar_lea.vmem %s1135_s24, 32 }
 0x2e6   : > { %p6079_p4 = scmp.ne.s32.totalorder %s1135_s24, %s6078_s27  ;;  %p6086_p7 = scmp.lt.s32.totalorder %s1135_s24, %s1135_s24 }
 0x2e7   : > { %p6087_p3 = scmp.lt.s32.totalorder %s6085_s25, %s6078_s27 }
 0x2e8   : > { %p6081_p0 = pnand %p6079_p4, %p7719_p8 }
 0x2e9   : > { %p6088_p10 = por %p6087_p3, %p6086_p7 }
 0x2ea   : > { %p6082_p2 = pneg %p6081_p0 }
 0x2ec   : > { %p6089_p11 = pnand %p6088_p10, %p6082_p2 }
 0x2ee   : > { %6092 = shalt.err (!%p6089_p11)
}
 0x2ef   : > { %5112 = dma.hbm_to_vmem [thread:$0]  (!%p7720_p1), %s7731_s4, 16, %s1135_s24, [#allocation46]  }
 0x2f0   : > { %s6463_s19 = smov [#allocation48]   ;;  %s4399_s13 = sshll.u32 %s6881_s5, 3 }
 0x2f1   : > { %s1145_s6 = sshll.u32 %s6463_s19, 4  ;;  %s6093_s26 = scalar_lea.hbm %s7693_s8, 16  ;;  %s1146_s6 = int_to_ptr.vmem [resolvable:$true] %s1145_s6 }
 0x2f2   : > { %p6094_p6 = scmp.ne.s32.totalorder %s7693_s8, %s6093_s26  ;;  %p6100_p5 = scmp.lt.u32.totalorder %s6093_s26, %s7693_s8 }
 0x2f4   : > { %p6096_p12 = pnand %p6094_p6, %p7719_p8 }
 0x2f6   : > { %p6097_p13 = pneg %p6096_p12 }
 0x2f8   : > { %p6102_p9 = pnand %p6100_p5, %p6097_p13 }
 0x2fa   : > { %6105 = shalt.err (!%p6102_p9)
}
 0x2fb   : > { %s6106_s21 = scalar_lea.vmem %s1146_s6, 16  ;;  %s6113_s27 = scalar_lea.vmem %s1146_s6, 32 }
 0x2fc   : > { %p6107_p4 = scmp.ne.s32.totalorder %s1146_s6, %s6106_s21  ;;  %p6114_p7 = scmp.lt.s32.totalorder %s1146_s6, %s1146_s6 }
 0x2fd   : > { %p6115_p3 = scmp.lt.s32.totalorder %s6113_s27, %s6106_s21 }
 0x2fe   : > { %p6109_p0 = pnand %p6107_p4, %p7719_p8 }
 0x2ff   : > { %p6116_p10 = por %p6115_p3, %p6114_p7 }
 0x300   : > { %p6110_p2 = pneg %p6109_p0 }
 0x302   : > { %p6117_p11 = pnand %p6116_p10, %p6110_p2 }
 0x304   : > { %6120 = shalt.err (!%p6117_p11)
}
 0x305   : > { %s7732_s24 = sld [smem:[#allocation73_spill]]  ;;  %s4400_s25 = sshll.u32 %s6401_s2, 7 }
 0x306   : > { %5115 = dma.hbm_to_vmem [thread:$0]  (!%p7720_p1), %s7693_s8, 16, %s1146_s6, [#allocation49]  }
 0x307   : > { %s1160_s19 = scalar_lea.vmem [#allocation3], %s4399_s13  ;;  %s1157_s21 = scalar_lea.sflag [#allocation4], %s6881_s5 }
 0x308   : > { %s1167_s26 = sshll.u32 %s1160_s19, 4  ;;  %p7733_p6 = scmp.ne.s32.totalorder %s7715_s20, 0  ;;  %s1168_s26 = int_to_ptr.vmem [resolvable:$true] %s1167_s26 }
 0x30b   : > { %s7090_s17 = scalar_lea.hbm %s7732_s24, %s4400_s25  ;;  %s6126_s27 = scalar_lea.hbm %s7732_s24, 256 }
 0x30c   : > { %s6121_s22 = scalar_lea.hbm %s7090_s17, 128  ;;  %p6127_p5 = scmp.lt.u32.totalorder %s7090_s17, %s7732_s24 }
 0x30d   : > { %p6122_p8 = scmp.ne.s32.totalorder %s7090_s17, %s6121_s22  ;;  %p6128_p9 = scmp.lt.u32.totalorder %s6126_s27, %s6121_s22 }
 0x30e   : > { %p6130_p4 = scmp.lt.u32.totalorder %s6121_s22, %s7090_s17 }
 0x30f   : > { %p6124_p12 = pnand %p6122_p8, %p7733_p6  ;;  %p6129_p1 = por %p6128_p9, %p6127_p5 }
 0x311   : > { %p6125_p13 = pneg %p6124_p12  ;;  %p6131_p0 = por %p6130_p4, %p6129_p1 }
 0x313   : > { %p6132_p2 = pnand %p6131_p0, %p6125_p13 }
 0x315   : > { %6135 = shalt.err (!%p6132_p2)
}
 0x316   : > { %s6136_s6 = scalar_lea.vmem %s1168_s26, 128  ;;  %s6464_s13 = smov [#allocation3]  }
 0x317   : > { %p6137_p7 = scmp.ne.s32.totalorder %s1168_s26, %s6136_s6  ;;  %s6141_s25 = sshll.u32 %s6464_s13, 4  ;;  %s6142_s25 = int_to_ptr.vmem [resolvable:$false] %s6141_s25 }
 0x318   : > { %s6143_s19 = scalar_lea.vmem %s6142_s25, 256  ;;  %p6144_p11 = scmp.lt.s32.totalorder %s1168_s26, %s6142_s25 }
 0x319   : > { %p6139_p3 = pnand %p6137_p7, %p7733_p6  ;;  %p6145_p8 = scmp.lt.s32.totalorder %s6143_s19, %s6136_s6 }
 0x31b   : > { %p6140_p10 = pneg %p6139_p3  ;;  %p6146_p12 = por %p6145_p8, %p6144_p11 }
 0x31d   : > { %p6147_p5 = pnand %p6146_p12, %p6140_p10 }
 0x31f   : > { %6150 = shalt.err (!%p6147_p5)
}
 0x320   : > { %p7734_p9 = scmp.ne.s32.totalorder %s7714_s3, 0  ;;  %s7735_s22 = sld [smem:[#allocation75_spill]] }
 0x321   : > { %s4404_s27 = sshll.u32 %s6401_s2, 4  ;;  %s1198_s4 = scalar_lea.vmem [#allocation8], %s6881_s5 }
 0x322   : > { %5119 = dma.hbm_to_vmem [thread:$0]  (!%p7734_p9), %s7090_s17, 128, %s1168_s26, %s1157_s21  }
 0x323   : > { %s1205_s13 = sshll.u32 %s1198_s4, 4  ;;  %s1206_s13 = int_to_ptr.vmem [resolvable:$true] %s1205_s13 }
 0x326   : > { %s1203_s8 = scalar_lea.hbm %s7735_s22, %s4404_s27  ;;  %s6156_s6 = scalar_lea.hbm %s7735_s22, 32 }
 0x327   : > { %s6151_s25 = scalar_lea.hbm %s1203_s8, 16  ;;  %p6157_p0 = scmp.lt.u32.totalorder %s1203_s8, %s7735_s22 }
 0x328   : > { %p6152_p13 = scmp.ne.s32.totalorder %s1203_s8, %s6151_s25  ;;  %p6158_p2 = scmp.lt.u32.totalorder %s6156_s6, %s6151_s25 }
 0x329   : > { %p6160_p3 = scmp.lt.u32.totalorder %s6151_s25, %s1203_s8 }
 0x32a   : > { %p6154_p1 = pnand %p6152_p13, %p7733_p6  ;;  %p6159_p7 = por %p6158_p2, %p6157_p0 }
 0x32c   : > { %p6155_p4 = pneg %p6154_p1  ;;  %p6161_p10 = por %p6160_p3, %p6159_p7 }
 0x32e   : > { %p6162_p11 = pnand %p6161_p10, %p6155_p4 }
 0x330   : > { %6165 = shalt.err (!%p6162_p11)
}
 0x331   : > { %s6166_s19 = scalar_lea.vmem %s1206_s13, 16  ;;  %s6465_s4 = smov [#allocation8]  }
 0x332   : > { %p6167_p8 = scmp.ne.s32.totalorder %s1206_s13, %s6166_s19  ;;  %s6171_s17 = sshll.u32 %s6465_s4, 4  ;;  %s6172_s17 = int_to_ptr.vmem [resolvable:$false] %s6171_s17 }
 0x333   : > { %s6173_s26 = scalar_lea.vmem %s6172_s17, 32  ;;  %p6174_p13 = scmp.lt.s32.totalorder %s1206_s13, %s6172_s17 }
 0x334   : > { %p6169_p12 = pnand %p6167_p8, %p7733_p6  ;;  %p6175_p1 = scmp.lt.s32.totalorder %s6173_s26, %s6166_s19 }
 0x336   : > { %p6170_p5 = pneg %p6169_p12  ;;  %p6176_p9 = por %p6175_p1, %p6174_p13 }
 0x338   : > { %p6177_p0 = pnand %p6176_p9, %p6170_p5 }
 0x33a   : > { %6180 = shalt.err (!%p6177_p0)
}
 0x33b   : > { %p7736_p2 = scmp.ne.s32.totalorder %s7714_s3, 0  ;;  %s7737_s21 = sld [smem:[#allocation76_spill]] }
 0x33c   : > { %s4405_s27 = sshll.u32 %s6881_s5, 1  ;;  %s4406_s25 = sshll.u32 %s6401_s2, 5 }
 0x33d   : > { %5125 = dma.hbm_to_vmem [thread:$0]  (!%p7736_p2), %s1203_s8, 16, %s1206_s13, %s6901_s14  }
 0x33e   : > { %s1216_s19 = scalar_lea.vmem [#allocation9], %s4405_s27  ;;  %s7738_s17 = sand.u32 1, %s6401_s2  }
 0x33f   : > { %s1223_s4 = sshll.u32 %s1216_s19, 4  ;;  %s1213_s26 = scalar_lea.sflag [#allocation10], %s7738_s17  ;;  %s1224_s4 = int_to_ptr.vmem [resolvable:$true] %s1223_s4 }
 0x341   : > { %s7121_s6 = scalar_lea.hbm %s7737_s21, %s4406_s25  ;;  %s6186_s12 = scalar_lea.hbm %s7737_s21, 64 }
 0x342   : > { %s6181_s9 = scalar_lea.hbm %s7121_s6, 32  ;;  %p6187_p3 = scmp.lt.u32.totalorder %s7121_s6, %s7737_s21 }
 0x343   : > { %p6182_p9 = scmp.ne.s32.totalorder %s7121_s6, %s6181_s9  ;;  %p6188_p10 = scmp.lt.u32.totalorder %s6186_s12, %s6181_s9 }
 0x344   : > { %p6190_p8 = scmp.lt.u32.totalorder %s6181_s9, %s7121_s6 }
 0x345   : > { %p6184_p4 = pnand %p6182_p9, %p7733_p6  ;;  %p6189_p11 = por %p6188_p10, %p6187_p3 }
 0x347   : > { %p6185_p7 = pneg %p6184_p4  ;;  %p6191_p12 = por %p6190_p8, %p6189_p11 }
 0x349   : > { %p6192_p5 = pnand %p6191_p12, %p6185_p7 }
 0x34b   : > { %6195 = shalt.err (!%p6192_p5)
}
 0x34c   : > { %s6196_s8 = scalar_lea.vmem %s1224_s4, 32  ;;  %s6466_s14 = smov [#allocation9]  }
 0x34d   : > { %p6197_p13 = scmp.ne.s32.totalorder %s1224_s4, %s6196_s8  ;;  %s6201_s5 = sshll.u32 %s6466_s14, 4  ;;  %s6202_s5 = int_to_ptr.vmem [resolvable:$false] %s6201_s5 }
 0x34e   : > { %s6203_s13 = scalar_lea.vmem %s6202_s5, 64  ;;  %p6204_p9 = scmp.lt.s32.totalorder %s1224_s4, %s6202_s5 }
 0x34f   : > { %p6199_p1 = pnand %p6197_p13, %p7733_p6  ;;  %p6205_p4 = scmp.lt.s32.totalorder %s6203_s13, %s6196_s8 }
 0x351   : > { %p6200_p0 = pneg %p6199_p1  ;;  %p6206_p2 = por %p6205_p4, %p6204_p9 }
 0x353   : > { %p6207_p3 = pnand %p6206_p2, %p6200_p0 }
 0x355   : > { %6210 = shalt.err (!%p6207_p3)
}
 0x356   : > { %p7739_p10 = scmp.ne.s32.totalorder %s7714_s3, 0  ;;  %p7740_p7 = scmp.ne.s32.totalorder %s7707_s15, 0 }
 0x357   : > { %s7141_s20 = sand.u32 (!%p7740_p7), 1, %s6393_s28   ;;  %p7741_p6 = scmp.ne.s32.totalorder (!%p7740_p7), %s7711_s23, 0 }
 0x358   : > { %5128 = dma.hbm_to_vmem [thread:$0]  (!%p7739_p10), %s7121_s6, 32, %s1224_s4, %s1213_s26  }
 0x359   : > { %1232 = sbr.rel (%p7740_p7) target bundleno = 6670 (0x1a0e), region = 140  ;;  %s7660_s9 = sshll.u32 (!%p7740_p7), %s7141_s20, 3 }
 0x35a   : > { %s1235_s12 = scalar_lea.sflag (!%p7740_p7), [#allocation4], %s7141_s20  ;;  %s7147_s27 = scalar_lea.vmem (!%p7740_p7), [#allocation3], %s7660_s9 }
 0x360   : > { %6312 = dma.done.wait (%p7741_p6), %s1235_s12, 128  }
 0x361   : > { %6314 = vsyncadd (%p7741_p6), %s1235_s12, 4294967168  ;;  %s7154_s3 = sand.u32 1, %s6671_s11   ;;  %s4409_s15 = sshll.u32 %s7141_s20, 4 }
 0x362   : > { %s1244_s25 = scalar_lea.sflag [#allocation7], %s7154_s3  ;;  %s7158_s6 = scalar_lea.vmem [#allocation6], %s4409_s15 }
 0x363   : > { %6316 = dma.done.wait (%p7741_p6), %s1244_s25, 272  }
 0x364   : > { %6318 = vsyncadd (%p7741_p6), %s1244_s25, 4294967024  ;;  %s4410_s19 = sshll.u32 %s7141_s20, 1  ;;  %s1255_s4 = scalar_lea.vmem [#allocation8], %s7141_s20 }
 0x365   : > { %s1261_s17 = scalar_lea.sflag [#allocation10], %s7154_s3  ;;  %s7167_s26 = scalar_lea.vmem [#allocation9], %s4410_s19 }
 0x366   : > { %6320 = dma.done.wait (%p7741_p6), %s1261_s17, 32  }
 0x367   : > { %6322 = vsyncadd (%p7741_p6), %s1261_s17, 4294967264  ;;  %p7742_p2 = scmp.eq.s32.totalorder %s6671_s11, 0 }
 0x369   : > { %6324 = dma.done.wait (%p7742_p2), [#allocation10], 512   ;;  %p7743_p11 = pmov %p7742_p2 }
 0x36a   : > { %p7744_p8 = pmov %p7742_p2 }
 0x36b   : > { %6326 = vsyncadd (%p7743_p11), [#allocation10], 4294966784 }
 0x36c   : > { %6328 = dma.done.wait (%p7744_p8), [#allocation13], 528   ;;  %p7745_p12 = pmov %p7742_p2 }
 0x36d   : > { %p7746_p5 = pmov %p7742_p2 }
 0x36e   : > { %6330 = vsyncadd (%p7745_p12), [#allocation13], 4294966768 }
 0x36f   : > { %6332 = dma.done.wait (%p7746_p5), [#allocation16], 528   ;;  %p7747_p13 = pmov %p7742_p2 }
 0x370   : > { %p7748_p1 = pmov %p7742_p2 }
 0x371   : > { %6334 = vsyncadd (%p7747_p13), [#allocation16], 4294966768 }
 0x372   : > { %6336 = dma.done.wait (%p7748_p1), [#allocation19], 528   ;;  %p7749_p0 = pmov %p7748_p1 }
 0x374   : > { %6338 = vsyncadd (%p7749_p0), [#allocation19], 4294966768  ;;  %p7750_p9 = pmov %p7749_p0 }
 0x375   : > { %p7751_p4 = pmov %p7749_p0 }
 0x376   : > { %6340 = dma.done.wait (%p7750_p9), [#allocation22], 32  }
 0x377   : > { %6342 = vsyncadd (%p7751_p4), [#allocation22], 4294967264  ;;  %p7752_p3 = pmov %p7749_p0 }
 0x378   : > { %p7753_p10 = pmov %p7749_p0 }
 0x379   : > { %6344 = dma.done.wait (%p7752_p3), [#allocation25], 528  }
 0x37a   : > { %6346 = vsyncadd (%p7753_p10), [#allocation25], 4294966768  ;;  %p7754_p7 = pmov %p7749_p0 }
 0x37b   : > { %p7755_p6 = pmov %p7749_p0 }
 0x37c   : > { %6348 = dma.done.wait (%p7754_p7), [#allocation28], 528  }
 0x37d   : > { %6350 = vsyncadd (%p7755_p6), [#allocation28], 4294966768  ;;  %p7756_p2 = pmov %p7749_p0 }
 0x37e   : > { %p7757_p11 = pmov %p7749_p0 }
 0x37f   : > { %6352 = dma.done.wait (%p7756_p2), [#allocation31], 528  }
 0x380   : > { %6354 = vsyncadd (%p7757_p11), [#allocation31], 4294966768  ;;  %p7758_p8 = pmov %p7749_p0 }
 0x381   : > { %p7759_p12 = pmov %p7749_p0 }
 0x382   : > { %6356 = dma.done.wait (%p7758_p8), [#allocation34], 528  }
 0x383   : > { %6358 = vsyncadd (%p7759_p12), [#allocation34], 4294966768  ;;  %p7760_p5 = pmov %p7749_p0 }
 0x384   : > { %p7761_p13 = pmov %p7749_p0 }
 0x385   : > { %6360 = dma.done.wait (%p7760_p5), [#allocation37], 32  }
 0x386   : > { %6362 = vsyncadd (%p7761_p13), [#allocation37], 4294967264  ;;  %p7762_p1 = pmov %p7749_p0 }
 0x388   : > { %6364 = dma.done.wait (%p7762_p1), [#allocation40], 528  }
 0x389   : > { %6366 = vsyncadd (%p7749_p0), [#allocation40], 4294966768  ;;  %p7763_p9 = pmov %p7749_p0 }
 0x38a   : > { %p7764_p4 = pmov %p7749_p0 }
 0x38b   : > { %6368 = dma.done.wait (%p7763_p9), [#allocation43], 1040  }
 0x38c   : > { %6370 = vsyncadd (%p7764_p4), [#allocation43], 4294966256  ;;  %p7765_p3 = pmov %p7749_p0 }
 0x38d   : > { %p7766_p10 = pmov %p7749_p0 }
 0x38e   : > { %6372 = dma.done.wait (%p7765_p3), [#allocation46], 32  }
 0x38f   : > { %6374 = vsyncadd (%p7766_p10), [#allocation46], 4294967264  ;;  %p7767_p7 = pmov %p7749_p0 }
 0x390   : > { %p7768_p6 = pmov %p7749_p0 }
 0x391   : > { %6376 = dma.done.wait (%p7767_p7), [#allocation49], 16  }
 0x392   : > { %6378 = vsyncadd (%p7768_p6), [#allocation49], 4294967280  ;;  %v6467_v0 = vmov 0.0|0.0   ;;  %vm6468_vm0 = vmmov 0   ;;  %v6469_v1 = vmov 0.0   ;;  %v1486_v2 = vld [vmem:[#allocation11] sm:$0xff] }
 0x393   : > { %4821 = vmatprep.subr.bf16.mxu1 %v6467_v0  ;;  %4615 = vmatprep.mubr.msk.f32.mxu1 %vm6468_vm0, %v6469_v1  ;;  %v1487_v3 = vld [vmem:[#allocation11 + $0x8] sm:$0xff]  ;;  %v1488_v4 = vld [vmem:[#allocation11 + $0x10] sm:$0xff]  ;;  %v1489_v6 = vld [vmem:[#allocation11 + $0x18] sm:$0xff]  ;;  %vm1497_vm1 = vcmask 261120   ;;  %vm1733_vm2 = vcmask 64512   ;;  %s6470_s23 = smov 112  }
 0x394   : > { %4833 = vmatprep.subr.bf16.mxu0 %v6467_v0  ;;  %4637 = vmatprep.mubr.msk.f32.mxu0 %vm6468_vm0, %v6469_v1  ;;  %v4822_v5 = vpack.c.bf16 %v1487_v3, %v1486_v2  ;;  %v4825_v7 = vpack.c.bf16 %v1489_v6, %v1488_v4  ;;  %v1571_v8 = vld [vmem:[#allocation14] sm:$0xff]  ;;  %v1572_v9 = vld [vmem:[#allocation14 + $0x8] sm:$0xff]  ;;  %v1573_v12 = vld [vmem:[#allocation14 + $0x10] sm:$0xff]  ;;  %s6471_s8 = smov 120   ;;  %s6472_s14 = smov 104   ;;  %vm2071_vm3 = vcmask 130112  }
 0x395   : > { %v7237_v10 = vld [vmem:[%s7147_s27] sm:$0xff]  ;;  %v4828_v11 = vpack.c.bf16 %v1572_v9, %v1571_v8  ;;  %v1574_v13 = vld [vmem:[#allocation14 + $0x18] sm:$0xff]  ;;  %v4444_v23 = vld [vmem:[#allocation15] ss:$0 sm:$0xff]  ;;  %s4438_s5 = sshll.u32 %s7141_s20, 5  ;;  %s6473_s12 = smov 8  }
 0x396   : > { %4823 = vmatpush3.bf16.msra.mxu1 %v4822_v5  ;;  %v4831_v14 = vpack.c.bf16 %v1574_v13, %v1573_v12  ;;  %v1652_v15 = vld [vmem:[#allocation17] sm:$0xff]  ;;  %v1653_v16 = vld [vmem:[#allocation17 + $0x8] sm:$0xff]  ;;  %v1654_v17 = vld [vmem:[#allocation17 + $0x10] sm:$0xff]  ;;  %s7304_s13 = scalar_lea.vmem [#allocation51], %s4438_s5  ;;  %s6474_s27 = smov 16   ;;  %vm2245_vm4 = vcmask 195712  }
 0x397   : > { %4824 = vmatprep.subr.bf16.mxu1 %v6467_v0  ;;  %v4834_v18 = vpack.c.bf16 %v1653_v16, %v1652_v15  ;;  %v1655_v19 = vld [vmem:[#allocation17 + $0x18] sm:$0xff]  ;;  %v4446_v29 = vld [vmem:[#allocation18] ss:$0 sm:$0xff]  ;;  %s6475_s15 = smov 24   ;;  %vm2419_vm5 = vcmask 261312   ;;  %vm7356_vm6 = vmpackc.low %vm1733_vm2, %vm1733_vm2  ;;  %vm2886_vm7 = vcmask 130048  }
 0x398   : > { %v4837_v20 = vpack.c.bf16 %v1655_v19, %v1654_v17  ;;  %v4442_v27 = vld [vmem:[#allocation12] ss:$0 sm:$0xff]  ;;  %v1476_v39 = vld [vmem:[%s7167_s26] sm:$0x3]  ;;  %s7391_s25 = scalar_lea.vmem [#allocation53], %s4438_s5  ;;  %vm3736_vm8 = vcmask 523264  }
 0x399   : > { %4835 = vmatpush3.bf16.msra.mxu0 %v4834_v18  ;;  %v1477_v40 = vunpack.c.0.s8 %v1476_v39  ;;  %s3894_s19 = sshll.u32 %s7391_s25, 4  ;;  %s3878_s26 = sshll.u32 %s7304_s13, 4  ;;  %s7494_s26 = int_to_ptr.vmem [resolvable:$true] %s3878_s26  ;;  %s7521_s19 = int_to_ptr.vmem [resolvable:$true] %s3894_s19 }
 0x39a   : > { %4826 = vmatpush3.bf16.msra.mxu1 %v4825_v7  ;;  %4836 = vmatprep.subr.bf16.mxu0 %v6467_v0  ;;  %p7772_p11 = scmp.ne.s32.totalorder %s7712_s18, 0 }
 0x39b   : > { %4827 = vmatprep.subr.bf16.mxu1 %v6467_v0  ;;  %v1478_v41 = vcvt.s32.f32 %v1477_v40 }
 0x39d   : > { %4616 = vmatmul.mubr.msk.f32.vlgmr.msra.gmra.mrb[0].mxu1 %vm1497_vm1, %v7237_v10  ;;  %4838 = vmatpush3.bf16.msra.mxu0 %v4837_v20  ;;  %v4440_v42 = vadd.f32 -1.0, %v1478_v41 }
 0x39e   : > { %4829 = vmatpush3.bf16.msra.mxu1 %v4828_v11  ;;  %4626 = vmatprep.mubr.msk.f32.mxu1 %vm6468_vm0, %v6469_v1 }
 0x39f   : > { %4830 = vmatprep.subr.bf16.mxu1 %v6467_v0  ;;  %4650 = vmatprep.subr.mxu0 %v6469_v1  ;;  %v1480_v43 = vmul.f32 1e+10, %v4440_v42 }
 0x3a0   : > { %4638 = vmatmul.mubr.msk.f32.vlgmr.msra.gmra.mrb[0].mxu0 %vm1497_vm1, %v7237_v10 }
 0x3a1   : > { %4652 = vmatprep.mubr.msk.f32.mxu0 %vm6468_vm0, %v6469_v1 }
 0x3a2   : > { %4832 = vmatpush3.bf16.msra.mxu1 %v4831_v14 }
 0x3a3   : > { %4640 = vmatprep.subr.mxu1 %v6469_v1 }
 0x3a5   : > { %4627 = vmatmul.mubr.msk.f32.vlgmr.msra.gmra.mrb[2].mxu1 %vm1497_vm1, %v7237_v10 }
 0x3a6   : > { %4642 = vmatprep.mubr.msk.f32.mxu1 %vm6468_vm0, %v6469_v1 }
 0x470   : > { %v1567_v21 = vpop.f32.mrb[0].mxu1 }
 0x471   : > { %v4617_v22 = vpop.f32.mrb[1].mxu1  ;;  %v1568_v28 = vadd.f32 %v4442_v27, %v1567_v21 }
 0x473   : > { %v1729_v30 = vpop.f32.mrb[0].mxu0 }
 0x474   : > { %v7267_v31 = vadd.f32 %v4446_v29, %v1729_v30  ;;  %v4639_v32 = vpop.f32.mrb[1].mxu0 }
 0x478   : > { %v1648_v24 = vpop.f32.mrb[2].mxu1 }
 0x479   : > { %v1649_v25 = vadd.f32 %v4444_v23, %v1648_v24  ;;  %v4628_v26 = vpop.f32.mrb[3].mxu1 }
 0x47b   : > { %2075 = vrot.lane.b32.xlu1 %v1649_v25, %s6470_s23  ;;  %1900 = vrot.lane.b32.xlu0 %v1649_v25, %s6471_s8 }
 0x47c   : > { %4641 = vmatpush3.xpose.msk.msra.mxu1 %vm1733_vm2, %v1649_v25 }
 0x47d   : > { %4645 = vmatprep.subr.mxu1 %v6469_v1 }
 0x47f   : > { %4643 = vmatmul.mubr.msk.f32.vlgmr.msra.gmra.mrb[4].mxu1 %vm1733_vm2, %v1568_v28  ;;  %2073 = vrot.lane.b32.xlu1 %v1568_v28, %s6470_s23 }
 0x480   : > { %1898 = vrot.lane.b32.xlu0 %v1568_v28, %s6471_s8  ;;  %4647 = vmatprep.mubr.msk.f32.mxu1 %vm6468_vm0, %v6469_v1 }
 0x481   : > { %4646 = vmatpush3.msra.mxu1 %v7267_v31 }
 0x482   : > { %4655 = vmatprep.subr.mxu1 %v6469_v1 }
 0x483   : > { %2247 = vrot.lane.b32.xlu1 %v1568_v28, %s6472_s14 }
 0x484   : > { %2249 = vrot.lane.b32.xlu0 %v1649_v25, %s6472_s14 }
 0x4ed   : > { %v1901_v33 = vpop.permute.xlu0 %1900  ;;  %v2076_v34 = vpop.permute.xlu1 %2075 }
 0x4ee   : > { %4651 = vmatpush3.xpose.msk.msra.mxu0 %vm1733_vm2, %v1901_v33 }
 0x4ef   : > { %4660 = vmatprep.subr.mxu0 %v6469_v1 }
 0x4f1   : > { %v2074_v36 = vpop.permute.xlu1 %2073 }
 0x4f2   : > { %v1899_v35 = vpop.permute.xlu0 %1898 }
 0x4f3   : > { %4653 = vmatmul.mubr.msk.f32.vlgmr.msra.gmra.mrb[2].mxu0 %vm1733_vm2, %v1899_v35 }
 0x4f4   : > { %4661 = vmatpush3.xpose.msk.msra.mxu0 %vm1733_vm2, %v2076_v34  ;;  %4662 = vmatprep.mubr.msk.f32.mxu0 %vm6468_vm0, %v6469_v1 }
 0x4f5   : > { %4670 = vmatprep.subr.mxu0 %v6469_v1  ;;  %v2248_v38 = vpop.permute.xlu1 %2247 }
 0x4f6   : > { %v2250_v37 = vpop.permute.xlu0 %2249 }
 0x4f7   : > { %4663 = vmatmul.mubr.msk.f32.vlgmr.msra.gmra.mrb[4].mxu0 %vm1733_vm2, %v2074_v36 }
 0x4f8   : > { %4671 = vmatpush3.xpose.msk.msra.mxu0 %vm1733_vm2, %v2250_v37  ;;  %4672 = vmatprep.mubr.msk.f32.mxu0 %vm6468_vm0, %v6469_v1 }
 0x4f9   : > { %4839 = vmatprep.subr.bf16.mxu0 %v6467_v0 }
 0x4fb   : > { %4673 = vmatmul.mubr.msk.f32.vlgmr.msra.gmra.mrb[6].mxu0 %vm1733_vm2, %v2248_v38 }
 0x4fc   : > { %4688 = vmatprep.mubr.msk.f32.mxu0 %vm6468_vm0, %v6469_v1 }
 0x552   : > { %v1806_v44 = vpop.f32.mrb[4].mxu1 }
 0x553   : > { %v1807_v45 = vadd.f32 %v1806_v44, %v1480_v43  ;;  %v4644_v46 = vpop.f32.mrb[5].mxu1 }
 0x555   : > { %v1810_v47 = vsel %vm1733_vm2, %v1807_v45, -inf }
 0x556   : > { %1811 = vmax.xlane.f32.xlu0 %v1810_v47 }
 0x5c6   : > { %v1972_v48 = vpop.f32.mrb[2].mxu0 }
 0x5c7   : > { %v1973_v49 = vadd.f32 %v1972_v48, %v1480_v43  ;;  %v4654_v50 = vpop.f32.mrb[3].mxu0  ;;  %v2426_v48 = vld [vmem:[#allocation20] sm:$0xff] }
 0x5c9   : > { %v1976_v51 = vsel %vm1733_vm2, %v1973_v49, -inf }
 0x5ca   : > { %1977 = vmax.xlane.f32.xlu1 %v1976_v51  ;;  %v2147_v52 = vpop.f32.mrb[4].mxu0  ;;  %v2428_v51 = vld [vmem:[#allocation20 + $0x10] sm:$0xff] }
 0x5cb   : > { %v2148_v53 = vadd.f32 %v2147_v52, %v1480_v43  ;;  %v4664_v54 = vpop.f32.mrb[5].mxu0  ;;  %v2429_v52 = vld [vmem:[#allocation20 + $0x18] sm:$0xff] }
 0x5cd   : > { %v2151_v55 = vsel %vm1733_vm2, %v2148_v53, -inf }
 0x5ce   : > { %v2321_v56 = vpop.f32.mrb[6].mxu0  ;;  %2152 = vmax.xlane.f32.xlu0 %v2151_v55 }
 0x5cf   : > { %v2322_v57 = vadd.f32 %v2321_v56, %v1480_v43  ;;  %v4674_v58 = vpop.f32.mrb[7].mxu0 }
 0x5d1   : > { %v2325_v59 = vsel %vm1733_vm2, %v2322_v57, -inf }
 0x5d2   : > { %2326 = vmax.xlane.f32.xlu0 %v2325_v59 }
 0x5e3   : > { %v1812_v60 = vpop.xlane.xlu0 %1811 }
 0x5e4   : > { %v1813_v61 = vsub.f32 %v1807_v45, %v1812_v60 }
 0x5e6   : > { %v1814_v62 = vmul.f32 1.442695, %v1813_v61 }
 0x5e8   : > { %5325 = vpow2.f32 %v1814_v62 }
 0x5f2   : > { %v5326_v63 = vpop.eup %5325 }
 0x5f3   : > { %v1816_v2 = vsel %vm1733_vm2, %v5326_v63, 0.0 }
 0x5f4   : > { %1817 = vadd.xlane.f32.xlu1 %v1816_v2  ;;  %v4460_v2 = vld [vmem:[#allocation21] ss:$0 sm:$0xff] }
 0x605   : > { %1991 = vrot.lane.b32.xlu1 %v7267_v31, %s6471_s8 }
 0x657   : > { %v1978_v3 = vpop.xlane.xlu1 %1977 }
 0x658   : > { %v1979_v4 = vsub.f32 %v1973_v49, %v1978_v3  ;;  %v2427_v49 = vld [vmem:[#allocation20 + $0x8] sm:$0xff] }
 0x659   : > { %v4840_v50 = vpack.c.bf16 %v2427_v49, %v2426_v48  ;;  %v2717_v48 = vld [vmem:[#allocation32] sm:$0xff]  ;;  %v2718_v49 = vld [vmem:[#allocation32 + $0x8] sm:$0xff] }
 0x65a   : > { %v1980_v5 = vmul.f32 1.442695, %v1979_v4 }
 0x65b   : > { %v2153_v6 = vpop.xlane.xlu0 %2152  ;;  %4841 = vmatpush3.bf16.msra.mxu0 %v4840_v50  ;;  %v2719_v50 = vld [vmem:[#allocation32 + $0x10] sm:$0xff] }
 0x65c   : > { %5327 = vpow2.f32 %v1980_v5  ;;  %v2154_v7 = vsub.f32 %v2148_v53, %v2153_v6  ;;  %v4843_v53 = vpack.c.bf16 %v2429_v52, %v2428_v51  ;;  %4842 = vmatprep.subr.bf16.mxu0 %v6467_v0  ;;  %v4859_v51 = vpack.c.bf16 %v2718_v49, %v2717_v48  ;;  %v2720_v52 = vld [vmem:[#allocation32 + $0x18] sm:$0xff] }
 0x65e   : > { %v2155_v8 = vmul.f32 1.442695, %v2154_v7 }
 0x65f   : > { %v2327_v9 = vpop.xlane.xlu0 %2326  ;;  %4844 = vmatpush3.bf16.msra.mxu0 %v4843_v53  ;;  %v4863_v53 = vpack.c.bf16 %v2720_v52, %v2719_v50 }
 0x660   : > { %5329 = vpow2.f32 %v2155_v8  ;;  %v2328_v11 = vsub.f32 %v2322_v57, %v2327_v9 }
 0x662   : > { %v2329_v12 = vmul.f32 1.442695, %v2328_v11 }
 0x664   : > { %5331 = vpow2.f32 %v2329_v12 }
 0x666   : > { %v5328_v13 = vpop.eup %5327 }
 0x667   : > { %v1982_v14 = vsel %vm1733_vm2, %v5328_v13, 0.0 }
 0x668   : > { %1983 = vadd.xlane.f32.xlu0 %v1982_v14  ;;  %v2625_v14 = vld [vmem:[#allocation29] sm:$0xff] }
 0x66a   : > { %v5330_v15 = vpop.eup %5329 }
 0x66b   : > { %v2157_v16 = vsel %vm1733_vm2, %v5330_v15, 0.0 }
 0x66c   : > { %2158 = vadd.xlane.f32.xlu1 %v2157_v16 }
 0x66e   : > { %v5332_v17 = vpop.eup %5331 }
 0x66f   : > { %v2331_v18 = vsel %vm1733_vm2, %v5332_v17, 0.0 }
 0x670   : > { %2332 = vadd.xlane.f32.xlu0 %v2331_v18  ;;  %v2628_v18 = vld [vmem:[#allocation29 + $0x18] sm:$0xff] }
 0x67d   : > { %2339 = vrot.lane.b32.xlu1 %v7267_v31, %s6472_s14 }
 0x681   : > { %v1818_v19 = vpop.xlane.xlu1 %1817 }
 0x682   : > { %5333 = vrcp.f32 %v1818_v19 }
 0x685   : > { %v1992_v25 = vpop.permute.xlu1 %1991 }
 0x686   : > { %2165 = vrot.lane.b32.xlu0 %v7267_v31, %s6470_s23 }
 0x68c   : > { %v5334_v20 = vpop.eup %5333 }
 0x68d   : > { %v1820_v21 = vmul.f32 %v5334_v20, %v1818_v19  ;;  %v1474_v19 = vld [vmem:[%s7158_s6] sm:$0xff] }
 0x68f   : > { %v1821_v22 = vsub.f32 2.0, %v1820_v21  ;;  %v2541_v21 = vld [vmem:[#allocation26] sm:$0xff] }
 0x691   : > { %v1822_v23 = vmul.f32 %v5334_v20, %v1821_v22  ;;  %v1475_v20 = vld [vmem:[%s7158_s6 + $0x8] sm:$0xff]  ;;  %s7771_s6 = sld [smem:[#allocation103_spill]] }
 0x692   : > { %v2542_v22 = vld [vmem:[#allocation26 + $0x8] sm:$0xff] }
 0x693   : > { %v1823_v24 = vmul.f32 %v5326_v63, %v1822_v23  ;;  %v4846_v23 = vpack.c.bf16 %v2542_v22, %v2541_v21 }
 0x695   : > { %2421 = vst.msk [vmem:[%s7304_s13] sm:$0xff] %vm1733_vm2, %v1823_v24  ;;  %4648 = vmatmul.mubr.msk.f32.vlgmr.msra.gmra.mrb[6].mxu1 %vm1733_vm2, %v1823_v24  ;;  %v2543_v24 = vld [vmem:[#allocation26 + $0x10] sm:$0xff] }
 0x696   : > { %4656 = vmatpush3.msra.mxu1 %v1992_v25  ;;  %4657 = vmatprep.mubr.msk.f32.mxu1 %vm6468_vm0, %v6469_v1  ;;  %v2544_v25 = vld [vmem:[#allocation26 + $0x18] sm:$0xff] }
 0x697   : > { %4665 = vmatprep.subr.mxu1 %v6469_v1 }
 0x6f5   : > { %v1984_v26 = vpop.xlane.xlu0 %1983 }
 0x6f6   : > { %5335 = vrcp.f32 %v1984_v26 }
 0x6f9   : > { %v2159_v27 = vpop.xlane.xlu1 %2158 }
 0x6fa   : > { %5337 = vrcp.f32 %v2159_v27 }
 0x6fd   : > { %v2333_v28 = vpop.xlane.xlu0 %2332  ;;  %v2340_v43 = vpop.permute.xlu1 %2339 }
 0x6fe   : > { %5339 = vrcp.f32 %v2333_v28 }
 0x700   : > { %v5336_v29 = vpop.eup %5335 }
 0x701   : > { %v1986_v30 = vmul.f32 %v5336_v29, %v1984_v26  ;;  %v2166_v40 = vpop.permute.xlu0 %2165  ;;  %v4849_v26 = vpack.c.bf16 %v2544_v25, %v2543_v24 }
 0x703   : > { %v1987_v31 = vsub.f32 2.0, %v1986_v30 }
 0x704   : > { %v5338_v32 = vpop.eup %5337 }
 0x705   : > { %v1988_v33 = vmul.f32 %v5336_v29, %v1987_v31  ;;  %v2161_v34 = vmul.f32 %v5338_v32, %v2159_v27  ;;  %v4462_v31 = vld [vmem:[#allocation23] ss:$0 sm:$0xff] }
 0x707   : > { %v1989_v35 = vmul.f32 %v5328_v13, %v1988_v33  ;;  %v2162_v36 = vsub.f32 2.0, %v2161_v34  ;;  %v4463_v33 = vld [vmem:[#allocation24] ss:$0 sm:$0xff] }
 0x708   : > { %v5340_v37 = vpop.eup %5339 }
 0x709   : > { %2422 = vst.msk [vmem:[%s7304_s13 + $0x8] sm:$0xff] %vm1733_vm2, %v1989_v35  ;;  %v2163_v38 = vmul.f32 %v5338_v32, %v2162_v36  ;;  %v2335_v39 = vmul.f32 %v5340_v37, %v2333_v28  ;;  %4658 = vmatmul.mubr.msk.f32.vlgmr.msra.gmra.mrb[8].mxu1 %vm1733_vm2, %v1989_v35  ;;  %v4466_v36 = vld [vmem:[#allocation30] ss:$0 sm:$0xff] }
 0x70a   : > { %4666 = vmatpush3.msra.mxu1 %v2166_v40  ;;  %4667 = vmatprep.mubr.msk.f32.mxu1 %vm6468_vm0, %v6469_v1 }
 0x70b   : > { %v2164_v41 = vmul.f32 %v5330_v15, %v2163_v38  ;;  %v2336_v42 = vsub.f32 2.0, %v2335_v39  ;;  %4675 = vmatprep.subr.mxu1 %v6469_v1  ;;  %v2626_v15 = vld [vmem:[#allocation29 + $0x8] sm:$0xff] }
 0x70c   : > { %v4851_v16 = vpack.c.bf16 %v2626_v15, %v2625_v14 }
 0x70d   : > { %2423 = vst.msk [vmem:[%s7304_s13 + $0x10] sm:$0xff] %vm1733_vm2, %v2164_v41  ;;  %v2337_v44 = vmul.f32 %v5340_v37, %v2336_v42  ;;  %4668 = vmatmul.mubr.msk.f32.vlgmr.msra.gmra.mrb[10].mxu1 %vm1733_vm2, %v2164_v41 }
 0x70e   : > { %4676 = vmatpush3.msra.mxu1 %v2340_v43  ;;  %4677 = vmatprep.mubr.msk.f32.mxu1 %vm6468_vm0, %v6469_v1 }
 0x70f   : > { %v2338_v45 = vmul.f32 %v5332_v17, %v2337_v44  ;;  %4845 = vmatprep.subr.bf16.mxu1 %v6467_v0  ;;  %4852 = vmatprep.subr.bf16.mxu0 %v4851_v16  ;;  %v2627_v17 = vld [vmem:[#allocation29 + $0x10] sm:$0xff]  ;;  %v4464_v44 = vld [vmem:[#allocation27] ss:$0 sm:$0xff] }
 0x711   : > { %2424 = vst.msk [vmem:[%s7304_s13 + $0x18] sm:$0xff] %vm1733_vm2, %v2338_v45  ;;  %4678 = vmatmul.mubr.msk.f32.vlgmr.msra.gmra.mrb[12].mxu1 %vm1733_vm2, %v2338_v45 }
 0x712   : > { %4699 = vmatprep.mubr.msk.f32.mxu1 %vm6468_vm0, %v6469_v1  ;;  %4847 = vmatpush3.bf16.msra.mxu1 %v4846_v23 }
 0x713   : > { %4848 = vmatprep.subr.bf16.mxu1 %v6467_v0 }
 0x716   : > { %4850 = vmatpush3.bf16.msra.mxu1 %v4849_v26 }
 0x717   : > { %4860 = vmatprep.subr.bf16.mxu1 %v4859_v51 }
 0x768   : > { %v1893_v46 = vpop.f32.mrb[6].mxu1 }
 0x769   : > { %1897 = vst.msk [vmem:[#allocation2] sm:$0xff] %vm1733_vm2, %v1893_v46  ;;  %v4649_v47 = vpop.f32.mrb[7].mxu1 }
 0x7dc   : > { %v2063_v54 = vpop.f32.mrb[8].mxu1 }
 0x7dd   : > { %2068 = vrot.lane.b32.xlu1 %v2063_v54, %s6473_s12  ;;  %v4659_v55 = vpop.f32.mrb[9].mxu1  ;;  %v1481_v54 = vld [vmem:[%s1255_s4] sm:$0x1]  ;;  %s4509_s4 = sshll.u32 %s6671_s11, 9 }
 0x7de   : > { %v1482_v55 = vunpack.c.0.s8 %v1481_v54  ;;  %s7491_s17 = scalar_lea.hbm %s7771_s6, %s4509_s4 }
 0x7e0   : > { %v2237_v56 = vpop.f32.mrb[10].mxu1 }
 0x7e1   : > { %2242 = vrot.lane.b32.xlu0 %v2237_v56, %s6474_s27  ;;  %v4669_v57 = vpop.f32.mrb[11].mxu1  ;;  %v1483_v56 = vcvt.s32.f32 %v1482_v55 }
 0x7e2   : > { %v2803_v57 = vlaneseq }
 0x7e4   : > { %v2411_v58 = vpop.f32.mrb[12].mxu1 }
 0x7e5   : > { %2416 = vrot.lane.b32.xlu1 %v2411_v58, %s6475_s15  ;;  %v4679_v59 = vpop.f32.mrb[13].mxu1  ;;  %v4441_v58 = vadd.f32 -1.0, %v1483_v56 }
 0x7e6   : > { %v2804_v59 = vshrl.u32 %v2803_v57, 7 }
 0x84f   : > { %v2069_v60 = vpop.permute.xlu1 %2068 }
 0x850   : > { %2072 = vst.msk [vmem:[#allocation2] sm:$0xff] %vm2071_vm3, %v2069_v60  ;;  %v1485_v60 = vmul.f32 1e+10, %v4441_v58 }
 0x853   : > { %v2243_v61 = vpop.permute.xlu0 %2242 }
 0x854   : > { %2246 = vst.msk [vmem:[#allocation2] sm:$0xff] %vm2245_vm4, %v2243_v61  ;;  %v2805_v61 = vsub.s32 0, %v2804_v59 }
 0x857   : > { %v2417_v62 = vpop.permute.xlu1 %2416 }
 0x858   : > { %2420 = vst.msk [vmem:[#allocation2] sm:$0xff] %vm2419_vm5, %v2417_v62  ;;  %v7379_v62 = vrot.slane %v1485_v60, %v2805_v61 }
 0x85f   : > { %v2425_v63 = vld [vmem:[#allocation2] sm:$0xff] }
 0x860   : > { %4689 = vmatmul.mubr.msk.f32.vlgmr.msra.gmra.mrb[8].mxu0 %vm1497_vm1, %v2425_v63 }
 0x861   : > { %4854 = vmatpush3.bf16.msra.mxu0 %v4851_v16  ;;  %4710 = vmatprep.mubr.msk.f32.mxu0 %vm1497_vm1, %v1474_v19 }
 0x933   : > { %v2506_v3 = vpop.f32.mrb[8].mxu0 }
 0x934   : > { %v2507_v4 = vadd.f32 %v4460_v2, %v2506_v3  ;;  %v4690_v5 = vpop.f32.mrb[9].mxu0 }
 0x936   : > { %v2512_v6 = vadd.f32 %v2507_v4, %v7237_v10  ;;  %v4855_v10 = vpack.c.bf16 %v2628_v18, %v2627_v17 }
 0x938   : > { %v2513_v7 = vsel %vm1497_vm1, %v2512_v6, 0.0  ;;  %4856 = vmatprep.subr.bf16.mxu0 %v4855_v10 }
 0x939   : > { %2514 = vadd.xlane.f32.xlu0 %v2513_v7  ;;  %4858 = vmatpush3.bf16.msra.mxu0 %v4855_v10 }
 0x93a   : > { %4867 = vmatprep.subr.bf16.mxu0 %v6467_v0 }
 0x93c   : > { %4711 = vmatmul.mubr.msk.f32.vlgmr.msra.gmra.mrb[10].mxu0 %vm1497_vm1, %v1475_v20 }
 0x93d   : > { %4728 = vmatprep.mubr.msk.f32.mxu0 %vm6468_vm0, %v6469_v1 }
 0x9c6   : > { %v2515_v8 = vpop.xlane.xlu0 %2514 }
 0x9c7   : > { %v2517_v9 = vmul.f32 0.03125, %v2515_v8 }
 0x9c9   : > { %v2518_v11 = vsub.f32 %v2512_v6, %v2517_v9 }
 0x9cb   : > { %v2519_v12 = vmul.f32 %v2518_v11, %v2518_v11 }
 0x9cd   : > { %v2520_v13 = vsel %vm1497_vm1, %v2519_v12, 0.0  ;;  %v4469_v12 = vld [vmem:[#allocation33] ss:$0 sm:$0xff] }
 0x9ce   : > { %2521 = vadd.xlane.f32.xlu1 %v2520_v13 }
 0xa0f   : > { %v4712_v37 = vpop.f32.mrb[10].mxu0 }
 0xa10   : > { %v2714_v38 = vadd.f32 %v4712_v37, %v4466_v36  ;;  %v2708_v39 = vpop.f32.mrb[11].mxu0 }
 0xa11   : > { %v2709_v40 = vadd.f32 %v4466_v36, %v2708_v39 }
 0xa13   : > { %v4868_v42 = vpack.c.bf16 %v2714_v38, %v2709_v40  ;;  %v7360_v43 = vpack.i.bf16 %v2714_v38, %v2709_v40 }
 0xa15   : > { %5296 = vrot.lane.b32.xlu1 %v7360_v43, %s6471_s8  ;;  %4870 = vmatpush3.bf16.xpose.msk.msra.mxu0 %vm7356_vm6, %v4868_v42 }
 0xa16   : > { %4878 = vmatprep.subr.bf16.mxu0 %v6467_v0 }
 0xa5b   : > { %v2522_v27 = vpop.xlane.xlu1 %2521 }
 0xa5c   : > { %v2523_v28 = vmul.f32 0.03125, %v2522_v27 }
 0xa5e   : > { %v2524_v29 = vadd.f32 1e-05, %v2523_v28 }
 0xa60   : > { %5341 = vrsqrt.f32 %v2524_v29 }
 0xa6a   : > { %v5342_v30 = vpop.eup %5341 }
 0xa6b   : > { %v2526_v32 = vmul.f32 %v5342_v30, %v2518_v11 }
 0xa6d   : > { %v2533_v34 = vmul.f32 %v4462_v31, %v2526_v32 }
 0xa6f   : > { %v7349_v35 = vadd.f32 %v4463_v33, %v2533_v34 }
 0xa71   : > { %4700 = vmatmul.mubr.msk.f32.vlgmr.msra.gmra.mrb[14].mxu1 %vm1497_vm1, %v7349_v35 }
 0xa72   : > { %4721 = vmatprep.mubr.msk.f32.mxu1 %vm1497_vm1, %v1474_v19  ;;  %4862 = vmatpush3.bf16.msra.mxu1 %v4859_v51 }
 0xa73   : > { %4864 = vmatprep.subr.bf16.mxu1 %v4863_v53 }
 0xa76   : > { %4866 = vmatpush3.bf16.msra.mxu1 %v4863_v53 }
 0xa77   : > { %4871 = vmatprep.subr.bf16.mxu1 %v6467_v0 }
 0xa79   : > { %4722 = vmatmul.mubr.msk.f32.vlgmr.msra.gmra.mrb[16].mxu1 %vm1497_vm1, %v1475_v20 }
 0xa7a   : > { %4735 = vmatprep.mubr.msk.f32.mxu1 %vm6468_vm0, %v6469_v1 }
 0xa87   : > { %v5297_v19 = vpop.permute.xlu1 %5296 }
 0xa88   : > { %v5299_v22 = vunpack.i.h.bf16 %v5297_v19  ;;  %v5298_v23 = vunpack.i.l.bf16 %v5297_v19 }
 0xa8a   : > { %v4875_v26 = vpack.c.bf16 %v5299_v22, %v5298_v23 }
 0xb44   : > { %v2621_v45 = vpop.f32.mrb[14].mxu1 }
 0xb45   : > { %v7367_v46 = vadd.f32 %v4464_v44, %v2621_v45  ;;  %v4701_v47 = vpop.f32.mrb[15].mxu1 }
 0xb47   : > { %4729 = vmatmul.mubr.msk.f32.vlgmr.msra.gmra.mrb[12].mxu0 %vm1733_vm2, %v7367_v46 }
 0xb48   : > { %4749 = vmatprep.mubr.msk.f32.mxu0 %vm6468_vm0, %v6469_v1 }
 0xb4c   : > { %v4723_v11 = vpop.f32.mrb[16].mxu1 }
 0xb4d   : > { %v2794_v13 = vpop.f32.mrb[17].mxu1  ;;  %v2800_v14 = vadd.f32 %v4723_v11, %v4469_v12 }
 0xb4e   : > { %v2795_v15 = vadd.f32 %v4469_v12, %v2794_v13 }
 0xb50   : > { %v4872_v16 = vpack.c.bf16 %v2800_v14, %v2795_v15  ;;  %v7386_v17 = vpack.i.bf16 %v2800_v14, %v2795_v15 }
 0xb52   : > { %4873 = vmatpush3.bf16.msra.mxu1 %v4872_v16 }
 0xb53   : > { %4874 = vmatprep.subr.bf16.mxu1 %v6467_v0 }
 0xc1a   : > { %v2882_v63 = vpop.f32.mrb[12].mxu0 }
 0xc1b   : > { %v2883_v2 = vadd.f32 %v2882_v63, %v7379_v62  ;;  %v4730_v3 = vpop.f32.mrb[13].mxu0 }
 0xc1d   : > { %v2887_v4 = vsel %vm2886_vm7, %v2883_v2, -inf }
 0xc1e   : > { %2888 = vmax.xlane.f32.xlu0 %v2887_v4 }
 0xcab   : > { %v2889_v5 = vpop.xlane.xlu0 %2888 }
 0xcac   : > { %v2890_v6 = vsub.f32 %v2883_v2, %v2889_v5 }
 0xcae   : > { %v2891_v7 = vmul.f32 1.442695, %v2890_v6 }
 0xcb0   : > { %5343 = vpow2.f32 %v2891_v7 }
 0xcba   : > { %v5344_v8 = vpop.eup %5343 }
 0xcbb   : > { %v2893_v9 = vsel %vm2886_vm7, %v5344_v8, 0.0 }
 0xcbc   : > { %2894 = vadd.xlane.f32.xlu0 %v2893_v9 }
 0xcd2   : > { %2975 = vrot.lane.b32.xlu0 %v7367_v46, %s6471_s8 }
 0xd49   : > { %v2895_v18 = vpop.xlane.xlu0 %2894 }
 0xd4a   : > { %5345 = vrcp.f32 %v2895_v18 }
 0xd4d   : > { %v2976_v27 = vpop.permute.xlu0 %2975 }
 0xd54   : > { %v5346_v10 = vpop.eup %5345 }
 0xd55   : > { %v2897_v20 = vmul.f32 %v5346_v10, %v2895_v18 }
 0xd57   : > { %v2898_v21 = vsub.f32 2.0, %v2897_v20 }
 0xd59   : > { %v2899_v24 = vmul.f32 %v5346_v10, %v2898_v21 }
 0xd5b   : > { %v2900_v25 = vmul.f32 %v5344_v8, %v2899_v24 }
 0xd5d   : > { %3517 = vst.msk [vmem:[%s7391_s25] sm:$0xff] %vm2886_vm7, %v2900_v25  ;;  %4736 = vmatmul.mubr.msk.f32.vlgmr.msra.gmra.mrb[18].mxu1 %vm2886_vm7, %v2900_v25 }
 0xd5e   : > { %4877 = vmatpush3.bf16.xpose.msk.msra.mxu1 %vm7356_vm6, %v4875_v26  ;;  %4742 = vmatprep.mubr.msk.f32.mxu1 %vm6468_vm0, %v6469_v1 }
 0xd5f   : > { %4885 = vmatprep.subr.bf16.mxu1 %v6467_v0 }
 0xd65   : > { %4743 = vmatmul.mubr.msk.f32.vlgmr.msra.gmra.mrb[20].mxu1 %vm1733_vm2, %v2976_v27 }
 0xd66   : > { %4763 = vmatprep.mubr.msk.f32.mxu1 %vm6468_vm0, %v6469_v1 }
 0xe30   : > { %v2970_v28 = vpop.f32.mrb[18].mxu1 }
 0xe31   : > { %2974 = vst.msk [vmem:[#allocation2] sm:$0xff] %vm1733_vm2, %v2970_v28  ;;  %v4737_v29 = vpop.f32.mrb[19].mxu1 }
 0xe38   : > { %v3053_v30 = vpop.f32.mrb[20].mxu1 }
 0xe39   : > { %v3054_v31 = vadd.f32 %v3053_v30, %v7379_v62  ;;  %v4744_v32 = vpop.f32.mrb[21].mxu1 }
 0xe3b   : > { %v3057_v33 = vsel %vm2886_vm7, %v3054_v31, -inf }
 0xe3c   : > { %3058 = vmax.xlane.f32.xlu1 %v3057_v33 }
 0xe4d   : > { %5301 = vrot.lane.b32.xlu1 %v7386_v17, %s6471_s8  ;;  %s6211_s8 = scalar_lea.vmem %s7494_s26, 512 }
 0xe4e   : > { %p6212_p2 = scmp.ne.s32.totalorder %s7494_s26, %s6211_s8 }
 0xe50   : > { %p6213_p8 = pnand %p6212_p2, %p7772_p11 }
 0xe51   : > { %3157 = vrot.lane.b32.xlu1 %v7367_v46, %s6470_s23 }
 0xe52   : > { %p6214_p12 = pneg %p6213_p8 }
 0xec9   : > { %v3059_v34 = vpop.xlane.xlu1 %3058 }
 0xeca   : > { %v3060_v36 = vsub.f32 %v3054_v31, %v3059_v34 }
 0xecc   : > { %v3061_v37 = vmul.f32 1.442695, %v3060_v36 }
 0xecd   : > { %v5302_v38 = vpop.permute.xlu1 %5301 }
 0xece   : > { %5347 = vpow2.f32 %v3061_v37  ;;  %v5304_v39 = vunpack.i.h.bf16 %v5302_v38  ;;  %v5303_v40 = vunpack.i.l.bf16 %v5302_v38 }
 0xed0   : > { %v4879_v42 = vpack.c.bf16 %v5304_v39, %v5303_v40 }
 0xed1   : > { %v3158_v57 = vpop.permute.xlu1 %3157 }
 0xed2   : > { %4880 = vmatpush3.bf16.msra.mxu0 %v4879_v42 }
 0xed3   : > { %4881 = vmatprep.subr.bf16.mxu0 %v6467_v0 }
 0xed8   : > { %v5348_v44 = vpop.eup %5347 }
 0xed9   : > { %v3063_v45 = vsel %vm2886_vm7, %v5348_v44, 0.0 }
 0xeda   : > { %3064 = vadd.xlane.f32.xlu0 %v3063_v45  ;;  %v3522_v45 = vld [vmem:[#allocation35] sm:$0xff] }
 0xef0   : > { %5306 = vrot.lane.b32.xlu0 %v7360_v43, %s6470_s23 }
 0xf67   : > { %v3065_v47 = vpop.xlane.xlu0 %3064 }
 0xf68   : > { %5349 = vrcp.f32 %v3065_v47 }
 0xf6b   : > { %v5307_v50 = vpop.permute.xlu0 %5306 }
 0xf6c   : > { %v5309_v52 = vunpack.i.h.bf16 %v5307_v50  ;;  %v5308_v53 = vunpack.i.l.bf16 %v5307_v50  ;;  %v3525_v50 = vld [vmem:[#allocation35 + $0x18] sm:$0xff] }
 0xf6e   : > { %v4882_v56 = vpack.c.bf16 %v5309_v52, %v5308_v53 }
 0xf72   : > { %v5350_v48 = vpop.eup %5349 }
 0xf73   : > { %v3067_v49 = vmul.f32 %v5350_v48, %v3065_v47  ;;  %v3523_v47 = vld [vmem:[#allocation35 + $0x8] sm:$0xff] }
 0xf75   : > { %v3068_v51 = vsub.f32 2.0, %v3067_v49  ;;  %v3524_v49 = vld [vmem:[#allocation35 + $0x10] sm:$0xff] }
 0xf77   : > { %v3069_v54 = vmul.f32 %v5350_v48, %v3068_v51  ;;  %v4896_v48 = vpack.c.bf16 %v3523_v47, %v3522_v45  ;;  %v4899_v51 = vpack.c.bf16 %v3525_v50, %v3524_v49 }
 0xf79   : > { %v3070_v55 = vmul.f32 %v5348_v44, %v3069_v54 }
 0xf7b   : > { %3518 = vst.msk [vmem:[%s7391_s25 + $0x8] sm:$0xff] %vm2886_vm7, %v3070_v55  ;;  %4750 = vmatmul.mubr.msk.f32.vlgmr.msra.gmra.mrb[14].mxu0 %vm2886_vm7, %v3070_v55 }
 0xf7c   : > { %4884 = vmatpush3.bf16.xpose.msk.msra.mxu0 %vm7356_vm6, %v4882_v56  ;;  %4756 = vmatprep.mubr.msk.f32.mxu0 %vm6468_vm0, %v6469_v1  ;;  %v4488_v56 = vld [vmem:[#allocation36] ss:$0 sm:$0xff] }
 0xf7d   : > { %4892 = vmatprep.subr.bf16.mxu0 %v6467_v0 }
 0xf83   : > { %4757 = vmatmul.mubr.msk.f32.vlgmr.msra.gmra.mrb[16].mxu0 %vm1733_vm2, %v3158_v57 }
 0xf84   : > { %4777 = vmatprep.mubr.msk.f32.mxu0 %vm6468_vm0, %v6469_v1 }
0x104e   : > { %v7426_v58 = vpop.f32.mrb[14].mxu0 }
0x104f   : > { %v4751_v59 = vpop.f32.mrb[15].mxu0 }
0x1056   : > { %v3235_v60 = vpop.f32.mrb[16].mxu0 }
0x1057   : > { %v3236_v61 = vadd.f32 %v3235_v60, %v7379_v62  ;;  %v4758_v63 = vpop.f32.mrb[17].mxu0 }
0x1059   : > { %v3239_v2 = vsel %vm2886_vm7, %v3236_v61, -inf }
0x105a   : > { %3240 = vmax.xlane.f32.xlu1 %v3239_v2 }
0x106b   : > { %5316 = vrot.lane.b32.xlu1 %v7360_v43, %s6472_s14 }
0x106f   : > { %3337 = vrot.lane.b32.xlu1 %v7367_v46, %s6472_s14 }
0x10e7   : > { %v3241_v3 = vpop.xlane.xlu1 %3240 }
0x10e8   : > { %v3242_v4 = vsub.f32 %v3236_v61, %v3241_v3 }
0x10ea   : > { %v3243_v5 = vmul.f32 1.442695, %v3242_v4 }
0x10eb   : > { %v5317_v13 = vpop.permute.xlu1 %5316 }
0x10ec   : > { %5351 = vpow2.f32 %v3243_v5  ;;  %v5319_v16 = vunpack.i.h.bf16 %v5317_v13  ;;  %v5318_v18 = vunpack.i.l.bf16 %v5317_v13  ;;  %v3724_v13 = vld [vmem:[#allocation44 + $0x18] sm:$0xff] }
0x10ee   : > { %v4889_v20 = vpack.c.bf16 %v5319_v16, %v5318_v18  ;;  %v3726_v16 = vld [vmem:[#allocation44 + $0x28] sm:$0xff] }
0x10ef   : > { %v3338_v21 = vpop.permute.xlu1 %3337 }
0x10f6   : > { %v5352_v6 = vpop.eup %5351 }
0x10f7   : > { %v3245_v7 = vsel %vm2886_vm7, %v5352_v6, 0.0 }
0x10f8   : > { %3246 = vadd.xlane.f32.xlu0 %v3245_v7  ;;  %v3637_v7 = vld [vmem:[#allocation41 + $0x8] sm:$0xff] }
0x110e   : > { %5311 = vrot.lane.b32.xlu0 %v7386_v17, %s6470_s23  ;;  %s3847_s23 = scalar_lea.sflag [#allocation52], %s7154_s3 }
0x1185   : > { %v3247_v8 = vpop.xlane.xlu0 %3246 }
0x1186   : > { %5353 = vrcp.f32 %v3247_v8 }
0x1189   : > { %v5312_v9 = vpop.permute.xlu0 %5311 }
0x118a   : > { %v5314_v11 = vunpack.i.h.bf16 %v5312_v9  ;;  %v5313_v43 = vunpack.i.l.bf16 %v5312_v9  ;;  %v3639_v9 = vld [vmem:[#allocation41 + $0x18] sm:$0xff] }
0x118c   : > { %v4886_v12 = vpack.c.bf16 %v5314_v11, %v5313_v43  ;;  %v3722_v43 = vld [vmem:[#allocation44 + $0x8] sm:$0xff] }
0x118e   : > { %4887 = vmatpush3.bf16.msra.mxu1 %v4886_v12  ;;  %v3723_v12 = vld [vmem:[#allocation44 + $0x10] sm:$0xff] }
0x118f   : > { %4888 = vmatprep.subr.bf16.mxu1 %v6467_v0 }
0x1190   : > { %v5354_v46 = vpop.eup %5353 }
0x1191   : > { %v3249_v14 = vmul.f32 %v5354_v46, %v3247_v8 }
0x1193   : > { %v3250_v15 = vsub.f32 2.0, %v3249_v14  ;;  %v4911_v14 = vpack.c.bf16 %v3724_v13, %v3723_v12 }
0x1195   : > { %v3251_v10 = vmul.f32 %v5354_v46, %v3250_v15  ;;  %v3725_v15 = vld [vmem:[#allocation44 + $0x20] sm:$0xff] }
0x1196   : > { %v4914_v18 = vpack.c.bf16 %v3726_v16, %v3725_v15 }
0x1197   : > { %v3252_v19 = vmul.f32 %v5352_v6, %v3251_v10  ;;  %v3636_v6 = vld [vmem:[#allocation41] sm:$0xff] }
0x1198   : > { %v4902_v8 = vpack.c.bf16 %v3637_v7, %v3636_v6 }
0x1199   : > { %3519 = vst.msk [vmem:[%s7391_s25 + $0x10] sm:$0xff] %vm2886_vm7, %v3252_v19  ;;  %4764 = vmatmul.mubr.msk.f32.vlgmr.msra.gmra.mrb[22].mxu1 %vm2886_vm7, %v3252_v19 }
0x119a   : > { %4891 = vmatpush3.bf16.xpose.msk.msra.mxu1 %vm7356_vm6, %v4889_v20  ;;  %4770 = vmatprep.mubr.msk.f32.mxu1 %vm6468_vm0, %v6469_v1 }
0x119b   : > { %4901 = vmatprep.subr.bf16.mxu1 %v6467_v0 }
0x11a1   : > { %4771 = vmatmul.mubr.msk.f32.vlgmr.msra.gmra.mrb[24].mxu1 %vm1733_vm2, %v3338_v21 }
0x11a2   : > { %4799 = vmatprep.mubr.msk.f32.mxu1 %vm6468_vm0, %v6469_v1  ;;  %4903 = vmatpush3.bf16.msra.mxu1 %v4902_v8 }
0x11a3   : > { %4904 = vmatprep.subr.bf16.mxu1 %v6467_v0 }
0x126c   : > { %v3328_v22 = vpop.f32.mrb[22].mxu1 }
0x126d   : > { %v4765_v23 = vpop.f32.mrb[23].mxu1 }
0x1274   : > { %v3415_v24 = vpop.f32.mrb[24].mxu1 }
0x1275   : > { %v3416_v25 = vadd.f32 %v3415_v24, %v7379_v62  ;;  %v4772_v26 = vpop.f32.mrb[25].mxu1  ;;  %v4491_v24 = vld [vmem:[#allocation39] ss:$0 sm:$0xff] }
0x1277   : > { %v3419_v41 = vsel %vm2886_vm7, %v3416_v25, -inf }
0x1278   : > { %3420 = vmax.xlane.f32.xlu0 %v3419_v41  ;;  %v3727_v41 = vld [vmem:[#allocation44 + $0x30] sm:$0xff] }
0x128e   : > { %5321 = vrot.lane.b32.xlu0 %v7386_v17, %s6472_s14  ;;  %s6476_s14 = smov [#allocation51]  }
0x128f   : > { %s6215_s5 = sshll.u32 %s6476_s14, 4  ;;  %s6216_s5 = int_to_ptr.vmem [resolvable:$false] %s6215_s5 }
0x1290   : > { %p6218_p5 = scmp.lt.s32.totalorder %s7494_s26, %s6216_s5 }
0x1292   : > { %3333 = vrot.lane.b32.xlu0 %v3328_v22, %s6474_s27  ;;  %v4490_v22 = vld [vmem:[#allocation38] ss:$0 sm:$0xff]  ;;  %s6217_s27 = scalar_lea.vmem %s6216_s5, 1024 }
0x1293   : > { %p6219_p13 = scmp.lt.s32.totalorder %s6217_s27, %s6211_s8 }
0x1295   : > { %p6220_p1 = por %p6219_p13, %p6218_p5 }
0x1297   : > { %p6221_p0 = pnand %p6220_p1, %p6214_p12 }
0x1305   : > { %v3421_v27 = vpop.xlane.xlu0 %3420 }
0x1306   : > { %v3422_v28 = vsub.f32 %v3416_v25, %v3421_v27  ;;  %v3728_v27 = vld [vmem:[#allocation44 + $0x38] sm:$0xff] }
0x1308   : > { %v3423_v29 = vmul.f32 1.442695, %v3422_v28  ;;  %v4917_v28 = vpack.c.bf16 %v3728_v27, %v3727_v41 }
0x1309   : > { %v5322_v30 = vpop.permute.xlu0 %5321 }
0x130a   : > { %5355 = vpow2.f32 %v3423_v29  ;;  %v5324_v31 = vunpack.i.h.bf16 %v5322_v30  ;;  %v5323_v32 = vunpack.i.l.bf16 %v5322_v30  ;;  %v4492_v29 = vld [vmem:[#allocation42] ss:$0 sm:$0xff] }
0x130c   : > { %v4893_v33 = vpack.c.bf16 %v5324_v31, %v5323_v32 }
0x130d   : > { %v3334_v37 = vpop.permute.xlu0 %3333 }
0x130e   : > { %4894 = vmatpush3.bf16.msra.mxu0 %v4893_v33  ;;  %v4494_v33 = vld [vmem:[#allocation45] ss:$0 sm:$0xff] }
0x130f   : > { %4895 = vmatprep.subr.bf16.mxu0 %v6467_v0 }
0x1314   : > { %v5356_v62 = vpop.eup %5355 }
0x1315   : > { %v3425_v34 = vsel %vm2886_vm7, %v5356_v62, 0.0 }
0x1316   : > { %3426 = vadd.xlane.f32.xlu1 %v3425_v34 }
0x1327   : > { %3153 = vrot.lane.b32.xlu1 %v7426_v58, %s6473_s12 }
0x13a3   : > { %v3427_v17 = vpop.xlane.xlu1 %3426 }
0x13a4   : > { %5357 = vrcp.f32 %v3427_v17 }
0x13a7   : > { %v3154_v36 = vpop.permute.xlu1 %3153 }
0x13a8   : > { %3156 = vst.msk [vmem:[#allocation2] sm:$0xff] %vm2071_vm3, %v3154_v36 }
0x13a9   : > { %3336 = vst.msk [vmem:[#allocation2] sm:$0xff] %vm2245_vm4, %v3334_v37 }
0x13ae   : > { %v5358_v38 = vpop.eup %5357 }
0x13af   : > { %v3429_v39 = vmul.f32 %v5358_v38, %v3427_v17 }
0x13b1   : > { %v3430_v40 = vsub.f32 2.0, %v3429_v39 }
0x13b3   : > { %v3431_v42 = vmul.f32 %v5358_v38, %v3430_v40 }
0x13b5   : > { %v3432_v44 = vmul.f32 %v5356_v62, %v3431_v42 }
0x13b7   : > { %3520 = vst.msk [vmem:[%s7391_s25 + $0x18] sm:$0xff] %vm2886_vm7, %v3432_v44  ;;  %4778 = vmatmul.mubr.msk.f32.vlgmr.msra.gmra.mrb[18].mxu0 %vm2886_vm7, %v3432_v44 }
0x13b8   : > { %4788 = vmatprep.mubr.msk.f32.mxu0 %vm6468_vm0, %v6469_v1  ;;  %4897 = vmatpush3.bf16.msra.mxu0 %v4896_v48 }
0x13b9   : > { %4898 = vmatprep.subr.bf16.mxu0 %v6467_v0 }
0x13bc   : > { %4900 = vmatpush3.bf16.msra.mxu0 %v4899_v51 }
0x13bd   : > { %4907 = vmatprep.subr.bf16.mxu0 %v6467_v0 }
0x148a   : > { %v3508_v52 = vpop.f32.mrb[18].mxu0 }
0x148b   : > { %3513 = vrot.lane.b32.xlu1 %v3508_v52, %s6475_s15  ;;  %v4779_v53 = vpop.f32.mrb[19].mxu0 }
0x14fd   : > { %v3514_v54 = vpop.permute.xlu1 %3513 }
0x14fe   : > { %3516 = vst.msk [vmem:[#allocation2] sm:$0xff] %vm2419_vm5, %v3514_v54 }
0x1505   : > { %v3521_v55 = vld [vmem:[#allocation2] sm:$0xff] }
0x1506   : > { %4789 = vmatmul.mubr.msk.f32.vlgmr.msra.gmra.mrb[20].mxu0 %vm1497_vm1, %v3521_v55 }
0x1507   : > { %4818 = vmatprep.mubr.msk.f32.mxu0 %vm6468_vm0, %v6469_v1  ;;  %v3638_v1 = vld [vmem:[#allocation41 + $0x10] sm:$0xff] }
0x1508   : > { %v4905_v11 = vpack.c.bf16 %v3639_v9, %v3638_v1 }
0x150a   : > { %4906 = vmatpush3.bf16.msra.mxu1 %v4905_v11 }
0x15d9   : > { %v3602_v57 = vpop.f32.mrb[20].mxu0 }
0x15da   : > { %v3603_v58 = vadd.f32 %v4488_v56, %v3602_v57  ;;  %v4790_v59 = vpop.f32.mrb[21].mxu0 }
0x15dc   : > { %v3608_v60 = vadd.f32 %v3603_v58, %v7349_v35  ;;  %v3721_v35 = vld [vmem:[#allocation44] sm:$0xff] }
0x15dd   : > { %v4908_v46 = vpack.c.bf16 %v3722_v43, %v3721_v35 }
0x15de   : > { %v3609_v61 = vsel %vm1497_vm1, %v3608_v60, 0.0 }
0x15df   : > { %3610 = vadd.xlane.f32.xlu0 %v3609_v61  ;;  %4909 = vmatpush3.bf16.msra.mxu0 %v4908_v46 }
0x15e0   : > { %4910 = vmatprep.subr.bf16.mxu0 %v6467_v0 }
0x15e3   : > { %4912 = vmatpush3.bf16.msra.mxu0 %v4911_v14 }
0x15e4   : > { %4913 = vmatprep.subr.bf16.mxu0 %v6467_v0 }
0x15e7   : > { %4915 = vmatpush3.bf16.msra.mxu0 %v4914_v18 }
0x15e8   : > { %4916 = vmatprep.subr.bf16.mxu0 %v6467_v0 }
0x15eb   : > { %4918 = vmatpush3.bf16.msra.mxu0 %v4917_v28 }
0x166c   : > { %v3611_v63 = vpop.xlane.xlu0 %3610 }
0x166d   : > { %v3612_v2 = vmul.f32 0.03125, %v3611_v63 }
0x166f   : > { %v3613_v3 = vsub.f32 %v3608_v60, %v3612_v2 }
0x1671   : > { %v3614_v4 = vmul.f32 %v3613_v3, %v3613_v3 }
0x1673   : > { %v3615_v5 = vsel %vm1497_vm1, %v3614_v4, 0.0 }
0x1674   : > { %3616 = vadd.xlane.f32.xlu1 %v3615_v5 }
0x1701   : > { %v3617_v10 = vpop.xlane.xlu1 %3616 }
0x1702   : > { %v3618_v19 = vmul.f32 0.03125, %v3617_v10 }
0x1704   : > { %v3619_v20 = vadd.f32 1e-05, %v3618_v19 }
0x1706   : > { %5359 = vrsqrt.f32 %v3619_v20 }
0x1710   : > { %v5360_v21 = vpop.eup %5359 }
0x1711   : > { %v3621_v23 = vmul.f32 %v5360_v21, %v3613_v3 }
0x1713   : > { %v3628_v25 = vmul.f32 %v4490_v22, %v3621_v23 }
0x1715   : > { %v3635_v26 = vadd.f32 %v4491_v24, %v3628_v25 }
0x1717   : > { %4800 = vmatmul.mubr.msk.f32.vlgmr.msra.gmra.mrb[26].mxu1 %vm1497_vm1, %v3635_v26 }
0x17ea   : > { %v3716_v30 = vpop.f32.mrb[26].mxu1 }
0x17eb   : > { %v3717_v31 = vadd.f32 %v4492_v29, %v3716_v30  ;;  %v4801_v0 = vpop.f32.mrb[27].mxu1 }
0x17ed   : > { %v3720_v32 = vmax.f32 %v3717_v31, 0.0 }
0x17ef   : > { %4819 = vmatmul.mubr.msk.f32.vlgmr.msra.gmra.mrb[22].mxu0 %vm3736_vm8, %v3720_v32 }
0x18c2   : > { %v3806_v62 = vpop.f32.mrb[22].mxu0 }
0x18c3   : > { %v3807_v34 = vadd.f32 %v4494_v33, %v3806_v62  ;;  %v4820_v17 = vpop.f32.mrb[23].mxu0 }
0x18c5   : > { %v3812_v36 = vadd.f32 %v3807_v34, %v3635_v26 }
0x18c7   : > { %v3813_v37 = vsel %vm1497_vm1, %v3812_v36, 0.0 }
0x18c8   : > { %3814 = vadd.xlane.f32.xlu0 %v3813_v37 }
0x1955   : > { %v3815_v38 = vpop.xlane.xlu0 %3814 }
0x1956   : > { %v3816_v39 = vmul.f32 0.03125, %v3815_v38 }
0x1958   : > { %v7481_v40 = vsub.f32 %v3812_v36, %v3816_v39 }
0x195a   : > { %v3818_v42 = vmul.f32 %v7481_v40, %v7481_v40 }
0x195c   : > { %v3819_v44 = vsel %vm1497_vm1, %v3818_v42, 0.0 }
0x195d   : > { %3820 = vadd.xlane.f32.xlu0 %v3819_v44 }
0x195e   : > { %6224 = shalt.err (!%p6221_p0)
}
0x195f   : > { %s6225_s13 = scalar_lea.hbm %s7491_s17, 512  ;;  %s6229_s15 = scalar_lea.hbm %s7771_s6, 1024 }
0x1960   : > { %p6226_p9 = scmp.ne.s32.totalorder %s7491_s17, %s6225_s13  ;;  %p6230_p10 = scmp.lt.u32.totalorder %s7491_s17, %s7771_s6 }
0x1961   : > { %p6231_p7 = scmp.lt.u32.totalorder %s6229_s15, %s6225_s13  ;;  %p6233_p2 = scmp.lt.u32.totalorder %s6225_s13, %s7491_s17 }
0x1962   : > { %p6227_p4 = pnand %p6226_p9, %p7772_p11 }
0x1963   : > { %p6232_p6 = por %p6231_p7, %p6230_p10 }
0x1964   : > { %p6228_p3 = pneg %p6227_p4 }
0x1965   : > { %p6234_p8 = por %p6233_p2, %p6232_p6 }
0x1967   : > { %p6235_p12 = pnand %p6234_p8, %p6228_p3 }
0x1969   : > { %6238 = shalt.err (!%p6235_p12)
}
0x196a   : > { %s6477_s8 = smov 128   ;;  %s7773_s14 = sld [smem:[#allocation104_spill]] }
0x196b   : > { %5032 = dma.vmem_to_hbm [thread:$0]  (%p7772_p11), %s7494_s26, 512, %s7491_s17, %s3847_s23, %s6477_s8, %s6477_s8, %s6473_s12  }
0x196c   : > { %s6239_s27 = scalar_lea.vmem %s7521_s19, 512  ;;  %s6478_s13 = smov [#allocation53]  }
0x196d   : > { %p6240_p5 = scmp.ne.s32.totalorder %s7521_s19, %s6239_s27  ;;  %s6243_s15 = sshll.u32 %s6478_s13, 4  ;;  %s6244_s15 = int_to_ptr.vmem [resolvable:$false] %s6243_s15 }
0x196e   : > { %s6245_s9 = scalar_lea.vmem %s6244_s15, 1024  ;;  %p6246_p0 = scmp.lt.s32.totalorder %s7521_s19, %s6244_s15 }
0x196f   : > { %p6241_p13 = pnand %p6240_p5, %p7772_p11  ;;  %p6247_p9 = scmp.lt.s32.totalorder %s6245_s9, %s6239_s27 }
0x1970   : > { %s7526_s5 = scalar_lea.hbm %s7773_s14, %s4509_s4 }
0x1971   : > { %p6242_p1 = pneg %p6241_p13  ;;  %p6248_p4 = por %p6247_p9, %p6246_p0 }
0x1973   : > { %p6249_p3 = pnand %p6248_p4, %p6242_p1 }
0x1975   : > { %6252 = shalt.err (!%p6249_p3)
}
0x1976   : > { %s6253_s25 = scalar_lea.hbm %s7526_s5, 512  ;;  %s6257_s4 = scalar_lea.hbm %s7773_s14, 1024 }
0x1977   : > { %p6254_p10 = scmp.ne.s32.totalorder %s7526_s5, %s6253_s25  ;;  %p6258_p2 = scmp.lt.u32.totalorder %s7526_s5, %s7773_s14 }
0x1978   : > { %p6259_p8 = scmp.lt.u32.totalorder %s6257_s4, %s6253_s25  ;;  %p6261_p5 = scmp.lt.u32.totalorder %s6253_s25, %s7526_s5 }
0x1979   : > { %p6255_p7 = pnand %p6254_p10, %p7772_p11 }
0x197a   : > { %p6260_p12 = por %p6259_p8, %p6258_p2 }
0x197b   : > { %p6256_p6 = pneg %p6255_p7 }
0x197c   : > { %p6262_p13 = por %p6261_p5, %p6260_p12 }
0x197e   : > { %p6263_p1 = pnand %p6262_p13, %p6256_p6 }
0x1980   : > { %6266 = shalt.err (!%p6263_p1)
}
0x1981   : > { %s7774_s9 = sld [smem:[#allocation102_spill]]  ;;  %v4496_v50 = vld [vmem:[#allocation47] ss:$0 sm:$0xff]  ;;  %v4497_v52 = vld [vmem:[#allocation48] ss:$0 sm:$0xff]  ;;  %s4501_s17 = sshll.u32 %s6671_s11, 7 }
0x1982   : > { %5033 = dma.vmem_to_hbm [thread:$0]  (%p7772_p11), %s7521_s19, 512, %s7526_s5, %s3847_s23, %s6477_s8, %s6477_s8, %s6473_s12  }
0x1983   : > { %s7775_s26 = sshll.u32 %s7141_s20, 3  ;;  %s3842_s12 = scalar_lea.sflag [#allocation5], %s7141_s20 }
0x1984   : > { %s1458_s3 = scalar_lea.vmem [#allocation50], %s7775_s26  ;;  %s6479_s11 = smov [#allocation50]  }
0x1985   : > { %s3865_s27 = sshll.u32 %s1458_s3, 4  ;;  %s6271_s23 = sshll.u32 %s6479_s11, 4  ;;  %s7557_s27 = int_to_ptr.vmem [resolvable:$true] %s3865_s27  ;;  %s6272_s23 = int_to_ptr.vmem [resolvable:$false] %s6271_s23 }
0x1986   : > { %s6267_s19 = scalar_lea.vmem %s7557_s27, 128  ;;  %s6273_s8 = scalar_lea.vmem %s6272_s23, 256 }
0x1987   : > { %s7555_s13 = scalar_lea.hbm %s7774_s9, %s4501_s17  ;;  %p6268_p0 = scmp.ne.s32.totalorder %s7557_s27, %s6267_s19 }
0x1988   : > { %p6274_p3 = scmp.lt.s32.totalorder %s7557_s27, %s6272_s23  ;;  %p6275_p10 = scmp.lt.s32.totalorder %s6273_s8, %s6267_s19 }
0x1989   : > { %p6269_p9 = pnand %p6268_p0, %p7772_p11 }
0x198a   : > { %p6276_p7 = por %p6275_p10, %p6274_p3 }
0x198b   : > { %p6270_p4 = pneg %p6269_p9 }
0x198d   : > { %p6277_p6 = pnand %p6276_p7, %p6270_p4 }
0x19ea   : > { %v3821_v45 = vpop.xlane.xlu0 %3820 }
0x19eb   : > { %v3822_v47 = vmul.f32 0.03125, %v3821_v45 }
0x19ed   : > { %v3823_v48 = vadd.f32 1e-05, %v3822_v47 }
0x19ef   : > { %5361 = vrsqrt.f32 %v3823_v48 }
0x19f9   : > { %v5362_v49 = vpop.eup %5361 }
0x19fa   : > { %v3825_v51 = vmul.f32 %v5362_v49, %v7481_v40 }
0x19fc   : > { %v3832_v53 = vmul.f32 %v4496_v50, %v3825_v51 }
0x19fe   : > { %v3839_v54 = vadd.f32 %v4497_v52, %v3832_v53 }
0x1a00   : > { %3840 = vst.msk [vmem:[%s1458_s3] sm:$0xff] %vm1497_vm1, %v3839_v54 }
0x1a01   : > { %6280 = shalt.err (!%p6277_p6)
}
0x1a02   : > { %s6281_s20 = scalar_lea.hbm %s7555_s13, 128  ;;  %s6285_s5 = scalar_lea.hbm %s7774_s9, 256 }
0x1a03   : > { %p6282_p2 = scmp.ne.s32.totalorder %s7555_s13, %s6281_s20  ;;  %p6286_p5 = scmp.lt.u32.totalorder %s7555_s13, %s7774_s9 }
0x1a04   : > { %p6287_p13 = scmp.lt.u32.totalorder %s6285_s5, %s6281_s20  ;;  %p6289_p0 = scmp.lt.u32.totalorder %s6281_s20, %s7555_s13 }
0x1a05   : > { %p6283_p8 = pnand %p6282_p2, %p7772_p11 }
0x1a06   : > { %p6288_p1 = por %p6287_p13, %p6286_p5 }
0x1a07   : > { %p6284_p12 = pneg %p6283_p8 }
0x1a08   : > { %p6290_p9 = por %p6289_p0, %p6288_p1 }
0x1a0a   : > { %p6291_p4 = pnand %p6290_p9, %p6284_p12 }
0x1a0c   : > { %6294 = shalt.err (!%p6291_p4)
}
0x1a0d   : > { %5031 = dma.vmem_to_hbm [thread:$0]  (%p7772_p11), %s7557_s27, 128, %s7555_s13, %s3842_s12  }
0x1a0e PF: > { %s3909_s15 = sand.u32 1, %s6389_s0   ;;  %p7776_p3 = scmp.ne.s32.totalorder %s7713_s7, 0 }
0x1a0f   : > { %p7777_p10 = scmp.ge.s32.totalorder %s6401_s2, 2  ;;  %s3910_s25 = scalar_lea.sflag [#allocation5], %s3909_s15 }
0x1a11   : > { %p5130_p7 = pnand %p7777_p10, %p7776_p3 }
0x1a13   : > { %6380 = dma.done.wait (!%p5130_p7), %s3910_s25, 128  }
0x1a14   : > { %6382 = vsyncadd (!%p5130_p7), %s3910_s25, 4294967168  ;;  %s7778_s4 = sadd.s32 4294967294, %s6401_s2  }
0x1a15   : > { %s3918_s17 = sand.u32 1, %s7778_s4  }
0x1a16   : > { %s3919_s26 = scalar_lea.sflag [#allocation52], %s3918_s17 }
0x1a17   : > { %6384 = dma.done.wait (!%p5130_p7), %s3919_s26, 1024  }
0x1a18   : > { %6386 = vsyncadd (!%p5130_p7), %s3919_s26, 4294966272  ;;  %p101_p11 = scmp.ge.s32.totalorder %s6853_s10, 4   ;;  %s7779_s0 = smov %s6393_s28 }
0x1a19   : > { %s7780_s28 = smov %s6397_s1  ;;  %s7781_s1 = smov %s6865_s16 }
0x1a1a   : > { %s7782_s2 = smov %s6853_s10  ;;  %103 = sbr.rel (!%p101_p11) target bundleno = 95 (0x5f), region = 390 }
0x1a21   :  { %3933 = vsyncpa [#allocation4], 1 }
0x1a22   :  { %3935 = vsyncpa [#allocation4 + $0x1], 1 }
0x1a23   :  { %3936 = vsyncpa [#allocation7], 1 }
0x1a24   :  { %3938 = vsyncpa [#allocation7 + $0x1], 1 }
0x1a25   :  { %3939 = vsyncpa [#allocation10], 1 }
0x1a26   :  { %3941 = vsyncpa [#allocation10 + $0x1], 1 }
0x1a27   :  { %3942 = vsyncpa [#allocation13], 1 }
0x1a28   :  { %3943 = vsyncpa [#allocation16], 1 }
0x1a29   :  { %3944 = vsyncpa [#allocation19], 1 }
0x1a2a   :  { %3945 = vsyncpa [#allocation22], 1 }
0x1a2b   :  { %3946 = vsyncpa [#allocation25], 1 }
0x1a2c   :  { %3947 = vsyncpa [#allocation28], 1 }
0x1a2d   :  { %3948 = vsyncpa [#allocation31], 1 }
0x1a2e   :  { %3949 = vsyncpa [#allocation34], 1 }
0x1a2f   :  { %3950 = vsyncpa [#allocation37], 1 }
0x1a30   :  { %3951 = vsyncpa [#allocation40], 1 }
0x1a31   :  { %3952 = vsyncpa [#allocation43], 1 }
0x1a32   :  { %3953 = vsyncpa [#allocation46], 1 }
0x1a33   :  { %3954 = vsyncpa [#allocation49], 1 }
0x1a34   :  { %3955 = vsyncpa [#allocation5], 1 }
0x1a35   :  { %3957 = vsyncpa [#allocation5 + $0x1], 1 }
0x1a36   :  { %3958 = vsyncpa [#allocation52], 1 }
0x1a37   :  { %3960 = vsyncpa [#allocation52 + $0x1], 1 }

</bundles_post_ra>
